<compile_context>
chip_gen: v6e
topology: v6e:2x2x1
jax: 0.10.0
libtpu: 0.0.40
codegen_flags: <defaults>
</compile_context>

<pallas_src>
import functools

import jax
import jax.numpy as jnp
from jax.experimental import pallas as pl
from jax.experimental.pallas import tpu as pltpu


def _make_conv_kernel(ks, Wp, M_out):
    """Conv(ks, stride=1) + bias + LeakyReLU(0.1) over a row-flattened image."""
    taps = ks * ks

    def kernel(x_ref, w_ref, b_ref, o_ref, acc_ref):
        # x_ref  : (1, Limg, Cin)   bf16  flattened padded image (flat = r*Wp + c)
        # w_ref  : (taps, Cin, TN)  bf16  weights, tap-major, Cout tile in lanes
        # b_ref  : (1, TN)          f32   bias (Cout tile)
        # o_ref  : (1, M_out, TN)   f32   virtual output rows (junk cols kept)
        # acc_ref: (M_out, TN)      f32   VMEM accumulator
        xv = x_ref[0]                                    # one aligned full-block load
        acc_ref[...] = jnp.zeros_like(acc_ref)
        for k in range(taps):
            kh, kw = divmod(k, ks)
            off = kh * Wp + kw                           # static element shift
            # bf16 x bf16 -> f32 on the MXU; shift handled by slicing the f32
            # product rows (32-bit relayout path), keeping all loads aligned.
            y = jnp.dot(xv, w_ref[k], preferred_element_type=jnp.float32)
            acc_ref[...] += y[off:off + M_out, :]
        a = acc_ref[...] + b_ref[...]                    # bias (broadcast over rows)
        a = jnp.where(a >= 0.0, a, 0.1 * a)              # LeakyReLU(negative_slope=0.1)
        o_ref[0] = a.astype(o_ref.dtype)

    return kernel


@functools.partial(jax.jit, static_argnames=("ks", "padding"))
def basicblock_forward(x_nchw, weight, bias, *, ks=3, padding=1):
    """Forward pass of Basicblock.

    x_nchw : (N, Cin, H, W)       float32 (PyTorch layout at the boundary)
    weight : (Cout, Cin, KH, KW)
    bias   : (Cout,)
    returns: (N, Cout, Hout, Wout)
    """
    N, Cin, H, W = x_nchw.shape
    Cout = weight.shape[0]
    p = padding

    Hp, Wp = H + 2 * p, W + 2 * p
    Hout, Wout = Hp - ks + 1, Wp - ks + 1
    taps = ks * ks

    # Lane-dense Cout tile: 256 where it divides (v6e/v7x MXU width), else 128
    # (v5e native width and the minimum lane-dense store width).
    Cout_pad = ((Cout + 127) // 128) * 128
    TN = 256 if Cout_pad % 256 == 0 else 128
    n_ct = Cout_pad // TN

    # One "virtual" output row per (h, w) with w running over the padded width Wp;
    # rows with w >= Wout are junk and dropped in the wrapper.  The ~(Wp-Wout)/Wp
    # extra MXU work buys fully static, aligned kernel accesses (no in-kernel
    # gather / reshape / im2col).
    M_out = Hout * Wp
    max_off = (ks - 1) * (Wp + 1)
    Limg = M_out + max_off                               # rows needed for largest shift

    # ---- cheap wrapper-side prep (only input/weight/output-sized arrays) ----
    x_nhwc = jnp.transpose(x_nchw, (0, 2, 3, 1)).astype(jnp.bfloat16)
    x_sp = jnp.pad(x_nhwc, ((0, 0), (p, p), (p, p), (0, 0)))
    x_flat = x_sp.reshape(N, Hp * Wp, Cin)
    x_flat = jnp.pad(x_flat, ((0, 0), (0, Limg - Hp * Wp), (0, 0)))

    # weight (Cout, Cin, KH, KW) -> (KH*KW, Cin, Cout_pad), bf16
    w_t = jnp.transpose(weight, (2, 3, 1, 0)).reshape(taps, Cin, Cout)
    w_t = jnp.pad(w_t, ((0, 0), (0, 0), (0, Cout_pad - Cout))).astype(jnp.bfloat16)
    b_t = jnp.pad(bias, (0, Cout_pad - Cout)).reshape(1, Cout_pad).astype(jnp.float32)

    kernel = _make_conv_kernel(ks, Wp, M_out)

    flops = 2 * N * n_ct * Limg * Cin * taps * TN
    bytes_accessed = (n_ct * N * Limg * Cin * 2          # activations (bf16)
                      + taps * Cin * Cout_pad * 2        # weights (bf16)
                      + Cout_pad * 4                     # bias
                      + N * M_out * Cout_pad * 4)        # output (f32)

    # VMEM budget estimate (lane/sublane padding included), with headroom but
    # capped well inside v7x's 64 MiB physical VMEM.
    vmem_est = (2 * Limg * max(Cin, 128) * 2             # double-buffered input block
                + 2 * taps * max(Cin, 8) * TN * 2        # weight block
                + 2 * 8 * TN * 4                         # bias block
                + 2 * M_out * TN * 4                     # output block
                + M_out * TN * 4                         # f32 accumulator scratch
                + 9 * Limg * TN * 4)                     # per-tap f32 intermediates
    vmem_limit = int(min(56 * 2**20, max(32 * 2**20, 2 * vmem_est)))

    out_flat = pl.pallas_call(
        kernel,
        out_shape=jax.ShapeDtypeStruct((N, M_out, Cout_pad), x_nchw.dtype),
        grid_spec=pltpu.PrefetchScalarGridSpec(
            num_scalar_prefetch=0,
            grid=(N, n_ct),
            in_specs=[
                pl.BlockSpec((1, Limg, Cin), lambda n, j: (n, 0, 0)),
                pl.BlockSpec((taps, Cin, TN), lambda n, j: (0, 0, j)),
                pl.BlockSpec((1, TN), lambda n, j: (0, j)),
            ],
            out_specs=pl.BlockSpec((1, M_out, TN), lambda n, j: (n, 0, j)),
            scratch_shapes=[pltpu.VMEM((M_out, TN), jnp.float32)],
        ),
        compiler_params=pltpu.CompilerParams(
            dimension_semantics=("parallel", "parallel"),
            vmem_limit_bytes=vmem_limit,
        ),
        cost_estimate=pl.CostEstimate(
            flops=flops, transcendentals=0, bytes_accessed=bytes_accessed),
    )(x_flat, w_t, b_t)

    # Drop the Cout padding and the junk (w >= Wout) columns; back to NCHW.
    out = out_flat[:, :, :Cout].reshape(N, Hout, Wp, Cout)[:, :, :Wout, :]
    return jnp.transpose(out, (0, 3, 1, 2))


def _reference_forward(x_nchw, weight, bias, ks, padding):
    # Pure-JAX reference (lax conv) for correctness checking.
    out = jax.lax.conv_general_dilated(
        x_nchw,
        weight,
        window_strides=(1, 1),
        padding=[(padding, padding), (padding, padding)],
        dimension_numbers=("NCHW", "OIHW", "NCHW"),
    )
    out = out + bias.reshape(1, -1, 1, 1)
    return jnp.where(out >= 0.0, out, 0.1 * out)


if __name__ == "__main__":
    # Small deterministic problem: batch=2, in_channels=4, out_channels=8, 16x16
    key = jax.random.PRNGKey(0)
    k_x, k_w, k_b = jax.random.split(key, 3)

    N, Cin, Cout, H, W = 2, 4, 8, 16, 16
    ks, padding = 3, 1

    x = jax.random.normal(k_x, (N, Cin, H, W), dtype=jnp.float32)
    fan_in = Cin * ks * ks
    bound = 1.0 / (fan_in ** 0.5)
    weight = jax.random.uniform(
        k_w, (Cout, Cin, ks, ks), dtype=jnp.float32, minval=-bound, maxval=bound
    )
    bias = jax.random.uniform(
        k_b, (Cout,), dtype=jnp.float32, minval=-bound, maxval=bound
    )

    out = basicblock_forward(x, weight, bias, ks=ks, padding=padding)
    out = jax.block_until_ready(out)
    assert out.shape == (N, Cout, H, W), out.shape

    # Check 1: same numerics as the kernel (bf16-rounded inputs, f32 accumulation).
    x_bf = x.astype(jnp.bfloat16).astype(jnp.float32)
    w_bf = weight.astype(jnp.bfloat16).astype(jnp.float32)
    ref_bf = _reference_forward(x_bf, w_bf, bias, ks, padding)
    assert jnp.allclose(out, ref_bf, atol=2e-3, rtol=2e-3), "mismatch vs bf16 reference"

    # Check 2: full-f32 reference — loose tolerance for the intentional bf16 MXU cast.
    ref = _reference_forward(x, weight, bias, ks, padding)
    assert jnp.allclose(out, ref, atol=5e-2, rtol=5e-2), "mismatch vs f32 reference"

    print("KERNEL_OK")
</pallas_src>

<mosaic_0001>
module attributes {stable_mosaic.version = 11 : i64} {
  func.func @kernel(%arg0: i32, %arg1: i32, %arg2: memref<1x326x4xbf16, #tpu.memory_space<vmem>>, %arg3: memref<9x4x128xbf16, #tpu.memory_space<vmem>>, %arg4: memref<1x128xf32, #tpu.memory_space<vmem>>, %arg5: memref<1x288x128xf32, #tpu.memory_space<vmem>>, %arg6: memref<288x128xf32, #tpu.memory_space<vmem>>) attributes {dimension_semantics = [#tpu.dimension_semantics<parallel>, #tpu.dimension_semantics<parallel>], iteration_bounds = array<i64: 2, 1>, scalar_prefetch = 0 : i64, scratch_operands = 1 : i64, tpu.core_type = #tpu.core_type<tc>, window_params = [{transform_indices = @transform_0, window_bounds = array<i64: 1, 326, 4>}, {transform_indices = @transform_1, window_bounds = array<i64: 9, 4, 128>}, {transform_indices = @transform_2, window_bounds = array<i64: 1, 128>}, {transform_indices = @transform_3, window_bounds = array<i64: 1, 288, 128>}]} {
    %c0 = arith.constant 0 : index
    %c0_0 = arith.constant 0 : index
    %c0_1 = arith.constant 0 : index
    %0 = vector.load %arg2[%c0, %c0_0, %c0_1] : memref<1x326x4xbf16, #tpu.memory_space<vmem>>, vector<1x326x4xbf16>
    %1 = vector.shape_cast %0 : vector<1x326x4xbf16> to vector<326x4xbf16>
    %cst = arith.constant 0.000000e+00 : f32
    %2 = vector.broadcast %cst : f32 to vector<288x128xf32>
    %c0_2 = arith.constant 0 : index
    %c0_3 = arith.constant 0 : index
    %3 = vector.load %arg6[%c0_2, %c0_3] : memref<288x128xf32, #tpu.memory_space<vmem>>, vector<288x128xf32>
    tpu.vector_store %arg6[%c0_2, %c0_3], %2 {strides = array<i32>} : memref<288x128xf32, #tpu.memory_space<vmem>>, vector<288x128xf32>,
    %c0_4 = arith.constant 0 : index
    %c0_5 = arith.constant 0 : index
    %c0_6 = arith.constant 0 : index
    %4 = vector.load %arg3[%c0_4, %c0_5, %c0_6] : memref<9x4x128xbf16, #tpu.memory_space<vmem>>, vector<1x4x128xbf16>
    %5 = vector.shape_cast %4 : vector<1x4x128xbf16> to vector<4x128xbf16>
    %cst_7 = arith.constant dense<0.000000e+00> : vector<326x128xf32>
    %6 = tpu.matmul %1, %5, %cst_7 {dimension_numbers = #tpu.dot_dimension_numbers<[1], [0], [0], [1], [0, 0, 1, 1], [], []>} : vector<326x4xbf16>, vector<4x128xbf16>, vector<326x128xf32> -> vector<326x128xf32>
    %c0_8 = arith.constant 0 : index
    %c0_9 = arith.constant 0 : index
    %7 = vector.load %arg6[%c0_8, %c0_9] : memref<288x128xf32, #tpu.memory_space<vmem>>, vector<288x128xf32>
    %8 = vector.extract_strided_slice %6 {offsets = [0, 0], sizes = [288, 128], strides = [1, 1]} : vector<326x128xf32> to vector<288x128xf32>
    %9 = arith.addf %7, %8 : vector<288x128xf32>
    %c0_10 = arith.constant 0 : index
    %c0_11 = arith.constant 0 : index
    %10 = vector.load %arg6[%c0_10, %c0_11] : memref<288x128xf32, #tpu.memory_space<vmem>>, vector<288x128xf32>
    tpu.vector_store %arg6[%c0_10, %c0_11], %9 {strides = array<i32>} : memref<288x128xf32, #tpu.memory_space<vmem>>, vector<288x128xf32>,
    %c1 = arith.constant 1 : index
    %c0_12 = arith.constant 0 : index
    %c0_13 = arith.constant 0 : index
    %11 = vector.load %arg3[%c1, %c0_12, %c0_13] : memref<9x4x128xbf16, #tpu.memory_space<vmem>>, vector<1x4x128xbf16>
    %12 = vector.shape_cast %11 : vector<1x4x128xbf16> to vector<4x128xbf16>
    %cst_14 = arith.constant dense<0.000000e+00> : vector<326x128xf32>
    %13 = tpu.matmul %1, %12, %cst_14 {dimension_numbers = #tpu.dot_dimension_numbers<[1], [0], [0], [1], [0, 0, 1, 1], [], []>} : vector<326x4xbf16>, vector<4x128xbf16>, vector<326x128xf32> -> vector<326x128xf32>
    %c0_15 = arith.constant 0 : index
    %c0_16 = arith.constant 0 : index
    %14 = vector.load %arg6[%c0_15, %c0_16] : memref<288x128xf32, #tpu.memory_space<vmem>>, vector<288x128xf32>
    %15 = vector.extract_strided_slice %13 {offsets = [1, 0], sizes = [288, 128], strides = [1, 1]} : vector<326x128xf32> to vector<288x128xf32>
    %16 = arith.addf %14, %15 : vector<288x128xf32>
    %c0_17 = arith.constant 0 : index
    %c0_18 = arith.constant 0 : index
    %17 = vector.load %arg6[%c0_17, %c0_18] : memref<288x128xf32, #tpu.memory_space<vmem>>, vector<288x128xf32>
    tpu.vector_store %arg6[%c0_17, %c0_18], %16 {strides = array<i32>} : memref<288x128xf32, #tpu.memory_space<vmem>>, vector<288x128xf32>,
    %c2 = arith.constant 2 : index
    %c0_19 = arith.constant 0 : index
    %c0_20 = arith.constant 0 : index
    %18 = vector.load %arg3[%c2, %c0_19, %c0_20] : memref<9x4x128xbf16, #tpu.memory_space<vmem>>, vector<1x4x128xbf16>
    %19 = vector.shape_cast %18 : vector<1x4x128xbf16> to vector<4x128xbf16>
    %cst_21 = arith.constant dense<0.000000e+00> : vector<326x128xf32>
    %20 = tpu.matmul %1, %19, %cst_21 {dimension_numbers = #tpu.dot_dimension_numbers<[1], [0], [0], [1], [0, 0, 1, 1], [], []>} : vector<326x4xbf16>, vector<4x128xbf16>, vector<326x128xf32> -> vector<326x128xf32>
    %c0_22 = arith.constant 0 : index
    %c0_23 = arith.constant 0 : index
    %21 = vector.load %arg6[%c0_22, %c0_23] : memref<288x128xf32, #tpu.memory_space<vmem>>, vector<288x128xf32>
    %22 = vector.extract_strided_slice %20 {offsets = [2, 0], sizes = [288, 128], strides = [1, 1]} : vector<326x128xf32> to vector<288x128xf32>
    %23 = arith.addf %21, %22 : vector<288x128xf32>
    %c0_24 = arith.constant 0 : index
    %c0_25 = arith.constant 0 : index
    %24 = vector.load %arg6[%c0_24, %c0_25] : memref<288x128xf32, #tpu.memory_space<vmem>>, vector<288x128xf32>
    tpu.vector_store %arg6[%c0_24, %c0_25], %23 {strides = array<i32>} : memref<288x128xf32, #tpu.memory_space<vmem>>, vector<288x128xf32>,
    %c3 = arith.constant 3 : index
    %c0_26 = arith.constant 0 : index
    %c0_27 = arith.constant 0 : index
    %25 = vector.load %arg3[%c3, %c0_26, %c0_27] : memref<9x4x128xbf16, #tpu.memory_space<vmem>>, vector<1x4x128xbf16>
    %26 = vector.shape_cast %25 : vector<1x4x128xbf16> to vector<4x128xbf16>
    %cst_28 = arith.constant dense<0.000000e+00> : vector<326x128xf32>
    %27 = tpu.matmul %1, %26, %cst_28 {dimension_numbers = #tpu.dot_dimension_numbers<[1], [0], [0], [1], [0, 0, 1, 1], [], []>} : vector<326x4xbf16>, vector<4x128xbf16>, vector<326x128xf32> -> vector<326x128xf32>
    %c0_29 = arith.constant 0 : index
    %c0_30 = arith.constant 0 : index
    %28 = vector.load %arg6[%c0_29, %c0_30] : memref<288x128xf32, #tpu.memory_space<vmem>>, vector<288x128xf32>
    %29 = vector.extract_strided_slice %27 {offsets = [18, 0], sizes = [288, 128], strides = [1, 1]} : vector<326x128xf32> to vector<288x128xf32>
    %30 = arith.addf %28, %29 : vector<288x128xf32>
    %c0_31 = arith.constant 0 : index
    %c0_32 = arith.constant 0 : index
    %31 = vector.load %arg6[%c0_31, %c0_32] : memref<288x128xf32, #tpu.memory_space<vmem>>, vector<288x128xf32>
    tpu.vector_store %arg6[%c0_31, %c0_32], %30 {strides = array<i32>} : memref<288x128xf32, #tpu.memory_space<vmem>>, vector<288x128xf32>,
    %c4 = arith.constant 4 : index
    %c0_33 = arith.constant 0 : index
    %c0_34 = arith.constant 0 : index
    %32 = vector.load %arg3[%c4, %c0_33, %c0_34] : memref<9x4x128xbf16, #tpu.memory_space<vmem>>, vector<1x4x128xbf16>
    %33 = vector.shape_cast %32 : vector<1x4x128xbf16> to vector<4x128xbf16>
    %cst_35 = arith.constant dense<0.000000e+00> : vector<326x128xf32>
    %34 = tpu.matmul %1, %33, %cst_35 {dimension_numbers = #tpu.dot_dimension_numbers<[1], [0], [0], [1], [0, 0, 1, 1], [], []>} : vector<326x4xbf16>, vector<4x128xbf16>, vector<326x128xf32> -> vector<326x128xf32>
    %c0_36 = arith.constant 0 : index
    %c0_37 = arith.constant 0 : index
    %35 = vector.load %arg6[%c0_36, %c0_37] : memref<288x128xf32, #tpu.memory_space<vmem>>, vector<288x128xf32>
    %36 = vector.extract_strided_slice %34 {offsets = [19, 0], sizes = [288, 128], strides = [1, 1]} : vector<326x128xf32> to vector<288x128xf32>
    %37 = arith.addf %35, %36 : vector<288x128xf32>
    %c0_38 = arith.constant 0 : index
    %c0_39 = arith.constant 0 : index
    %38 = vector.load %arg6[%c0_38, %c0_39] : memref<288x128xf32, #tpu.memory_space<vmem>>, vector<288x128xf32>
    tpu.vector_store %arg6[%c0_38, %c0_39], %37 {strides = array<i32>} : memref<288x128xf32, #tpu.memory_space<vmem>>, vector<288x128xf32>,
    %c5 = arith.constant 5 : index
    %c0_40 = arith.constant 0 : index
    %c0_41 = arith.constant 0 : index
    %39 = vector.load %arg3[%c5, %c0_40, %c0_41] : memref<9x4x128xbf16, #tpu.memory_space<vmem>>, vector<1x4x128xbf16>
    %40 = vector.shape_cast %39 : vector<1x4x128xbf16> to vector<4x128xbf16>
    %cst_42 = arith.constant dense<0.000000e+00> : vector<326x128xf32>
    %41 = tpu.matmul %1, %40, %cst_42 {dimension_numbers = #tpu.dot_dimension_numbers<[1], [0], [0], [1], [0, 0, 1, 1], [], []>} : vector<326x4xbf16>, vector<4x128xbf16>, vector<326x128xf32> -> vector<326x128xf32>
    %c0_43 = arith.constant 0 : index
    %c0_44 = arith.constant 0 : index
    %42 = vector.load %arg6[%c0_43, %c0_44] : memref<288x128xf32, #tpu.memory_space<vmem>>, vector<288x128xf32>
    %43 = vector.extract_strided_slice %41 {offsets = [20, 0], sizes = [288, 128], strides = [1, 1]} : vector<326x128xf32> to vector<288x128xf32>
    %44 = arith.addf %42, %43 : vector<288x128xf32>
    %c0_45 = arith.constant 0 : index
    %c0_46 = arith.constant 0 : index
    %45 = vector.load %arg6[%c0_45, %c0_46] : memref<288x128xf32, #tpu.memory_space<vmem>>, vector<288x128xf32>
    tpu.vector_store %arg6[%c0_45, %c0_46], %44 {strides = array<i32>} : memref<288x128xf32, #tpu.memory_space<vmem>>, vector<288x128xf32>,
    %c6 = arith.constant 6 : index
    %c0_47 = arith.constant 0 : index
    %c0_48 = arith.constant 0 : index
    %46 = vector.load %arg3[%c6, %c0_47, %c0_48] : memref<9x4x128xbf16, #tpu.memory_space<vmem>>, vector<1x4x128xbf16>
    %47 = vector.shape_cast %46 : vector<1x4x128xbf16> to vector<4x128xbf16>
    %cst_49 = arith.constant dense<0.000000e+00> : vector<326x128xf32>
    %48 = tpu.matmul %1, %47, %cst_49 {dimension_numbers = #tpu.dot_dimension_numbers<[1], [0], [0], [1], [0, 0, 1, 1], [], []>} : vector<326x4xbf16>, vector<4x128xbf16>, vector<326x128xf32> -> vector<326x128xf32>
    %c0_50 = arith.constant 0 : index
    %c0_51 = arith.constant 0 : index
    %49 = vector.load %arg6[%c0_50, %c0_51] : memref<288x128xf32, #tpu.memory_space<vmem>>, vector<288x128xf32>
    %50 = vector.extract_strided_slice %48 {offsets = [36, 0], sizes = [288, 128], strides = [1, 1]} : vector<326x128xf32> to vector<288x128xf32>
    %51 = arith.addf %49, %50 : vector<288x128xf32>
    %c0_52 = arith.constant 0 : index
    %c0_53 = arith.constant 0 : index
    %52 = vector.load %arg6[%c0_52, %c0_53] : memref<288x128xf32, #tpu.memory_space<vmem>>, vector<288x128xf32>
    tpu.vector_store %arg6[%c0_52, %c0_53], %51 {strides = array<i32>} : memref<288x128xf32, #tpu.memory_space<vmem>>, vector<288x128xf32>,
    %c7 = arith.constant 7 : index
    %c0_54 = arith.constant 0 : index
    %c0_55 = arith.constant 0 : index
    %53 = vector.load %arg3[%c7, %c0_54, %c0_55] : memref<9x4x128xbf16, #tpu.memory_space<vmem>>, vector<1x4x128xbf16>
    %54 = vector.shape_cast %53 : vector<1x4x128xbf16> to vector<4x128xbf16>
    %cst_56 = arith.constant dense<0.000000e+00> : vector<326x128xf32>
    %55 = tpu.matmul %1, %54, %cst_56 {dimension_numbers = #tpu.dot_dimension_numbers<[1], [0], [0], [1], [0, 0, 1, 1], [], []>} : vector<326x4xbf16>, vector<4x128xbf16>, vector<326x128xf32> -> vector<326x128xf32>
    %c0_57 = arith.constant 0 : index
    %c0_58 = arith.constant 0 : index
    %56 = vector.load %arg6[%c0_57, %c0_58] : memref<288x128xf32, #tpu.memory_space<vmem>>, vector<288x128xf32>
    %57 = vector.extract_strided_slice %55 {offsets = [37, 0], sizes = [288, 128], strides = [1, 1]} : vector<326x128xf32> to vector<288x128xf32>
    %58 = arith.addf %56, %57 : vector<288x128xf32>
    %c0_59 = arith.constant 0 : index
    %c0_60 = arith.constant 0 : index
    %59 = vector.load %arg6[%c0_59, %c0_60] : memref<288x128xf32, #tpu.memory_space<vmem>>, vector<288x128xf32>
    tpu.vector_store %arg6[%c0_59, %c0_60], %58 {strides = array<i32>} : memref<288x128xf32, #tpu.memory_space<vmem>>, vector<288x128xf32>,
    %c8 = arith.constant 8 : index
    %c0_61 = arith.constant 0 : index
    %c0_62 = arith.constant 0 : index
    %60 = vector.load %arg3[%c8, %c0_61, %c0_62] : memref<9x4x128xbf16, #tpu.memory_space<vmem>>, vector<1x4x128xbf16>
    %61 = vector.shape_cast %60 : vector<1x4x128xbf16> to vector<4x128xbf16>
    %cst_63 = arith.constant dense<0.000000e+00> : vector<326x128xf32>
    %62 = tpu.matmul %1, %61, %cst_63 {dimension_numbers = #tpu.dot_dimension_numbers<[1], [0], [0], [1], [0, 0, 1, 1], [], []>} : vector<326x4xbf16>, vector<4x128xbf16>, vector<326x128xf32> -> vector<326x128xf32>
    %c0_64 = arith.constant 0 : index
    %c0_65 = arith.constant 0 : index
    %63 = vector.load %arg6[%c0_64, %c0_65] : memref<288x128xf32, #tpu.memory_space<vmem>>, vector<288x128xf32>
    %64 = vector.extract_strided_slice %62 {offsets = [38, 0], sizes = [288, 128], strides = [1, 1]} : vector<326x128xf32> to vector<288x128xf32>
    %65 = arith.addf %63, %64 : vector<288x128xf32>
    %c0_66 = arith.constant 0 : index
    %c0_67 = arith.constant 0 : index
    %66 = vector.load %arg6[%c0_66, %c0_67] : memref<288x128xf32, #tpu.memory_space<vmem>>, vector<288x128xf32>
    tpu.vector_store %arg6[%c0_66, %c0_67], %65 {strides = array<i32>} : memref<288x128xf32, #tpu.memory_space<vmem>>, vector<288x128xf32>,
    %c0_68 = arith.constant 0 : index
    %c0_69 = arith.constant 0 : index
    %67 = vector.load %arg6[%c0_68, %c0_69] : memref<288x128xf32, #tpu.memory_space<vmem>>, vector<288x128xf32>
    %c0_70 = arith.constant 0 : index
    %c0_71 = arith.constant 0 : index
    %68 = vector.load %arg4[%c0_70, %c0_71] : memref<1x128xf32, #tpu.memory_space<vmem>>, vector<1x128xf32>
    %69 = vector.broadcast %68 : vector<1x128xf32> to vector<288x128xf32>
    %70 = arith.addf %67, %69 : vector<288x128xf32>
    %cst_72 = arith.constant 0.000000e+00 : f32
    %71 = vector.broadcast %cst_72 : f32 to vector<288x128xf32>
    %72 = arith.cmpf oge, %70, %71 : vector<288x128xf32>
    %cst_73 = arith.constant 1.000000e-01 : f32
    %73 = vector.broadcast %cst_73 : f32 to vector<288x128xf32>
    %74 = arith.mulf %73, %70 : vector<288x128xf32>
    %75 = arith.select %72, %70, %74 : vector<288x128xi1>, vector<288x128xf32>
    %c0_74 = arith.constant 0 : index
    %c0_75 = arith.constant 0 : index
    %c0_76 = arith.constant 0 : index
    %76 = vector.load %arg5[%c0_74, %c0_75, %c0_76] : memref<1x288x128xf32, #tpu.memory_space<vmem>>, vector<1x288x128xf32>
    %77 = vector.shape_cast %76 : vector<1x288x128xf32> to vector<288x128xf32>
    %78 = vector.shape_cast %75 : vector<288x128xf32> to vector<1x288x128xf32>
    tpu.vector_store %arg5[%c0_74, %c0_75, %c0_76], %78 {strides = array<i32>} : memref<1x288x128xf32, #tpu.memory_space<vmem>>, vector<1x288x128xf32>,
    return
  }
  func.func @transform_0(%arg0: i32, %arg1: i32) -> (i32, i32, i32) {
    %c0_i32 = arith.constant 0 : i32
    %c0_i32_0 = arith.constant 0 : i32
    %c0_i32_1 = arith.constant 0 : i32
    return %arg0, %c0_i32, %c0_i32_0 : i32, i32, i32
  }
  func.func @transform_1(%arg0: i32, %arg1: i32) -> (i32, i32, i32) {
    %c0_i32 = arith.constant 0 : i32
    %c0_i32_0 = arith.constant 0 : i32
    %c0_i32_1 = arith.constant 0 : i32
    return %c0_i32, %c0_i32_0, %arg1 : i32, i32, i32
  }
  func.func @transform_2(%arg0: i32, %arg1: i32) -> (i32, i32) {
    %c0_i32 = arith.constant 0 : i32
    %c0_i32_0 = arith.constant 0 : i32
    return %c0_i32, %arg1 : i32, i32
  }
  func.func @transform_3(%arg0: i32, %arg1: i32) -> (i32, i32, i32) {
    %c0_i32 = arith.constant 0 : i32
    %c0_i32_0 = arith.constant 0 : i32
    return %arg0, %c0_i32, %arg1 : i32, i32, i32
  }
}

</mosaic_0001>

<bundles_post_ra>
// kernel: basicblock_forward.1
= control target key start
LH: loop header
LB: loop body
LE: loop exit
PB: predicated region body
PF: predicated region fallthrough
CT: control target
= control target key end

     0   :  { %s6076_s12 = smov 0   ;;  %s6078_s13 = smov 0   ;;  %s7836_s0 = inlined_call_operand.vmem [shape: bf16[2,326,4], index: 0, kind: input, shape index: {}]   ;;  %s7837_s1 = inlined_call_operand.vmem [shape: bf16[9,4,128], index: 1, kind: input, shape index: {}]   ;;  %s7838_s2 = inlined_call_operand.vmem [shape: f32[1,128], index: 2, kind: input, shape index: {}]   ;;  %s7839_s3 = inlined_call_operand.vmem [shape: f32[2,288,128], index: 3, kind: output, shape index: {}]  }
   0x1   :  { %s6080_s14 = smov 0  }
   0x2 LB: > { %s25_s15 = sadd.s32 1, %s6048_s13  ;;  %p4754_p0 = scmp.ge.s32.totalorder %s6052_s14, 1  ;;  %s6052_s14 = sphi %s6080_s14, %s13_s14   ;;  %s6048_s13 = sphi %s6078_s13, %s7896_s13   ;;  %s6044_s12 = sphi %s6076_s12, %s7895_s12  }
   0x3   : > { %p27_p1 = scmp.ge.s32.totalorder %s25_s15, 2  ;;  %p168_p2 = scmp.lt.s32.totalorder %s6052_s14, 3 }
   0x5   : > { %s7898_s15 = smov (%p27_p1, %s25_s15), 0  ;;  %p169_p3 = pnand %p4754_p0, %p168_p2 }
   0x7   : > { %172 = sbr.rel (%p169_p3) target bundleno = 975 (0x3cf), region = 32 }
   0xc   : > { %v300_v0 = vld [vmem:[%s7837_s1] sm:$0x3]  ;;  %vm468_vm0 = vcmask 1041408   ;;  %p202_p4 = scmp.lt.s32.totalorder %s6044_s12, 1  ;;  %v7840_v1 = vmov 0.0   ;;  %vm6055_vm1 = vmmov 0  }
   0xd   : > { %5176 = vmatprep.subr.bf16.mxu0 %v7840_v1  ;;  %5950 = vmatprep.subr.bf16.mxu1 %v7840_v1  ;;  %v470_v2 = vsel %vm468_vm0, %v300_v0, 0  ;;  %v4821_v3 = vld [vmem:[%s7837_s1 + $0x4] sm:$0x3]  ;;  %v4799_v4 = vld [vmem:[%s7837_s1 + $0x2] sm:$0x3]  ;;  %vm404_vm2 = vcmask 31744  }
   0xe   : > { %5177 = vmatpush3.bf16.msra.mxu0 %v470_v2  ;;  %5951 = vmatpush3.bf16.msra.mxu1 %v470_v2  ;;  %s7900_s12 = smov (!%p202_p4, %s6044_s12), 1  ;;  %v1234_v6 = vsel %vm468_vm0, %v4821_v3, 0  ;;  %v778_v8 = vsel %vm468_vm0, %v4799_v4, 0  ;;  %v4843_v28 = vld [vmem:[%s7837_s1 + $0x6] sm:$0x3]  ;;  %vm1049_vm3 = vcmask 1046528  }
   0xf   : > { %5178 = vmatprep.mubr.msk.bf16.mxu0 %vm6055_vm1, %v7840_v1  ;;  %5222 = vmatprep.mubr.msk.bf16.mxu1 %vm6055_vm1, %v7840_v1  ;;  %s5952_s18 = smul.u32 164, %s7900_s12  ;;  %v1690_v29 = vsel %vm468_vm0, %v4843_v28, 0  ;;  %v4865_v30 = vld [vmem:[%s7837_s1 + $0x8] sm:$0x3]  ;;  %vm1505_vm4 = vcmask 1045504   ;;  %vm2416_vm5 = vcmask 1044480  }
  0x10   : > { %5348 = vmatprep.subr.bf16.mxu0 %v7840_v1  ;;  %5262 = vmatprep.subr.bf16.mxu1 %v7840_v1  ;;  %v2145_v31 = vsel %vm468_vm0, %v4865_v30, 0  ;;  %vm2872_vm6 = vcmask 1043456   ;;  %vm3783_vm7 = vcmask 1042432   ;;  %s5953_s17 = smul.u32 288, %s7900_s12 }
  0x11   : > { %s6118_s25 = scalar_lea.vmem %s7836_s0, %s5952_s18 }
  0x12   : > { %v6121_v5 = vld [vmem:[%s6118_s25] sm:$0xff]   ;;  %v6125_v7 = vld [vmem:[%s6118_s25 + $0x58] sm:$0xff]   ;;  %v6138_v9 = vld [vmem:[%s6118_s25 + $0x8] sm:$0xff]   ;;  %s7652_s20 = scalar_lea.vmem %s7839_s3, %s5953_s17 }
  0x13   : > { %5179 = vmatmul.mubr.msk.bf16.vlgmr.msra.gmra.mxu0 %vm404_vm2, %v6121_v5  ;;  %5223 = vmatmul.mubr.msk.bf16.vlgmr.msra.gmra.mxu1 %vm404_vm2, %v6125_v7  ;;  %v6142_v10 = vld [vmem:[%s6118_s25 + $0x60] sm:$0xff]   ;;  %v6153_v11 = vld [vmem:[%s6118_s25 + $0x10] sm:$0xff]   ;;  %v6156_v12 = vld [vmem:[%s6118_s25 + $0x68] sm:$0xff]  }
  0x14   : > { %5349 = vmatpush3.bf16.msra.mxu0 %v1234_v6  ;;  %5263 = vmatpush3.bf16.msra.mxu1 %v778_v8  ;;  %v6167_v13 = vld [vmem:[%s6118_s25 + $0x18] sm:$0xff]   ;;  %v6170_v14 = vld [vmem:[%s6118_s25 + $0x70] sm:$0xff]   ;;  %v6181_v15 = vld [vmem:[%s6118_s25 + $0x20] sm:$0xff]  }
  0x15   : > { %5182 = vmatprep.mubr.msk.bf16.mxu0 %vm6055_vm1, %v7840_v1  ;;  %5226 = vmatprep.mubr.msk.bf16.mxu1 %vm6055_vm1, %v7840_v1  ;;  %v6184_v16 = vld [vmem:[%s6118_s25 + $0x78] sm:$0xff]   ;;  %v6195_v17 = vld [vmem:[%s6118_s25 + $0x28] sm:$0xff]   ;;  %v6198_v18 = vld [vmem:[%s6118_s25 + $0x80] sm:$0xff]  }
  0x16   : > { %5434 = vmatprep.subr.bf16.mxu1 %v7840_v1  ;;  %5520 = vmatprep.subr.bf16.mxu0 %v7840_v1  ;;  %v6209_v19 = vld [vmem:[%s6118_s25 + $0x30] sm:$0xff]   ;;  %v6212_v20 = vld [vmem:[%s6118_s25 + $0x88] sm:$0xff]   ;;  %v6223_v21 = vld [vmem:[%s6118_s25 + $0x38] sm:$0xff]  }
  0x17   : > { %v6226_v22 = vld [vmem:[%s6118_s25 + $0x90] sm:$0xff]   ;;  %v6237_v23 = vld [vmem:[%s6118_s25 + $0x40] sm:$0xff]   ;;  %v6240_v24 = vld [vmem:[%s6118_s25 + $0x98] sm:$0xff]  }
  0x18   : > { %v6251_v25 = vld [vmem:[%s6118_s25 + $0x48] sm:$0xff]   ;;  %v6254_v26 = vld [vmem:[%s6118_s25 + $0xa0] ss:$0 sps:$4 sm:$0x77]   ;;  %v6265_v27 = vld [vmem:[%s6118_s25 + $0x50] sm:$0xff]  }
  0x1b   : > { %5183 = vmatmul.mubr.msk.bf16.gmra.mxu0 %vm404_vm2, %v6138_v9  ;;  %5227 = vmatmul.mubr.msk.bf16.gmra.mxu1 %vm404_vm2, %v6142_v10 }
  0x1c   : > { %5186 = vmatprep.mubr.msk.bf16.mxu0 %vm6055_vm1, %v7840_v1  ;;  %5230 = vmatprep.mubr.msk.bf16.mxu1 %vm6055_vm1, %v7840_v1 }
  0x23   : > { %5187 = vmatmul.mubr.msk.bf16.gmra.mxu0 %vm404_vm2, %v6153_v11  ;;  %5231 = vmatmul.mubr.msk.bf16.gmra.mxu1 %vm404_vm2, %v6156_v12 }
  0x24   : > { %5190 = vmatprep.mubr.msk.bf16.mxu0 %vm6055_vm1, %v7840_v1  ;;  %5234 = vmatprep.mubr.msk.bf16.mxu1 %vm6055_vm1, %v7840_v1 }
  0x2b   : > { %5191 = vmatmul.mubr.msk.bf16.gmra.mxu0 %vm404_vm2, %v6167_v13  ;;  %5235 = vmatmul.mubr.msk.bf16.gmra.mxu1 %vm404_vm2, %v6170_v14 }
  0x2c   : > { %5194 = vmatprep.mubr.msk.bf16.mxu0 %vm6055_vm1, %v7840_v1  ;;  %5238 = vmatprep.mubr.msk.bf16.mxu1 %vm6055_vm1, %v7840_v1 }
  0x33   : > { %5195 = vmatmul.mubr.msk.bf16.gmra.mxu0 %vm404_vm2, %v6181_v15  ;;  %5239 = vmatmul.mubr.msk.bf16.gmra.mxu1 %vm404_vm2, %v6184_v16 }
  0x34   : > { %5198 = vmatprep.mubr.msk.bf16.mxu0 %vm6055_vm1, %v7840_v1  ;;  %5242 = vmatprep.mubr.msk.bf16.mxu1 %vm6055_vm1, %v7840_v1 }
  0x3b   : > { %5199 = vmatmul.mubr.msk.bf16.gmra.mxu0 %vm404_vm2, %v6195_v17  ;;  %5243 = vmatmul.mubr.msk.bf16.gmra.mxu1 %vm404_vm2, %v6198_v18 }
  0x3c   : > { %5202 = vmatprep.mubr.msk.bf16.mxu0 %vm6055_vm1, %v7840_v1  ;;  %5246 = vmatprep.mubr.msk.bf16.mxu1 %vm6055_vm1, %v7840_v1 }
  0x43   : > { %5203 = vmatmul.mubr.msk.bf16.gmra.mxu0 %vm404_vm2, %v6209_v19  ;;  %5247 = vmatmul.mubr.msk.bf16.gmra.mxu1 %vm404_vm2, %v6212_v20 }
  0x44   : > { %5206 = vmatprep.mubr.msk.bf16.mxu0 %vm6055_vm1, %v7840_v1  ;;  %5250 = vmatprep.mubr.msk.bf16.mxu1 %vm6055_vm1, %v7840_v1 }
  0x4b   : > { %5207 = vmatmul.mubr.msk.bf16.gmra.mxu0 %vm404_vm2, %v6223_v21  ;;  %5251 = vmatmul.mubr.msk.bf16.gmra.mxu1 %vm404_vm2, %v6226_v22 }
  0x4c   : > { %5210 = vmatprep.mubr.msk.bf16.mxu0 %vm6055_vm1, %v7840_v1  ;;  %5254 = vmatprep.mubr.msk.bf16.mxu1 %vm6055_vm1, %v7840_v1 }
  0x53   : > { %5211 = vmatmul.mubr.msk.bf16.gmra.mxu0 %vm404_vm2, %v6237_v23  ;;  %5255 = vmatmul.mubr.msk.bf16.gmra.mxu1 %vm404_vm2, %v6240_v24 }
  0x54   : > { %5214 = vmatprep.mubr.msk.bf16.mxu0 %vm6055_vm1, %v7840_v1  ;;  %5258 = vmatprep.mubr.msk.bf16.mxu1 %vm6055_vm1, %v7840_v1 }
  0x5b   : > { %5215 = vmatmul.mubr.msk.bf16.gmra.mxu0 %vm404_vm2, %v6251_v25  ;;  %5259 = vmatmul.mubr.msk.bf16.gmra.mxu1 %vm404_vm2, %v6254_v26 }
  0x5c   : > { %5218 = vmatprep.mubr.msk.bf16.mxu0 %vm6055_vm1, %v7840_v1  ;;  %5264 = vmatprep.mubr.msk.bf16.mxu1 %vm6055_vm1, %v7840_v1 }
  0x63   : > { %5219 = vmatmul.mubr.msk.bf16.gmra.mxu0 %vm404_vm2, %v6265_v27  ;;  %5265 = vmatmul.mubr.msk.bf16.vlgmr.msra.gmra.mxu1 %vm404_vm2, %v6121_v5 }
  0x64   : > { %5350 = vmatprep.mubr.msk.bf16.mxu0 %vm6055_vm1, %v7840_v1  ;;  %5435 = vmatpush3.bf16.msra.mxu1 %v1690_v29 }
  0x65   : > { %5268 = vmatprep.mubr.msk.bf16.mxu1 %vm6055_vm1, %v7840_v1  ;;  %5606 = vmatprep.subr.bf16.mxu1 %v7840_v1 }
  0x6b   : > { %5351 = vmatmul.mubr.msk.bf16.vlgmr.msra.gmra.mxu0 %vm404_vm2, %v6121_v5  ;;  %5269 = vmatmul.mubr.msk.bf16.gmra.mxu1 %vm404_vm2, %v6138_v9 }
  0x6c   : > { %5521 = vmatpush3.bf16.msra.mxu0 %v2145_v31  ;;  %5272 = vmatprep.mubr.msk.bf16.mxu1 %vm6055_vm1, %v7840_v1 }
  0x6d   : > { %5354 = vmatprep.mubr.msk.bf16.mxu0 %vm6055_vm1, %v7840_v1  ;;  %5692 = vmatprep.subr.bf16.mxu0 %v7840_v1 }
  0x73   : > { %5355 = vmatmul.mubr.msk.bf16.gmra.mxu0 %vm404_vm2, %v6138_v9  ;;  %5273 = vmatmul.mubr.msk.bf16.gmra.mxu1 %vm404_vm2, %v6153_v11 }
  0x74   : > { %5358 = vmatprep.mubr.msk.bf16.mxu0 %vm6055_vm1, %v7840_v1  ;;  %5276 = vmatprep.mubr.msk.bf16.mxu1 %vm6055_vm1, %v7840_v1 }
  0x7b   : > { %5359 = vmatmul.mubr.msk.bf16.gmra.mxu0 %vm404_vm2, %v6153_v11  ;;  %5277 = vmatmul.mubr.msk.bf16.gmra.mxu1 %vm404_vm2, %v6167_v13 }
  0x7c   : > { %5362 = vmatprep.mubr.msk.bf16.mxu0 %vm6055_vm1, %v7840_v1  ;;  %5280 = vmatprep.mubr.msk.bf16.mxu1 %vm6055_vm1, %v7840_v1 }
  0x83   : > { %5363 = vmatmul.mubr.msk.bf16.gmra.mxu0 %vm404_vm2, %v6167_v13  ;;  %5281 = vmatmul.mubr.msk.bf16.gmra.mxu1 %vm404_vm2, %v6181_v15 }
  0x84   : > { %5366 = vmatprep.mubr.msk.bf16.mxu0 %vm6055_vm1, %v7840_v1  ;;  %5284 = vmatprep.mubr.msk.bf16.mxu1 %vm6055_vm1, %v7840_v1 }
  0x8b   : > { %5367 = vmatmul.mubr.msk.bf16.gmra.mxu0 %vm404_vm2, %v6181_v15  ;;  %5285 = vmatmul.mubr.msk.bf16.gmra.mxu1 %vm404_vm2, %v6195_v17 }
  0x8c   : > { %5370 = vmatprep.mubr.msk.bf16.mxu0 %vm6055_vm1, %v7840_v1  ;;  %5288 = vmatprep.mubr.msk.bf16.mxu1 %vm6055_vm1, %v7840_v1 }
  0x93   : > { %5371 = vmatmul.mubr.msk.bf16.gmra.mxu0 %vm404_vm2, %v6195_v17  ;;  %5289 = vmatmul.mubr.msk.bf16.gmra.mxu1 %vm404_vm2, %v6209_v19 }
  0x94   : > { %5374 = vmatprep.mubr.msk.bf16.mxu0 %vm6055_vm1, %v7840_v1  ;;  %5292 = vmatprep.mubr.msk.bf16.mxu1 %vm6055_vm1, %v7840_v1 }
  0x9b   : > { %5375 = vmatmul.mubr.msk.bf16.gmra.mxu0 %vm404_vm2, %v6209_v19  ;;  %5293 = vmatmul.mubr.msk.bf16.gmra.mxu1 %vm404_vm2, %v6223_v21 }
  0x9c   : > { %5378 = vmatprep.mubr.msk.bf16.mxu0 %vm6055_vm1, %v7840_v1  ;;  %5296 = vmatprep.mubr.msk.bf16.mxu1 %vm6055_vm1, %v7840_v1 }
  0xa3   : > { %5379 = vmatmul.mubr.msk.bf16.gmra.mxu0 %vm404_vm2, %v6223_v21  ;;  %5297 = vmatmul.mubr.msk.bf16.gmra.mxu1 %vm404_vm2, %v6237_v23 }
  0xa4   : > { %5382 = vmatprep.mubr.msk.bf16.mxu0 %vm6055_vm1, %v7840_v1  ;;  %5300 = vmatprep.mubr.msk.bf16.mxu1 %vm6055_vm1, %v7840_v1 }
  0xab   : > { %5383 = vmatmul.mubr.msk.bf16.gmra.mxu0 %vm404_vm2, %v6237_v23  ;;  %5301 = vmatmul.mubr.msk.bf16.gmra.mxu1 %vm404_vm2, %v6251_v25 }
  0xac   : > { %5386 = vmatprep.mubr.msk.bf16.mxu0 %vm6055_vm1, %v7840_v1  ;;  %5304 = vmatprep.mubr.msk.bf16.mxu1 %vm6055_vm1, %v7840_v1 }
  0xb3   : > { %5387 = vmatmul.mubr.msk.bf16.gmra.mxu0 %vm404_vm2, %v6251_v25  ;;  %5305 = vmatmul.mubr.msk.bf16.gmra.mxu1 %vm404_vm2, %v6265_v27 }
  0xb4   : > { %5390 = vmatprep.mubr.msk.bf16.mxu0 %vm6055_vm1, %v7840_v1  ;;  %5308 = vmatprep.mubr.msk.bf16.mxu1 %vm6055_vm1, %v7840_v1 }
  0xbb   : > { %5391 = vmatmul.mubr.msk.bf16.gmra.mxu0 %vm404_vm2, %v6265_v27  ;;  %5309 = vmatmul.mubr.msk.bf16.gmra.mxu1 %vm404_vm2, %v6125_v7 }
  0xbc   : > { %5394 = vmatprep.mubr.msk.bf16.mxu0 %vm6055_vm1, %v7840_v1  ;;  %5312 = vmatprep.mubr.msk.bf16.mxu1 %vm6055_vm1, %v7840_v1 }
  0xc3   : > { %5395 = vmatmul.mubr.msk.bf16.gmra.mxu0 %vm404_vm2, %v6125_v7  ;;  %5313 = vmatmul.mubr.msk.bf16.gmra.mxu1 %vm404_vm2, %v6142_v10 }
  0xc4   : > { %5398 = vmatprep.mubr.msk.bf16.mxu0 %vm6055_vm1, %v7840_v1  ;;  %5316 = vmatprep.mubr.msk.bf16.mxu1 %vm6055_vm1, %v7840_v1 }
  0xcb   : > { %5399 = vmatmul.mubr.msk.bf16.gmra.mxu0 %vm404_vm2, %v6142_v10  ;;  %5317 = vmatmul.mubr.msk.bf16.gmra.mxu1 %vm404_vm2, %v6156_v12 }
  0xcc   : > { %5402 = vmatprep.mubr.msk.bf16.mxu0 %vm6055_vm1, %v7840_v1  ;;  %5320 = vmatprep.mubr.msk.bf16.mxu1 %vm6055_vm1, %v7840_v1 }
  0xd3   : > { %v6389_v32 = vpop.f32.mrf.mxu0  ;;  %5403 = vmatmul.mubr.msk.bf16.gmra.mxu0 %vm404_vm2, %v6156_v12  ;;  %v6393_v33 = vpop.f32.mrf.mxu1  ;;  %5321 = vmatmul.mubr.msk.bf16.gmra.mxu1 %vm404_vm2, %v6170_v14 }
  0xd4   : > { %5406 = vmatprep.mubr.msk.bf16.mxu0 %vm6055_vm1, %v7840_v1  ;;  %5324 = vmatprep.mubr.msk.bf16.mxu1 %vm6055_vm1, %v7840_v1 }
  0xd5   : > { %v5180_v34 = vpop.f32.mrf.mxu0  ;;  %v5224_v35 = vpop.f32.mrf.mxu1 }
  0xd7   : > { %v6401_v36 = vpop.f32.mrf.mxu0  ;;  %v6403_v37 = vpop.f32.mrf.mxu1 }
  0xd9   : > { %v5181_v38 = vpop.f32.mrf.mxu0  ;;  %v5225_v39 = vpop.f32.mrf.mxu1 }
  0xdb   : > { %v6405_v40 = vpop.f32.mrf.mxu0  ;;  %5407 = vmatmul.mubr.msk.bf16.gmra.mxu0 %vm404_vm2, %v6170_v14  ;;  %v6409_v41 = vpop.f32.mrf.mxu1  ;;  %5325 = vmatmul.mubr.msk.bf16.gmra.mxu1 %vm404_vm2, %v6184_v16 }
  0xdc   : > { %5410 = vmatprep.mubr.msk.bf16.mxu0 %vm6055_vm1, %v7840_v1  ;;  %5328 = vmatprep.mubr.msk.bf16.mxu1 %vm6055_vm1, %v7840_v1 }
  0xdd   : > { %v5184_v42 = vpop.f32.mrf.mxu0  ;;  %v5228_v43 = vpop.f32.mrf.mxu1 }
  0xdf   : > { %v6417_v44 = vpop.f32.mrf.mxu0  ;;  %v6419_v45 = vpop.f32.mrf.mxu1 }
  0xe1   : > { %v5185_v46 = vpop.f32.mrf.mxu0  ;;  %v5229_v47 = vpop.f32.mrf.mxu1 }
  0xe3   : > { %v6421_v48 = vpop.f32.mrf.mxu0  ;;  %5411 = vmatmul.mubr.msk.bf16.gmra.mxu0 %vm404_vm2, %v6184_v16  ;;  %v6425_v49 = vpop.f32.mrf.mxu1  ;;  %5329 = vmatmul.mubr.msk.bf16.gmra.mxu1 %vm404_vm2, %v6198_v18 }
  0xe4   : > { %5414 = vmatprep.mubr.msk.bf16.mxu0 %vm6055_vm1, %v7840_v1  ;;  %5332 = vmatprep.mubr.msk.bf16.mxu1 %vm6055_vm1, %v7840_v1 }
  0xe5   : > { %v5188_v50 = vpop.f32.mrf.mxu0  ;;  %v5232_v51 = vpop.f32.mrf.mxu1 }
  0xe6   : > { %v4887_v50 = vld [vmem:[%s7837_s1 + $0xa] sm:$0x3] }
  0xe7   : > { %v6433_v52 = vpop.f32.mrf.mxu0  ;;  %v6435_v53 = vpop.f32.mrf.mxu1 }
  0xe9   : > { %v5189_v54 = vpop.f32.mrf.mxu0  ;;  %v5233_v55 = vpop.f32.mrf.mxu1 }
  0xea   : > { %v2601_v55 = vsel %vm468_vm0, %v4887_v50, 0 }
  0xeb   : > { %v6437_v56 = vpop.f32.mrf.mxu0  ;;  %5415 = vmatmul.mubr.msk.bf16.gmra.mxu0 %vm404_vm2, %v6198_v18  ;;  %v6441_v57 = vpop.f32.mrf.mxu1  ;;  %5333 = vmatmul.mubr.msk.bf16.gmra.mxu1 %vm404_vm2, %v6212_v20 }
  0xec   : > { %5418 = vmatprep.mubr.msk.bf16.mxu0 %vm6055_vm1, %v7840_v1  ;;  %5336 = vmatprep.mubr.msk.bf16.mxu1 %vm6055_vm1, %v7840_v1 }
  0xed   : > { %v5192_v58 = vpop.f32.mrf.mxu0  ;;  %v5236_v59 = vpop.f32.mrf.mxu1 }
  0xef   : > { %v6449_v60 = vpop.f32.mrf.mxu0  ;;  %v6451_v61 = vpop.f32.mrf.mxu1 }
  0xf1   : > { %v5193_v62 = vpop.f32.mrf.mxu0  ;;  %v5237_v63 = vpop.f32.mrf.mxu1 }
  0xf3   : > { %v6453_v0 = vpop.f32.mrf.mxu0  ;;  %5419 = vmatmul.mubr.msk.bf16.gmra.mxu0 %vm404_vm2, %v6212_v20  ;;  %v6457_v2 = vpop.f32.mrf.mxu1  ;;  %5337 = vmatmul.mubr.msk.bf16.gmra.mxu1 %vm404_vm2, %v6226_v22 }
  0xf4   : > { %5422 = vmatprep.mubr.msk.bf16.mxu0 %vm6055_vm1, %v7840_v1  ;;  %5340 = vmatprep.mubr.msk.bf16.mxu1 %vm6055_vm1, %v7840_v1 }
  0xf5   : > { %v5196_v3 = vpop.f32.mrf.mxu0  ;;  %v5240_v4 = vpop.f32.mrf.mxu1 }
  0xf6   : > { %v4909_v3 = vld [vmem:[%s7837_s1 + $0xc] sm:$0x3] }
  0xf7   : > { %v6465_v6 = vpop.f32.mrf.mxu0  ;;  %v6467_v8 = vpop.f32.mrf.mxu1 }
  0xf9   : > { %v5197_v18 = vpop.f32.mrf.mxu0  ;;  %v5241_v28 = vpop.f32.mrf.mxu1 }
  0xfa   : > { %v3057_v28 = vsel %vm468_vm0, %v4909_v3, 0 }
  0xfb   : > { %v6469_v20 = vpop.f32.mrf.mxu0  ;;  %5423 = vmatmul.mubr.msk.bf16.gmra.mxu0 %vm404_vm2, %v6226_v22  ;;  %v6473_v29 = vpop.f32.mrf.mxu1  ;;  %5341 = vmatmul.mubr.msk.bf16.gmra.mxu1 %vm404_vm2, %v6240_v24 }
  0xfc   : > { %5426 = vmatprep.mubr.msk.bf16.mxu0 %vm6055_vm1, %v7840_v1  ;;  %5344 = vmatprep.mubr.msk.bf16.mxu1 %vm6055_vm1, %v7840_v1 }
  0xfd   : > { %v5200_v30 = vpop.f32.mrf.mxu0  ;;  %v5244_v31 = vpop.f32.mrf.mxu1 }
  0xff   : > { %v6481_v34 = vpop.f32.mrf.mxu0  ;;  %v6483_v35 = vpop.f32.mrf.mxu1 }
 0x101   : > { %v5201_v38 = vpop.f32.mrf.mxu0  ;;  %v5245_v39 = vpop.f32.mrf.mxu1 }
 0x103   : > { %v6485_v22 = vpop.f32.mrf.mxu0  ;;  %5427 = vmatmul.mubr.msk.bf16.gmra.mxu0 %vm404_vm2, %v6240_v24  ;;  %v6489_v42 = vpop.f32.mrf.mxu1  ;;  %5345 = vmatmul.mubr.msk.bf16.gmra.mxu1 %vm404_vm2, %v6254_v26 }
 0x104   : > { %7864 = vst [vmem:[#allocation3_spill] sm:$0xff] %v6489_v42  ;;  %5430 = vmatprep.mubr.msk.bf16.mxu0 %vm6055_vm1, %v7840_v1  ;;  %5436 = vmatprep.mubr.msk.bf16.mxu1 %vm6055_vm1, %v7840_v1 }
 0x105   : > { %v5204_v43 = vpop.f32.mrf.mxu0  ;;  %v5248_v46 = vpop.f32.mrf.mxu1 }
 0x107   : > { %v6497_v47 = vpop.f32.mrf.mxu0  ;;  %v6502_v24 = vpop.f32.mrf.mxu1 }
 0x108   : > { %7865 = vst [vmem:[#allocation4_spill] sm:$0xff] %v6502_v24 }
 0x109   : > { %v5205_v51 = vpop.f32.mrf.mxu0  ;;  %v5249_v54 = vpop.f32.mrf.mxu1 }
 0x10b   : > { %v6505_v58 = vpop.f32.mrf.mxu0  ;;  %5431 = vmatmul.mubr.msk.bf16.gmra.mxu0 %vm404_vm2, %v6254_v26  ;;  %v650_v59 = vpop.f32.mrf.mxu1  ;;  %5437 = vmatmul.mubr.msk.bf16.vlgmr.msra.gmra.mxu1 %vm404_vm2, %v6121_v5 }
 0x10c   : > { %5522 = vmatprep.mubr.msk.bf16.mxu0 %vm6055_vm1, %v7840_v1  ;;  %5607 = vmatpush3.bf16.msra.mxu1 %v2601_v55 }
 0x10d   : > { %v5208_v62 = vpop.f32.mrf.mxu0  ;;  %5440 = vmatprep.mubr.msk.bf16.mxu1 %vm6055_vm1, %v7840_v1  ;;  %v5252_v63 = vpop.f32.mrf.mxu1  ;;  %5778 = vmatprep.subr.bf16.mxu1 %v7840_v1 }
 0x10f   : > { %v6519_v26 = vpop.f32.mrf.mxu0  ;;  %v652_v4 = vpop.f32.mrf.mxu1 }
 0x111   : > { %v5209_v18 = vpop.f32.mrf.mxu0  ;;  %v5253_v30 = vpop.f32.mrf.mxu1 }
 0x113   : > { %v6522_v31 = vpop.f32.mrf.mxu0  ;;  %5523 = vmatmul.mubr.msk.bf16.vlgmr.msra.gmra.mxu0 %vm404_vm2, %v6121_v5  ;;  %v656_v38 = vpop.f32.mrf.mxu1  ;;  %5441 = vmatmul.mubr.msk.bf16.gmra.mxu1 %vm404_vm2, %v6138_v9 }
 0x114   : > { %5693 = vmatpush3.bf16.msra.mxu0 %v3057_v28  ;;  %5444 = vmatprep.mubr.msk.bf16.mxu1 %vm6055_vm1, %v7840_v1 }
 0x115   : > { %v5212_v39 = vpop.f32.mrf.mxu0  ;;  %5526 = vmatprep.mubr.msk.bf16.mxu0 %vm6055_vm1, %v7840_v1  ;;  %v5256_v43 = vpop.f32.mrf.mxu1  ;;  %5864 = vmatprep.subr.bf16.mxu0 %v7840_v1 }
 0x117   : > { %v6533_v46 = vpop.f32.mrf.mxu0  ;;  %v658_v50 = vpop.f32.mrf.mxu1 }
 0x119   : > { %v5213_v51 = vpop.f32.mrf.mxu0  ;;  %v5257_v5 = vpop.f32.mrf.mxu1 }
 0x11b   : > { %v6535_v54 = vpop.f32.mrf.mxu0  ;;  %5527 = vmatmul.mubr.msk.bf16.gmra.mxu0 %vm404_vm2, %v6138_v9  ;;  %v662_v55 = vpop.f32.mrf.mxu1  ;;  %5445 = vmatmul.mubr.msk.bf16.gmra.mxu1 %vm404_vm2, %v6153_v11 }
 0x11c   : > { %5530 = vmatprep.mubr.msk.bf16.mxu0 %vm6055_vm1, %v7840_v1  ;;  %5448 = vmatprep.mubr.msk.bf16.mxu1 %vm6055_vm1, %v7840_v1 }
 0x11d   : > { %v5216_v59 = vpop.f32.mrf.mxu0  ;;  %v5260_v62 = vpop.f32.mrf.mxu1 }
 0x11f   : > { %v6545_v63 = vpop.f32.mrf.mxu0  ;;  %v664_v3 = vpop.f32.mrf.mxu1 }
 0x121   : > { %v5217_v4 = vpop.f32.mrf.mxu0  ;;  %v5261_v18 = vpop.f32.mrf.mxu1 }
 0x123   : > { %v6547_v28 = vpop.f32.mrf.mxu0  ;;  %5531 = vmatmul.mubr.msk.bf16.gmra.mxu0 %vm404_vm2, %v6153_v11  ;;  %v814_v9 = vpop.f32.mrf.mxu1  ;;  %5449 = vmatmul.mubr.msk.bf16.gmra.mxu1 %vm404_vm2, %v6167_v13 }
 0x124   : > { %5534 = vmatprep.mubr.msk.bf16.mxu0 %vm6055_vm1, %v7840_v1  ;;  %5452 = vmatprep.mubr.msk.bf16.mxu1 %vm6055_vm1, %v7840_v1  ;;  %v1050_v39 = vrot.slane %v814_v9, 1 }
 0x125   : > { %v5220_v30 = vpop.f32.mrf.mxu0  ;;  %v5266_v38 = vpop.f32.mrf.mxu1 }
 0x127   : > { %v6557_v43 = vpop.f32.mrf.mxu0  ;;  %v817_v50 = vpop.f32.mrf.mxu1 }
 0x128   : > { %v1051_v51 = vrot.slane %v817_v50, 1 }
 0x129   : > { %v5221_v5 = vpop.f32.mrf.mxu0  ;;  %v5267_v11 = vpop.f32.mrf.mxu1 }
 0x12a   : > { %v1052_v55 = vsel %vm1049_vm3, %v1050_v39, %v1051_v51 }
 0x12b   : > { %v1270_v59 = vpop.f32.mrf.mxu0  ;;  %5535 = vmatmul.mubr.msk.bf16.gmra.mxu0 %vm404_vm2, %v6167_v13  ;;  %v822_v62 = vpop.f32.mrf.mxu1  ;;  %5453 = vmatmul.mubr.msk.bf16.gmra.mxu1 %vm404_vm2, %v6181_v15  ;;  %v1159_v50 = vadd.f32 %v1052_v55, %v6389_v32 }
 0x12c   : > { %5538 = vmatprep.mubr.msk.bf16.mxu0 %vm6055_vm1, %v7840_v1  ;;  %v1053_v3 = vrot.slane %v822_v62, 1  ;;  %5456 = vmatprep.mubr.msk.bf16.mxu1 %vm6055_vm1, %v7840_v1  ;;  %v1506_v38 = vrot.slane %v1270_v59, 2  ;;  %v7867_v59 = vmov 0.0  }
 0x12d   : > { %v5352_v4 = vpop.f32.mrf.mxu0  ;;  %v5270_v18 = vpop.f32.mrf.mxu1 }
 0x12e   : > { %v1054_v9 = vsel %vm1049_vm3, %v1051_v51, %v1053_v3 }
 0x12f   : > { %v1273_v30 = vpop.f32.mrf.mxu0  ;;  %v825_v39 = vpop.f32.mrf.mxu1  ;;  %v1160_v32 = vadd.f32 %v1054_v9, %v6401_v36 }
 0x130   : > { %v1507_v13 = vrot.slane %v1273_v30, 2  ;;  %v1055_v5 = vrot.slane %v825_v39, 1 }
 0x131   : > { %v5353_v11 = vpop.f32.mrf.mxu0  ;;  %v5271_v42 = vpop.f32.mrf.mxu1 }
 0x132   : > { %v1508_v24 = vsel %vm1505_vm4, %v1506_v38, %v1507_v13  ;;  %v1056_v62 = vsel %vm1049_vm3, %v1053_v3, %v1055_v5 }
 0x133   : > { %v6572_v4 = vadd.f32 %v1508_v24, %v1159_v50  ;;  %v1278_v1 = vpop.f32.mrf.mxu0  ;;  %5539 = vmatmul.mubr.msk.bf16.gmra.mxu0 %vm404_vm2, %v6181_v15  ;;  %v830_v51 = vpop.f32.mrf.mxu1  ;;  %5457 = vmatmul.mubr.msk.bf16.gmra.mxu1 %vm404_vm2, %v6195_v17  ;;  %v1161_v50 = vadd.f32 %v1056_v62, %v6405_v40 }
 0x134   : > { %v1509_v18 = vrot.slane %v1278_v1, 2  ;;  %5542 = vmatprep.mubr.msk.bf16.mxu0 %vm6055_vm1, %v7867_v59  ;;  %v1057_v55 = vrot.slane %v830_v51, 1  ;;  %5460 = vmatprep.mubr.msk.bf16.mxu1 %vm6055_vm1, %v7867_v59 }
 0x135   : > { %7866 = vst [vmem:[#allocation5_spill] sm:$0xff] %v6572_v4  ;;  %v5356_v42 = vpop.f32.mrf.mxu0  ;;  %v5274_v3 = vpop.f32.mrf.mxu1 }
 0x136   : > { %v1510_v24 = vsel %vm1505_vm4, %v1507_v13, %v1509_v18  ;;  %v1058_v15 = vsel %vm1049_vm3, %v1055_v5, %v1057_v55 }
 0x137   : > { %v6585_v30 = vadd.f32 %v1510_v24, %v1160_v32  ;;  %v1281_v1 = vpop.f32.mrf.mxu0  ;;  %v833_v38 = vpop.f32.mrf.mxu1  ;;  %v1162_v40 = vadd.f32 %v1058_v15, %v6417_v44 }
 0x138   : > { %v1511_v39 = vrot.slane %v1281_v1, 2  ;;  %v1059_v11 = vrot.slane %v833_v38, 1 }
 0x139   : > { %v5357_v4 = vpop.f32.mrf.mxu0  ;;  %v5275_v9 = vpop.f32.mrf.mxu1 }
 0x13a   : > { %v1512_v36 = vsel %vm1505_vm4, %v1509_v18, %v1511_v39  ;;  %v1060_v51 = vsel %vm1049_vm3, %v1057_v55, %v1059_v11 }
 0x13b   : > { %v6590_v42 = vadd.f32 %v1512_v36, %v1161_v50  ;;  %v1286_v13 = vpop.f32.mrf.mxu0  ;;  %5543 = vmatmul.mubr.msk.bf16.gmra.mxu0 %vm404_vm2, %v6195_v17  ;;  %v838_v5 = vpop.f32.mrf.mxu1  ;;  %5461 = vmatmul.mubr.msk.bf16.gmra.mxu1 %vm404_vm2, %v6209_v19  ;;  %v1163_v50 = vadd.f32 %v1060_v51, %v6421_v48 }
 0x13c   : > { %v1513_v32 = vrot.slane %v1286_v13, 2  ;;  %5546 = vmatprep.mubr.msk.bf16.mxu0 %vm6055_vm1, %v7867_v59  ;;  %v1061_v62 = vrot.slane %v838_v5, 1  ;;  %5464 = vmatprep.mubr.msk.bf16.mxu1 %vm6055_vm1, %v7867_v59 }
 0x13d   : > { %v5360_v4 = vpop.f32.mrf.mxu0  ;;  %v5278_v55 = vpop.f32.mrf.mxu1 }
 0x13e   : > { %v1514_v18 = vsel %vm1505_vm4, %v1511_v39, %v1513_v32  ;;  %v1062_v17 = vsel %vm1049_vm3, %v1059_v11, %v1061_v62 }
 0x13f   : > { %v6603_v24 = vadd.f32 %v1514_v18, %v1162_v40  ;;  %v1289_v3 = vpop.f32.mrf.mxu0  ;;  %v841_v1 = vpop.f32.mrf.mxu1  ;;  %v1164_v48 = vadd.f32 %v1062_v17, %v6433_v52 }
 0x140   : > { %v1515_v38 = vrot.slane %v1289_v3, 2  ;;  %v1063_v36 = vrot.slane %v841_v1, 1 }
 0x141   : > { %v5361_v9 = vpop.f32.mrf.mxu0  ;;  %v5279_v15 = vpop.f32.mrf.mxu1 }
 0x142   : > { %v1516_v44 = vsel %vm1505_vm4, %v1513_v32, %v1515_v38  ;;  %v1064_v13 = vsel %vm1049_vm3, %v1061_v62, %v1063_v36 }
 0x143   : > { %v6608_v5 = vadd.f32 %v1516_v44, %v1163_v50  ;;  %v1294_v39 = vpop.f32.mrf.mxu0  ;;  %5547 = vmatmul.mubr.msk.bf16.gmra.mxu0 %vm404_vm2, %v6209_v19  ;;  %v846_v11 = vpop.f32.mrf.mxu1  ;;  %5465 = vmatmul.mubr.msk.bf16.gmra.mxu1 %vm404_vm2, %v6223_v21  ;;  %v1165_v50 = vadd.f32 %v1064_v13, %v6437_v56 }
 0x144   : > { %v1517_v40 = vrot.slane %v1294_v39, 2  ;;  %5550 = vmatprep.mubr.msk.bf16.mxu0 %vm6055_vm1, %v7867_v59  ;;  %v1065_v51 = vrot.slane %v846_v11, 1  ;;  %5468 = vmatprep.mubr.msk.bf16.mxu1 %vm6055_vm1, %v7867_v59 }
 0x145   : > { %v5364_v32 = vpop.f32.mrf.mxu0  ;;  %v5282_v4 = vpop.f32.mrf.mxu1 }
 0x146   : > { %v1518_v62 = vsel %vm1505_vm4, %v1515_v38, %v1517_v40  ;;  %v1066_v19 = vsel %vm1049_vm3, %v1063_v36, %v1065_v51 }
 0x147   : > { %v6621_v18 = vadd.f32 %v1518_v62, %v1164_v48  ;;  %v1297_v55 = vpop.f32.mrf.mxu0  ;;  %v849_v3 = vpop.f32.mrf.mxu1  ;;  %v1166_v56 = vadd.f32 %v1066_v19, %v6449_v60 }
 0x148   : > { %v1519_v1 = vrot.slane %v1297_v55, 2  ;;  %v1067_v9 = vrot.slane %v849_v3, 1 }
 0x149   : > { %v5365_v44 = vpop.f32.mrf.mxu0  ;;  %v5283_v17 = vpop.f32.mrf.mxu1 }
 0x14a   : > { %v1520_v52 = vsel %vm1505_vm4, %v1517_v40, %v1519_v1  ;;  %v1068_v15 = vsel %vm1049_vm3, %v1065_v51, %v1067_v9 }
 0x14b   : > { %v6626_v39 = vadd.f32 %v1520_v52, %v1165_v50  ;;  %v1302_v38 = vpop.f32.mrf.mxu0  ;;  %5551 = vmatmul.mubr.msk.bf16.gmra.mxu0 %vm404_vm2, %v6223_v21  ;;  %v854_v36 = vpop.f32.mrf.mxu1  ;;  %5469 = vmatmul.mubr.msk.bf16.gmra.mxu1 %vm404_vm2, %v6237_v23  ;;  %v1167_v3 = vadd.f32 %v1068_v15, %v6453_v0 }
 0x14c   : > { %v1521_v11 = vrot.slane %v1302_v38, 2  ;;  %5554 = vmatprep.mubr.msk.bf16.mxu0 %vm6055_vm1, %v7867_v59  ;;  %v1069_v13 = vrot.slane %v854_v36, 1  ;;  %5472 = vmatprep.mubr.msk.bf16.mxu1 %vm6055_vm1, %v7867_v59 }
 0x14d   : > { %v5368_v40 = vpop.f32.mrf.mxu0  ;;  %v5286_v51 = vpop.f32.mrf.mxu1 }
 0x14e   : > { %v1522_v48 = vsel %vm1505_vm4, %v1519_v1, %v1521_v11  ;;  %v1070_v21 = vsel %vm1049_vm3, %v1067_v9, %v1069_v13 }
 0x14f   : > { %v6639_v32 = vadd.f32 %v1522_v48, %v1166_v56  ;;  %v1305_v62 = vpop.f32.mrf.mxu0  ;;  %v857_v4 = vpop.f32.mrf.mxu1  ;;  %v1168_v0 = vadd.f32 %v1070_v21, %v6465_v6 }
 0x150   : > { %v1523_v55 = vrot.slane %v1305_v62, 2  ;;  %v1071_v50 = vrot.slane %v857_v4, 1 }
 0x151   : > { %v5369_v44 = vpop.f32.mrf.mxu0  ;;  %v5287_v19 = vpop.f32.mrf.mxu1 }
 0x152   : > { %v1524_v60 = vsel %vm1505_vm4, %v1521_v11, %v1523_v55  ;;  %v1072_v52 = vsel %vm1049_vm3, %v1069_v13, %v1071_v50 }
 0x153   : > { %v6644_v17 = vadd.f32 %v1524_v60, %v1167_v3  ;;  %v1310_v1 = vpop.f32.mrf.mxu0  ;;  %5555 = vmatmul.mubr.msk.bf16.gmra.mxu0 %vm404_vm2, %v6237_v23  ;;  %v862_v9 = vpop.f32.mrf.mxu1  ;;  %5473 = vmatmul.mubr.msk.bf16.gmra.mxu1 %vm404_vm2, %v6251_v25  ;;  %v1169_v62 = vadd.f32 %v1072_v52, %v6469_v20 }
 0x154   : > { %v1525_v38 = vrot.slane %v1310_v1, 2  ;;  %5558 = vmatprep.mubr.msk.bf16.mxu0 %vm6055_vm1, %v7867_v59  ;;  %v1073_v15 = vrot.slane %v862_v9, 1  ;;  %5476 = vmatprep.mubr.msk.bf16.mxu1 %vm6055_vm1, %v7867_v59 }
 0x155   : > { %v5372_v36 = vpop.f32.mrf.mxu0  ;;  %v5290_v56 = vpop.f32.mrf.mxu1 }
 0x156   : > { %v1526_v11 = vsel %vm1505_vm4, %v1523_v55, %v1525_v38  ;;  %v1074_v23 = vsel %vm1049_vm3, %v1071_v50, %v1073_v15 }
 0x157   : > { %v6657_v13 = vadd.f32 %v1526_v11, %v1168_v0  ;;  %v1313_v40 = vpop.f32.mrf.mxu0  ;;  %v865_v48 = vpop.f32.mrf.mxu1  ;;  %v1170_v20 = vadd.f32 %v1074_v23, %v6481_v34 }
 0x158   : > { %v1527_v51 = vrot.slane %v1313_v40, 2  ;;  %v1075_v4 = vrot.slane %v865_v48, 1 }
 0x159   : > { %v5373_v3 = vpop.f32.mrf.mxu0  ;;  %v5291_v21 = vpop.f32.mrf.mxu1 }
 0x15a   : > { %v1528_v6 = vsel %vm1505_vm4, %v1525_v38, %v1527_v51  ;;  %v1076_v44 = vsel %vm1049_vm3, %v1073_v15, %v1075_v4 }
 0x15b   : > { %v6662_v60 = vadd.f32 %v1528_v6, %v1169_v62  ;;  %v1318_v55 = vpop.f32.mrf.mxu0  ;;  %5559 = vmatmul.mubr.msk.bf16.gmra.mxu0 %vm404_vm2, %v6251_v25  ;;  %v870_v50 = vpop.f32.mrf.mxu1  ;;  %5477 = vmatmul.mubr.msk.bf16.gmra.mxu1 %vm404_vm2, %v6265_v27  ;;  %v1171_v56 = vadd.f32 %v1076_v44, %v6485_v22 }
 0x15c   : > { %v1529_v19 = vrot.slane %v1318_v55, 2  ;;  %5562 = vmatprep.mubr.msk.bf16.mxu0 %vm6055_vm1, %v7867_v59  ;;  %v1077_v52 = vrot.slane %v870_v50, 1  ;;  %5480 = vmatprep.mubr.msk.bf16.mxu1 %vm6055_vm1, %v7867_v59 }
 0x15d   : > { %v5376_v1 = vpop.f32.mrf.mxu0  ;;  %v5294_v38 = vpop.f32.mrf.mxu1 }
 0x15e   : > { %v1530_v9 = vsel %vm1505_vm4, %v1527_v51, %v1529_v19  ;;  %v1078_v25 = vsel %vm1049_vm3, %v1075_v4, %v1077_v52 }
 0x15f   : > { %v6675_v0 = vadd.f32 %v1530_v9, %v1170_v20  ;;  %v1321_v15 = vpop.f32.mrf.mxu0  ;;  %v873_v36 = vpop.f32.mrf.mxu1  ;;  %v1172_v22 = vadd.f32 %v1078_v25, %v6497_v47 }
 0x160   : > { %v1531_v11 = vrot.slane %v1321_v15, 2  ;;  %v1079_v40 = vrot.slane %v873_v36, 1 }
 0x161   : > { %v5377_v48 = vpop.f32.mrf.mxu0  ;;  %v5295_v23 = vpop.f32.mrf.mxu1 }
 0x162   : > { %v1532_v34 = vsel %vm1505_vm4, %v1529_v19, %v1531_v11  ;;  %v1080_v62 = vsel %vm1049_vm3, %v1077_v52, %v1079_v40 }
 0x163   : > { %v6680_v3 = vadd.f32 %v1532_v34, %v1171_v56  ;;  %v1326_v51 = vpop.f32.mrf.mxu0  ;;  %5563 = vmatmul.mubr.msk.bf16.gmra.mxu0 %vm404_vm2, %v6265_v27  ;;  %v878_v4 = vpop.f32.mrf.mxu1  ;;  %5481 = vmatmul.mubr.msk.bf16.gmra.mxu1 %vm404_vm2, %v6125_v7  ;;  %v1173_v9 = vadd.f32 %v1080_v62, %v6505_v58 }
 0x164   : > { %v1533_v6 = vrot.slane %v1326_v51, 2  ;;  %5566 = vmatprep.mubr.msk.bf16.mxu0 %vm6055_vm1, %v7867_v59  ;;  %v1081_v21 = vrot.slane %v878_v4, 1  ;;  %5484 = vmatprep.mubr.msk.bf16.mxu1 %vm6055_vm1, %v7867_v59 }
 0x165   : > { %v5380_v44 = vpop.f32.mrf.mxu0  ;;  %v5298_v50 = vpop.f32.mrf.mxu1 }
 0x166   : > { %v1534_v55 = vsel %vm1505_vm4, %v1531_v11, %v1533_v6  ;;  %v1082_v27 = vsel %vm1049_vm3, %v1079_v40, %v1081_v21 }
 0x167   : > { %v6693_v19 = vadd.f32 %v1534_v55, %v1172_v22  ;;  %v1329_v20 = vpop.f32.mrf.mxu0  ;;  %v881_v52 = vpop.f32.mrf.mxu1  ;;  %v1174_v58 = vadd.f32 %v1082_v27, %v6519_v26 }
 0x168   : > { %v1535_v1 = vrot.slane %v1329_v20, 2  ;;  %v1083_v38 = vrot.slane %v881_v52, 1 }
 0x169   : > { %v5381_v15 = vpop.f32.mrf.mxu0  ;;  %v5299_v25 = vpop.f32.mrf.mxu1 }
 0x16a   : > { %v1536_v47 = vsel %vm1505_vm4, %v1533_v6, %v1535_v1  ;;  %v1084_v36 = vsel %vm1049_vm3, %v1081_v21, %v1083_v38 }
 0x16b   : > { %v6698_v56 = vadd.f32 %v1536_v47, %v1173_v9  ;;  %v1334_v11 = vpop.f32.mrf.mxu0  ;;  %5567 = vmatmul.mubr.msk.bf16.gmra.mxu0 %vm404_vm2, %v6125_v7  ;;  %v886_v40 = vpop.f32.mrf.mxu1  ;;  %5485 = vmatmul.mubr.msk.bf16.gmra.mxu1 %vm404_vm2, %v6142_v10  ;;  %v1175_v44 = vadd.f32 %v1084_v36, %v6522_v31 }
 0x16c   : > { %v1537_v48 = vrot.slane %v1334_v11, 2  ;;  %5570 = vmatprep.mubr.msk.bf16.mxu0 %vm6055_vm1, %v7867_v59  ;;  %v1085_v34 = vrot.slane %v886_v40, 1  ;;  %5488 = vmatprep.mubr.msk.bf16.mxu1 %vm6055_vm1, %v7867_v59 }
 0x16d   : > { %v5384_v23 = vpop.f32.mrf.mxu0  ;;  %v5302_v51 = vpop.f32.mrf.mxu1 }
 0x16e   : > { %v1538_v62 = vsel %vm1505_vm4, %v1535_v1, %v1537_v48  ;;  %v1086_v7 = vsel %vm1049_vm3, %v1083_v38, %v1085_v34 }
 0x16f   : > { %v6711_v4 = vadd.f32 %v1538_v62, %v1174_v58  ;;  %v1337_v6 = vpop.f32.mrf.mxu0  ;;  %v889_v22 = vpop.f32.mrf.mxu1  ;;  %v1176_v31 = vadd.f32 %v1086_v7, %v6533_v46 }
 0x170   : > { %v1539_v21 = vrot.slane %v1337_v6, 2  ;;  %v1087_v55 = vrot.slane %v889_v22, 1 }
 0x171   : > { %v5385_v50 = vpop.f32.mrf.mxu0  ;;  %v5303_v27 = vpop.f32.mrf.mxu1 }
 0x172   : > { %v1540_v26 = vsel %vm1505_vm4, %v1537_v48, %v1539_v21  ;;  %v1088_v20 = vsel %vm1049_vm3, %v1085_v34, %v1087_v55 }
 0x173   : > { %v6716_v52 = vadd.f32 %v1540_v26, %v1175_v44  ;;  %v1342_v1 = vpop.f32.mrf.mxu0  ;;  %5571 = vmatmul.mubr.msk.bf16.gmra.mxu0 %vm404_vm2, %v6142_v10  ;;  %v894_v9 = vpop.f32.mrf.mxu1  ;;  %5489 = vmatmul.mubr.msk.bf16.gmra.mxu1 %vm404_vm2, %v6156_v12  ;;  %v1177_v34 = vadd.f32 %v1088_v20, %v6535_v54 }
 0x174   : > { %v1541_v38 = vrot.slane %v1342_v1, 2  ;;  %5574 = vmatprep.mubr.msk.bf16.mxu0 %vm6055_vm1, %v7867_v59  ;;  %v1089_v15 = vrot.slane %v894_v9, 1  ;;  %5492 = vmatprep.mubr.msk.bf16.mxu1 %vm6055_vm1, %v7867_v59 }
 0x175   : > { %v5388_v47 = vpop.f32.mrf.mxu0  ;;  %v5306_v36 = vpop.f32.mrf.mxu1 }
 0x176   : > { %v1542_v25 = vsel %vm1505_vm4, %v1539_v21, %v1541_v38  ;;  %v1090_v10 = vsel %vm1049_vm3, %v1087_v55, %v1089_v15 }
 0x177   : > { %v6729_v11 = vadd.f32 %v1542_v25, %v1176_v31  ;;  %v1345_v40 = vpop.f32.mrf.mxu0  ;;  %v897_v48 = vpop.f32.mrf.mxu1  ;;  %v1178_v54 = vadd.f32 %v1090_v10, %v6545_v63 }
 0x178   : > { %v1543_v58 = vrot.slane %v1345_v40, 2  ;;  %v1091_v23 = vrot.slane %v897_v48, 1  ;;  %v6755_v40 = vld [vmem:[%s6118_s25 + $0x70] sm:$0xff]  }
 0x179   : > { %v5389_v62 = vpop.f32.mrf.mxu0  ;;  %v5307_v51 = vpop.f32.mrf.mxu1 }
 0x17a   : > { %v1544_v46 = vsel %vm1505_vm4, %v1541_v38, %v1543_v58  ;;  %v1092_v7 = vsel %vm1049_vm3, %v1089_v15, %v1091_v23 }
 0x17b   : > { %v6734_v6 = vadd.f32 %v1544_v46, %v1177_v34  ;;  %v1350_v22 = vpop.f32.mrf.mxu0  ;;  %5575 = vmatmul.mubr.msk.bf16.gmra.mxu0 %vm404_vm2, %v6156_v12  ;;  %v902_v21 = vpop.f32.mrf.mxu1  ;;  %5493 = vmatmul.mubr.msk.bf16.gmra.mxu1 %vm404_vm2, %v6170_v14  ;;  %v1179_v38 = vadd.f32 %v1092_v7, %v6547_v28 }
 0x17c   : > { %v1545_v44 = vrot.slane %v1350_v22, 2  ;;  %5578 = vmatprep.mubr.msk.bf16.mxu0 %vm6055_vm1, %v7867_v59  ;;  %v1093_v55 = vrot.slane %v902_v21, 1  ;;  %5496 = vmatprep.mubr.msk.bf16.mxu1 %vm6055_vm1, %v7867_v59 }
 0x17d   : > { %v5392_v50 = vpop.f32.mrf.mxu0  ;;  %v5310_v27 = vpop.f32.mrf.mxu1 }
 0x17e   : > { %v1546_v26 = vsel %vm1505_vm4, %v1543_v58, %v1545_v44  ;;  %v1094_v12 = vsel %vm1049_vm3, %v1091_v23, %v1093_v55 }
 0x17f   : > { %v6747_v20 = vadd.f32 %v1546_v26, %v1178_v54  ;;  %v1353_v1 = vpop.f32.mrf.mxu0  ;;  %v905_v14 = vpop.f32.mrf.mxu1  ;;  %v1180_v28 = vadd.f32 %v1094_v12, %v6557_v43 }
 0x180   : > { %v1547_v9 = vrot.slane %v1353_v1, 2  ;;  %v1095_v31 = vrot.slane %v905_v14, 1  ;;  %v6776_v1 = vld [vmem:[%s6118_s25 + $0x78] sm:$0xff]  }
 0x181   : > { %v5393_v63 = vpop.f32.mrf.mxu0  ;;  %v5311_v47 = vpop.f32.mrf.mxu1 }
 0x182   : > { %v1548_v15 = vsel %vm1505_vm4, %v1545_v44, %v1547_v9  ;;  %v1096_v25 = vsel %vm1049_vm3, %v1093_v55, %v1095_v31 }
 0x183   : > { %v6752_v36 = vadd.f32 %v1548_v15, %v1179_v38  ;;  %v1358_v10 = vpop.f32.mrf.mxu0  ;;  %5579 = vmatmul.mubr.msk.bf16.gmra.mxu0 %vm404_vm2, %v6755_v40  ;;  %v910_v48 = vpop.f32.mrf.mxu1  ;;  %5497 = vmatmul.mubr.msk.bf16.gmra.mxu1 %vm404_vm2, %v6184_v16  ;;  %v1181_v44 = vadd.f32 %v1096_v25, %v6393_v33  ;;  %v6781_v38 = vld [vmem:[%s6118_s25 + $0x80] sm:$0xff]  }
 0x184   : > { %v1549_v58 = vrot.slane %v1358_v10, 2  ;;  %5582 = vmatprep.mubr.msk.bf16.mxu0 %vm6055_vm1, %v7867_v59  ;;  %v1097_v34 = vrot.slane %v910_v48, 1  ;;  %5500 = vmatprep.mubr.msk.bf16.mxu1 %vm6055_vm1, %v7867_v59 }
 0x185   : > { %v5396_v23 = vpop.f32.mrf.mxu0  ;;  %v5314_v46 = vpop.f32.mrf.mxu1 }
 0x186   : > { %v1550_v62 = vsel %vm1505_vm4, %v1547_v9, %v1549_v58  ;;  %v1098_v51 = vsel %vm1049_vm3, %v1095_v31, %v1097_v34 }
 0x187   : > { %v6768_v7 = vadd.f32 %v1550_v62, %v1180_v28  ;;  %v1361_v16 = vpop.f32.mrf.mxu0  ;;  %v913_v22 = vpop.f32.mrf.mxu1  ;;  %v1182_v33 = vadd.f32 %v1098_v51, %v6403_v37 }
 0x188   : > { %v1551_v21 = vrot.slane %v1361_v16, 2  ;;  %v1099_v43 = vrot.slane %v913_v22, 1 }
 0x189   : > { %v5397_v54 = vpop.f32.mrf.mxu0  ;;  %v5315_v50 = vpop.f32.mrf.mxu1 }
 0x18a   : > { %v1552_v55 = vsel %vm1505_vm4, %v1549_v58, %v1551_v21  ;;  %v1100_v26 = vsel %vm1049_vm3, %v1097_v34, %v1099_v43 }
 0x18b   : > { %v6773_v27 = vadd.f32 %v1552_v55, %v1181_v44  ;;  %v1366_v12 = vpop.f32.mrf.mxu0  ;;  %5583 = vmatmul.mubr.msk.bf16.gmra.mxu0 %vm404_vm2, %v6776_v1  ;;  %v918_v14 = vpop.f32.mrf.mxu1  ;;  %5501 = vmatmul.mubr.msk.bf16.gmra.mxu1 %vm404_vm2, %v6781_v38  ;;  %v1183_v34 = vadd.f32 %v1100_v26, %v6409_v41 }
 0x18c   : > { %v1553_v9 = vrot.slane %v1366_v12, 2  ;;  %5586 = vmatprep.mubr.msk.bf16.mxu0 %vm6055_vm1, %v7867_v59  ;;  %v1101_v31 = vrot.slane %v918_v14, 1  ;;  %5504 = vmatprep.mubr.msk.bf16.mxu1 %vm6055_vm1, %v7867_v59 }
 0x18d   : > { %v5400_v63 = vpop.f32.mrf.mxu0  ;;  %v5318_v47 = vpop.f32.mrf.mxu1 }
 0x18e   : > { %v1554_v15 = vsel %vm1505_vm4, %v1551_v21, %v1553_v9  ;;  %v1102_v25 = vsel %vm1049_vm3, %v1099_v43, %v1101_v31  ;;  %v6802_v43 = vld [vmem:[%s6118_s25 + $0x88] sm:$0xff]  }
 0x18f   : > { %v6792_v10 = vadd.f32 %v1554_v15, %v1182_v33  ;;  %v1369_v48 = vpop.f32.mrf.mxu0  ;;  %v921_v58 = vpop.f32.mrf.mxu1  ;;  %v1184_v41 = vadd.f32 %v1102_v25, %v6419_v45 }
 0x190   : > { %v1555_v28 = vrot.slane %v1369_v48, 2  ;;  %v1103_v23 = vrot.slane %v921_v58, 1 }
 0x191   : > { %v5401_v37 = vpop.f32.mrf.mxu0  ;;  %v5319_v46 = vpop.f32.mrf.mxu1 }
 0x192   : > { %v1556_v62 = vsel %vm1505_vm4, %v1553_v9, %v1555_v28  ;;  %v1104_v51 = vsel %vm1049_vm3, %v1101_v31, %v1103_v23  ;;  %v6823_v37 = vld [vmem:[%s6118_s25 + $0x90] sm:$0xff]  }
 0x193   : > { %v6797_v16 = vadd.f32 %v1556_v62, %v1183_v34  ;;  %v1374_v22 = vpop.f32.mrf.mxu0  ;;  %5587 = vmatmul.mubr.msk.bf16.gmra.mxu0 %vm404_vm2, %v6781_v38  ;;  %v926_v21 = vpop.f32.mrf.mxu1  ;;  %5505 = vmatmul.mubr.msk.bf16.gmra.mxu1 %vm404_vm2, %v6802_v43  ;;  %v1185_v63 = vadd.f32 %v1104_v51, %v6425_v49 }
 0x194   : > { %v1557_v44 = vrot.slane %v1374_v22, 2  ;;  %5590 = vmatprep.mubr.msk.bf16.mxu0 %vm6055_vm1, %v7867_v59  ;;  %v1105_v54 = vrot.slane %v926_v21, 1  ;;  %5508 = vmatprep.mubr.msk.bf16.mxu1 %vm6055_vm1, %v7867_v59 }
 0x195   : > { %v5404_v55 = vpop.f32.mrf.mxu0  ;;  %v5322_v26 = vpop.f32.mrf.mxu1 }
 0x196   : > { %v1558_v50 = vsel %vm1505_vm4, %v1555_v28, %v1557_v44  ;;  %v1106_v12 = vsel %vm1049_vm3, %v1103_v23, %v1105_v54 }
 0x197   : > { %v6813_v14 = vadd.f32 %v1558_v50, %v1184_v41  ;;  %v1377_v9 = vpop.f32.mrf.mxu0  ;;  %v929_v33 = vpop.f32.mrf.mxu1  ;;  %v1186_v49 = vadd.f32 %v1106_v12, %v6435_v53 }
 0x198   : > { %v1559_v31 = vrot.slane %v1377_v9, 2  ;;  %v1107_v15 = vrot.slane %v929_v33, 1 }
 0x199   : > { %v5405_v45 = vpop.f32.mrf.mxu0  ;;  %v5323_v25 = vpop.f32.mrf.mxu1 }
 0x19a   : > { %v1560_v47 = vsel %vm1505_vm4, %v1557_v44, %v1559_v31  ;;  %v1108_v48 = vsel %vm1049_vm3, %v1105_v54, %v1107_v15 }
 0x19b   : > { %v6818_v58 = vadd.f32 %v1560_v47, %v1185_v63  ;;  %v1382_v28 = vpop.f32.mrf.mxu0  ;;  %5591 = vmatmul.mubr.msk.bf16.gmra.mxu0 %vm404_vm2, %v6802_v43  ;;  %v934_v34 = vpop.f32.mrf.mxu1  ;;  %5509 = vmatmul.mubr.msk.bf16.gmra.mxu1 %vm404_vm2, %v6823_v37  ;;  %v1187_v50 = vadd.f32 %v1108_v48, %v6441_v57  ;;  %v6844_v47 = vld [vmem:[%s6118_s25 + $0x98] sm:$0xff]  }
 0x19c   : > { %v1561_v23 = vrot.slane %v1382_v28, 2  ;;  %5594 = vmatprep.mubr.msk.bf16.mxu0 %vm6055_vm1, %v7867_v59  ;;  %v1109_v62 = vrot.slane %v934_v34, 1  ;;  %5512 = vmatprep.mubr.msk.bf16.mxu1 %vm6055_vm1, %v7867_v59 }
 0x19d   : > { %v5408_v46 = vpop.f32.mrf.mxu0  ;;  %v5326_v22 = vpop.f32.mrf.mxu1 }
 0x19e   : > { %v1562_v51 = vsel %vm1505_vm4, %v1559_v31, %v1561_v23  ;;  %v1110_v21 = vsel %vm1049_vm3, %v1107_v15, %v1109_v62 }
 0x19f   : > { %v6834_v44 = vadd.f32 %v1562_v51, %v1186_v49  ;;  %v1385_v41 = vpop.f32.mrf.mxu0  ;;  %v937_v54 = vpop.f32.mrf.mxu1  ;;  %v1188_v57 = vadd.f32 %v1110_v21, %v6451_v61 }
 0x1a0   : > { %v1563_v55 = vrot.slane %v1385_v41, 2  ;;  %v1111_v26 = vrot.slane %v937_v54, 1 }
 0x1a1   : > { %v5409_v53 = vpop.f32.mrf.mxu0  ;;  %v5327_v9 = vpop.f32.mrf.mxu1 }
 0x1a2   : > { %v1564_v12 = vsel %vm1505_vm4, %v1561_v23, %v1563_v55  ;;  %v1112_v33 = vsel %vm1049_vm3, %v1109_v62, %v1111_v26  ;;  %v6865_v9 = vld [vmem:[%s6118_s25 + $0xa0] ss:$0 sps:$4 sm:$0x77]  }
 0x1a3   : > { %v6839_v63 = vadd.f32 %v1564_v12, %v1187_v50  ;;  %v1390_v31 = vpop.f32.mrf.mxu0  ;;  %5595 = vmatmul.mubr.msk.bf16.gmra.mxu0 %vm404_vm2, %v6823_v37  ;;  %v942_v15 = vpop.f32.mrf.mxu1  ;;  %5513 = vmatmul.mubr.msk.bf16.gmra.mxu1 %vm404_vm2, %v6844_v47  ;;  %v1189_v22 = vadd.f32 %v1112_v33, %v6457_v2 }
 0x1a4   : > { %v1565_v45 = vrot.slane %v1390_v31, 2  ;;  %5598 = vmatprep.mubr.msk.bf16.mxu0 %vm6055_vm1, %v7867_v59  ;;  %v1113_v25 = vrot.slane %v942_v15, 1  ;;  %5516 = vmatprep.mubr.msk.bf16.mxu1 %vm6055_vm1, %v7867_v59 }
 0x1a5   : > { %v5412_v48 = vpop.f32.mrf.mxu0  ;;  %v5330_v34 = vpop.f32.mrf.mxu1 }
 0x1a6   : > { %v1566_v28 = vsel %vm1505_vm4, %v1563_v55, %v1565_v45  ;;  %v1114_v23 = vsel %vm1049_vm3, %v1111_v26, %v1113_v25 }
 0x1a7   : > { %v6855_v49 = vadd.f32 %v1566_v28, %v1188_v57  ;;  %v1393_v62 = vpop.f32.mrf.mxu0  ;;  %v945_v46 = vpop.f32.mrf.mxu1  ;;  %v1190_v2 = vadd.f32 %v1114_v23, %v6467_v8  ;;  %v4931_v28 = vld [vmem:[%s7837_s1 + $0xe] sm:$0x3] }
 0x1a8   : > { %v1567_v51 = vrot.slane %v1393_v62, 2  ;;  %v1115_v41 = vrot.slane %v945_v46, 1 }
 0x1a9   : > { %v5413_v61 = vpop.f32.mrf.mxu0  ;;  %v5331_v54 = vpop.f32.mrf.mxu1 }
 0x1aa   : > { %v1568_v21 = vsel %vm1505_vm4, %v1565_v45, %v1567_v51  ;;  %v1116_v50 = vsel %vm1049_vm3, %v1113_v25, %v1115_v41  ;;  %v3512_v61 = vsel %vm468_vm0, %v4931_v28, 0 }
 0x1ab   : > { %v6860_v53 = vadd.f32 %v1568_v21, %v1189_v22  ;;  %v1398_v55 = vpop.f32.mrf.mxu0  ;;  %5599 = vmatmul.mubr.msk.bf16.gmra.mxu0 %vm404_vm2, %v6844_v47  ;;  %v950_v26 = vpop.f32.mrf.mxu1  ;;  %5517 = vmatmul.mubr.msk.bf16.gmra.mxu1 %vm404_vm2, %v6865_v9  ;;  %v1191_v23 = vadd.f32 %v1116_v50, %v6473_v29 }
 0x1ac   : > { %v1569_v12 = vrot.slane %v1398_v55, 2  ;;  %5602 = vmatprep.mubr.msk.bf16.mxu0 %vm6055_vm1, %v7867_v59  ;;  %v1117_v33 = vrot.slane %v950_v26, 1  ;;  %5608 = vmatprep.mubr.msk.bf16.mxu1 %vm6055_vm1, %v7867_v59 }
 0x1ad   : > { %v5416_v31 = vpop.f32.mrf.mxu0  ;;  %v5334_v45 = vpop.f32.mrf.mxu1 }
 0x1ae   : > { %v1570_v15 = vsel %vm1505_vm4, %v1567_v51, %v1569_v12  ;;  %v1118_v57 = vsel %vm1049_vm3, %v1115_v41, %v1117_v33 }
 0x1af   : > { %v6876_v25 = vadd.f32 %v1570_v15, %v1190_v2  ;;  %v1401_v48 = vpop.f32.mrf.mxu0  ;;  %v953_v34 = vpop.f32.mrf.mxu1  ;;  %v6890_v2 = vld [vmem:[%s6118_s25] sm:$0xff]   ;;  %v1192_v29 = vadd.f32 %v1118_v57, %v6483_v35  ;;  %v4953_v15 = vld [vmem:[%s7837_s1 + $0x10] sm:$0x3] }
 0x1b0   : > { %v1571_v8 = vrot.slane %v1401_v48, 2  ;;  %v1119_v62 = vrot.slane %v953_v34, 1  ;;  %v7868_v34 = vld [vmem:[#allocation3_spill] sm:$0xff] }
 0x1b1   : > { %v5417_v46 = vpop.f32.mrf.mxu0  ;;  %v5335_v51 = vpop.f32.mrf.mxu1 }
 0x1b2   : > { %v1572_v22 = vsel %vm1505_vm4, %v1569_v12, %v1571_v8  ;;  %v1120_v41 = vsel %vm1049_vm3, %v1117_v33, %v1119_v62 }
 0x1b3   : > { %v6885_v21 = vadd.f32 %v1572_v22, %v1191_v23  ;;  %v1406_v54 = vpop.f32.mrf.mxu0  ;;  %5603 = vmatmul.mubr.msk.bf16.gmra.mxu0 %vm404_vm2, %v6865_v9  ;;  %v958_v55 = vpop.f32.mrf.mxu1  ;;  %5609 = vmatmul.mubr.msk.bf16.vlgmr.msra.gmra.mxu1 %vm404_vm2, %v6890_v2  ;;  %v1193_v23 = vadd.f32 %v1120_v41, %v7868_v34  ;;  %v3968_v22 = vsel %vm468_vm0, %v4953_v15, 0  ;;  %v7869_v41 = vld [vmem:[#allocation4_spill] sm:$0xff] }
 0x1b4   : > { %v1573_v26 = vrot.slane %v1406_v54, 2  ;;  %5694 = vmatprep.mubr.msk.bf16.mxu0 %vm6055_vm1, %v7867_v59  ;;  %v1121_v50 = vrot.slane %v958_v55, 1  ;;  %5779 = vmatpush3.bf16.msra.mxu1 %v3512_v61 }
 0x1b5   : > { %v5420_v12 = vpop.f32.mrf.mxu0  ;;  %5612 = vmatprep.mubr.msk.bf16.mxu1 %vm6055_vm1, %v7867_v59  ;;  %v5338_v31 = vpop.f32.mrf.mxu1 }
 0x1b6   : > { %v1574_v33 = vsel %vm1505_vm4, %v1571_v8, %v1573_v26  ;;  %v1122_v45 = vsel %vm1049_vm3, %v1119_v62, %v1121_v50 }
 0x1b7   : > { %v6904_v48 = vadd.f32 %v1574_v33, %v1192_v29  ;;  %v1409_v28 = vpop.f32.mrf.mxu0  ;;  %v961_v35 = vpop.f32.mrf.mxu1  ;;  %v6914_v29 = vld [vmem:[%s6118_s25 + $0x8] sm:$0xff]   ;;  %v1194_v50 = vadd.f32 %v1122_v45, %v7869_v41 }
 0x1b8   : > { %v1575_v57 = vrot.slane %v1409_v28, 2 }
 0x1b9   : > { %v5421_v46 = vpop.f32.mrf.mxu0  ;;  %v5339_v51 = vpop.f32.mrf.mxu1 }
 0x1ba   : > { %v1576_v8 = vsel %vm1505_vm4, %v1573_v26, %v1575_v57  ;;  %v6929_v46 = vld [vmem:[%s6118_s25 + $0x10] sm:$0xff]  }
 0x1bb   : > { %v6909_v61 = vadd.f32 %v1576_v8, %v1193_v23  ;;  %v1414_v54 = vpop.f32.mrf.mxu0  ;;  %5695 = vmatmul.mubr.msk.bf16.vlgmr.msra.gmra.mxu0 %vm404_vm2, %v6890_v2  ;;  %v965_v62 = vpop.f32.mrf.mxu1  ;;  %5613 = vmatmul.mubr.msk.bf16.gmra.mxu1 %vm404_vm2, %v6914_v29  ;;  %7870 = vst [vmem:[#allocation3_spill] sm:$0xff] %v6929_v46 }
 0x1bc   : > { %v1577_v55 = vrot.slane %v1414_v54, 2  ;;  %5865 = vmatpush3.bf16.msra.mxu0 %v3968_v22  ;;  %5616 = vmatprep.mubr.msk.bf16.mxu1 %vm6055_vm1, %v7867_v59 }
 0x1bd   : > { %v5424_v12 = vpop.f32.mrf.mxu0  ;;  %5698 = vmatprep.mubr.msk.bf16.mxu0 %vm6055_vm1, %v7867_v59  ;;  %v5342_v33 = vpop.f32.mrf.mxu1 }
 0x1be   : > { %v1578_v26 = vsel %vm1505_vm4, %v1575_v57, %v1577_v55 }
 0x1bf   : > { %v6924_v31 = vadd.f32 %v1578_v26, %v1194_v50  ;;  %v1417_v15 = vpop.f32.mrf.mxu0  ;;  %v967_v28 = vpop.f32.mrf.mxu1  ;;  %v6940_v50 = vld [vmem:[%s6118_s25 + $0x18] sm:$0xff]  }
 0x1c0   : > { %7871 = vst [vmem:[#allocation4_spill] sm:$0xff] %v6940_v50 }
 0x1c1   : > { %v5425_v35 = vpop.f32.mrf.mxu0  ;;  %v5343_v34 = vpop.f32.mrf.mxu1 }
 0x1c3   : > { %v1421_v23 = vpop.f32.mrf.mxu0  ;;  %5699 = vmatmul.mubr.msk.bf16.gmra.mxu0 %vm404_vm2, %v6914_v29  ;;  %v971_v45 = vpop.f32.mrf.mxu1  ;;  %5617 = vmatmul.mubr.msk.bf16.gmra.mxu1 %vm404_vm2, %v6929_v46 }
 0x1c4   : > { %5702 = vmatprep.mubr.msk.bf16.mxu0 %vm6055_vm1, %v7867_v59  ;;  %5620 = vmatprep.mubr.msk.bf16.mxu1 %vm6055_vm1, %v7867_v59  ;;  %v6951_v45 = vld [vmem:[%s6118_s25 + $0x20] sm:$0xff]  }
 0x1c5   : > { %v5428_v57 = vpop.f32.mrf.mxu0  ;;  %v5346_v22 = vpop.f32.mrf.mxu1  ;;  %7872 = vst [vmem:[#allocation6_spill] sm:$0xff] %v6951_v45 }
 0x1c7   : > { %v1423_v8 = vpop.f32.mrf.mxu0  ;;  %v973_v51 = vpop.f32.mrf.mxu1 }
 0x1c9   : > { %v5429_v54 = vpop.f32.mrf.mxu0  ;;  %v5347_v62 = vpop.f32.mrf.mxu1 }
 0x1cb   : > { %v1427_v55 = vpop.f32.mrf.mxu0  ;;  %5703 = vmatmul.mubr.msk.bf16.gmra.mxu0 %vm404_vm2, %v6929_v46  ;;  %v1726_v41 = vpop.f32.mrf.mxu1  ;;  %5621 = vmatmul.mubr.msk.bf16.gmra.mxu1 %vm404_vm2, %v6940_v50 }
 0x1cc   : > { %5706 = vmatprep.mubr.msk.bf16.mxu0 %vm6055_vm1, %v7867_v59  ;;  %5624 = vmatprep.mubr.msk.bf16.mxu1 %vm6055_vm1, %v7867_v59 }
 0x1cd   : > { %v5432_v12 = vpop.f32.mrf.mxu0  ;;  %v5438_v26 = vpop.f32.mrf.mxu1 }
 0x1cf   : > { %v1429_v33 = vpop.f32.mrf.mxu0  ;;  %v1728_v15 = vpop.f32.mrf.mxu1 }
 0x1d0   : > { %v7873_v33 = vld [vmem:[#allocation5_spill] sm:$0xff] }
 0x1d1   : > { %v5433_v28 = vpop.f32.mrf.mxu0  ;;  %v5439_v35 = vpop.f32.mrf.mxu1 }
 0x1d2   : > { %v6964_v35 = vld [vmem:[%s6118_s25 + $0x28] sm:$0xff]  }
 0x1d3   : > { %v2181_v34 = vpop.f32.mrf.mxu0  ;;  %5707 = vmatmul.mubr.msk.bf16.gmra.mxu0 %vm404_vm2, %v6940_v50  ;;  %v1732_v23 = vpop.f32.mrf.mxu1  ;;  %5625 = vmatmul.mubr.msk.bf16.gmra.mxu1 %vm404_vm2, %v6951_v45  ;;  %7874 = vst [vmem:[#allocation5_spill] sm:$0xff] %v6964_v35 }
 0x1d4   : > { %5710 = vmatprep.mubr.msk.bf16.mxu0 %vm6055_vm1, %v7867_v59  ;;  %5628 = vmatprep.mubr.msk.bf16.mxu1 %vm6055_vm1, %v7867_v59  ;;  %v1961_v8 = vrot.slane %v1732_v23, 2 }
 0x1d5   : > { %v5524_v57 = vpop.f32.mrf.mxu0  ;;  %v5442_v22 = vpop.f32.mrf.mxu1 }
 0x1d7   : > { %v2183_v51 = vpop.f32.mrf.mxu0  ;;  %v1735_v54 = vpop.f32.mrf.mxu1 }
 0x1d8   : > { %v1962_v62 = vrot.slane %v1735_v54, 2 }
 0x1d9   : > { %v5525_v55 = vpop.f32.mrf.mxu0  ;;  %v5443_v41 = vpop.f32.mrf.mxu1 }
 0x1da   : > { %v1963_v12 = vsel %vm1505_vm4, %v1961_v8, %v1962_v62 }
 0x1db   : > { %v2187_v26 = vpop.f32.mrf.mxu0  ;;  %5711 = vmatmul.mubr.msk.bf16.gmra.mxu0 %vm404_vm2, %v6951_v45  ;;  %v2070_v15 = vadd.f32 %v1963_v12, %v7873_v33  ;;  %v1740_v28 = vpop.f32.mrf.mxu1  ;;  %5629 = vmatmul.mubr.msk.bf16.gmra.mxu1 %vm404_vm2, %v6964_v35 }
 0x1dc   : > { %5714 = vmatprep.mubr.msk.bf16.mxu0 %vm6055_vm1, %v7867_v59  ;;  %v1964_v34 = vrot.slane %v1740_v28, 2  ;;  %5632 = vmatprep.mubr.msk.bf16.mxu1 %vm6055_vm1, %v7867_v59  ;;  %v2417_v54 = vrot.slane %v2187_v26, 3  ;;  %v6982_v26 = vld [vmem:[%s6118_s25 + $0x30] sm:$0xff]  }
 0x1dd   : > { %v5528_v23 = vpop.f32.mrf.mxu0  ;;  %v5446_v57 = vpop.f32.mrf.mxu1  ;;  %7876 = vst [vmem:[#allocation8_spill] sm:$0xff] %v6982_v26 }
 0x1de   : > { %v1965_v22 = vsel %vm1505_vm4, %v1962_v62, %v1964_v34 }
 0x1df   : > { %v2190_v8 = vpop.f32.mrf.mxu0  ;;  %v2071_v51 = vadd.f32 %v1965_v22, %v6585_v30  ;;  %v1743_v55 = vpop.f32.mrf.mxu1 }
 0x1e0   : > { %v2418_v41 = vrot.slane %v2190_v8, 3  ;;  %v1966_v12 = vrot.slane %v1743_v55, 2 }
 0x1e1   : > { %v5529_v33 = vpop.f32.mrf.mxu0  ;;  %v5447_v28 = vpop.f32.mrf.mxu1 }
 0x1e2   : > { %v2419_v45 = vsel %vm2416_vm5, %v2417_v54, %v2418_v41  ;;  %v1967_v23 = vsel %vm1505_vm4, %v1964_v34, %v1966_v12 }
 0x1e3   : > { %v6976_v50 = vadd.f32 %v2419_v45, %v2070_v15  ;;  %v2195_v57 = vpop.f32.mrf.mxu0  ;;  %5715 = vmatmul.mubr.msk.bf16.gmra.mxu0 %vm404_vm2, %v6964_v35  ;;  %v2072_v62 = vadd.f32 %v1967_v23, %v6590_v42  ;;  %v1748_v46 = vpop.f32.mrf.mxu1  ;;  %5633 = vmatmul.mubr.msk.bf16.gmra.mxu1 %vm404_vm2, %v6982_v26 }
 0x1e4   : > { %v2420_v30 = vrot.slane %v2195_v57, 3  ;;  %5718 = vmatprep.mubr.msk.bf16.mxu0 %vm6055_vm1, %v7867_v59  ;;  %v1968_v22 = vrot.slane %v1748_v46, 2  ;;  %5636 = vmatprep.mubr.msk.bf16.mxu1 %vm6055_vm1, %v7867_v59 }
 0x1e5   : > { %7875 = vst [vmem:[#allocation7_spill] sm:$0xff] %v6976_v50  ;;  %v5532_v34 = vpop.f32.mrf.mxu0  ;;  %v5450_v15 = vpop.f32.mrf.mxu1 }
 0x1e6   : > { %v2421_v45 = vsel %vm2416_vm5, %v2418_v41, %v2420_v30  ;;  %v1969_v42 = vsel %vm1505_vm4, %v1966_v12, %v1968_v22 }
 0x1e7   : > { %v6992_v8 = vadd.f32 %v2421_v45, %v2071_v51  ;;  %v2198_v54 = vpop.f32.mrf.mxu0  ;;  %v2073_v55 = vadd.f32 %v1969_v42, %v6603_v24  ;;  %v1751_v33 = vpop.f32.mrf.mxu1  ;;  %v7003_v24 = vld [vmem:[%s6118_s25 + $0x38] sm:$0xff]  }
 0x1e8   : > { %v2422_v28 = vrot.slane %v2198_v54, 3  ;;  %v1970_v23 = vrot.slane %v1751_v33, 2  ;;  %7877 = vst [vmem:[#allocation9_spill] sm:$0xff] %v7003_v24 }
 0x1e9   : > { %v5533_v57 = vpop.f32.mrf.mxu0  ;;  %v5451_v34 = vpop.f32.mrf.mxu1 }
 0x1ea   : > { %v2423_v46 = vsel %vm2416_vm5, %v2420_v30, %v2422_v28  ;;  %v1971_v35 = vsel %vm1505_vm4, %v1968_v22, %v1970_v23 }
 0x1eb   : > { %v6997_v50 = vadd.f32 %v2423_v46, %v2072_v62  ;;  %v2203_v41 = vpop.f32.mrf.mxu0  ;;  %5719 = vmatmul.mubr.msk.bf16.gmra.mxu0 %vm404_vm2, %v6982_v26  ;;  %v2074_v51 = vadd.f32 %v1971_v35, %v6608_v5  ;;  %v1756_v12 = vpop.f32.mrf.mxu1  ;;  %5637 = vmatmul.mubr.msk.bf16.gmra.mxu1 %vm404_vm2, %v7003_v24 }
 0x1ec   : > { %v2424_v45 = vrot.slane %v2203_v41, 3  ;;  %5722 = vmatprep.mubr.msk.bf16.mxu0 %vm6055_vm1, %v7867_v59  ;;  %v1972_v30 = vrot.slane %v1756_v12, 2  ;;  %5640 = vmatprep.mubr.msk.bf16.mxu1 %vm6055_vm1, %v7867_v59 }
 0x1ed   : > { %v5536_v22 = vpop.f32.mrf.mxu0  ;;  %v5454_v15 = vpop.f32.mrf.mxu1 }
 0x1ee   : > { %v2425_v62 = vsel %vm2416_vm5, %v2422_v28, %v2424_v45  ;;  %v1973_v5 = vsel %vm1505_vm4, %v1970_v23, %v1972_v30 }
 0x1ef   : > { %v7013_v35 = vadd.f32 %v2425_v62, %v2073_v55  ;;  %v2206_v42 = vpop.f32.mrf.mxu0  ;;  %v2075_v54 = vadd.f32 %v1973_v5, %v6621_v18  ;;  %v1759_v33 = vpop.f32.mrf.mxu1  ;;  %v7024_v18 = vld [vmem:[%s6118_s25 + $0x40] sm:$0xff]  }
 0x1f0   : > { %v2426_v57 = vrot.slane %v2206_v42, 3  ;;  %v1974_v46 = vrot.slane %v1759_v33, 2  ;;  %7878 = vst [vmem:[#allocation10_spill] sm:$0xff] %v7024_v18 }
 0x1f1   : > { %v5537_v34 = vpop.f32.mrf.mxu0  ;;  %v5455_v12 = vpop.f32.mrf.mxu1 }
 0x1f2   : > { %v2427_v41 = vsel %vm2416_vm5, %v2424_v45, %v2426_v57  ;;  %v1975_v22 = vsel %vm1505_vm4, %v1972_v30, %v1974_v46 }
 0x1f3   : > { %v7018_v26 = vadd.f32 %v2427_v41, %v2074_v51  ;;  %v2211_v28 = vpop.f32.mrf.mxu0  ;;  %5723 = vmatmul.mubr.msk.bf16.gmra.mxu0 %vm404_vm2, %v7003_v24  ;;  %v2076_v55 = vadd.f32 %v1975_v22, %v6626_v39  ;;  %v1764_v23 = vpop.f32.mrf.mxu1  ;;  %5641 = vmatmul.mubr.msk.bf16.gmra.mxu1 %vm404_vm2, %v7024_v18 }
 0x1f4   : > { %v2428_v62 = vrot.slane %v2211_v28, 3  ;;  %5726 = vmatprep.mubr.msk.bf16.mxu0 %vm6055_vm1, %v7867_v59  ;;  %v1976_v45 = vrot.slane %v1764_v23, 2  ;;  %5644 = vmatprep.mubr.msk.bf16.mxu1 %vm6055_vm1, %v7867_v59 }
 0x1f5   : > { %v5540_v30 = vpop.f32.mrf.mxu0  ;;  %v5458_v15 = vpop.f32.mrf.mxu1 }
 0x1f6   : > { %v2429_v51 = vsel %vm2416_vm5, %v2426_v57, %v2428_v62  ;;  %v1977_v39 = vsel %vm1505_vm4, %v1974_v46, %v1976_v45 }
 0x1f7   : > { %v7034_v5 = vadd.f32 %v2429_v51, %v2075_v54  ;;  %v2214_v42 = vpop.f32.mrf.mxu0  ;;  %v2077_v33 = vadd.f32 %v1977_v39, %v6639_v32  ;;  %v1767_v34 = vpop.f32.mrf.mxu1  ;;  %v7045_v32 = vld [vmem:[%s6118_s25 + $0x48] sm:$0xff]  }
 0x1f8   : > { %v2430_v41 = vrot.slane %v2214_v42, 3  ;;  %v1978_v12 = vrot.slane %v1767_v34, 2  ;;  %7879 = vst [vmem:[#allocation11_spill] sm:$0xff] %v7045_v32 }
 0x1f9   : > { %v5541_v22 = vpop.f32.mrf.mxu0  ;;  %v5459_v23 = vpop.f32.mrf.mxu1 }
 0x1fa   : > { %v2431_v28 = vsel %vm2416_vm5, %v2428_v62, %v2430_v41  ;;  %v1979_v30 = vsel %vm1505_vm4, %v1976_v45, %v1978_v12 }
 0x1fb   : > { %v7039_v24 = vadd.f32 %v2431_v28, %v2076_v55  ;;  %v2219_v57 = vpop.f32.mrf.mxu0  ;;  %5727 = vmatmul.mubr.msk.bf16.gmra.mxu0 %vm404_vm2, %v7024_v18  ;;  %v2078_v54 = vadd.f32 %v1979_v30, %v6644_v17  ;;  %v1772_v46 = vpop.f32.mrf.mxu1  ;;  %5645 = vmatmul.mubr.msk.bf16.gmra.mxu1 %vm404_vm2, %v7045_v32 }
 0x1fc   : > { %v2432_v51 = vrot.slane %v2219_v57, 3  ;;  %5730 = vmatprep.mubr.msk.bf16.mxu0 %vm6055_vm1, %v7867_v59  ;;  %v1980_v62 = vrot.slane %v1772_v46, 2  ;;  %5648 = vmatprep.mubr.msk.bf16.mxu1 %vm6055_vm1, %v7867_v59 }
 0x1fd   : > { %v5544_v45 = vpop.f32.mrf.mxu0  ;;  %v5462_v15 = vpop.f32.mrf.mxu1 }
 0x1fe   : > { %v2433_v55 = vsel %vm2416_vm5, %v2430_v41, %v2432_v51  ;;  %v1981_v17 = vsel %vm1505_vm4, %v1978_v12, %v1980_v62 }
 0x1ff   : > { %v7055_v39 = vadd.f32 %v2433_v55, %v2077_v33  ;;  %v2222_v42 = vpop.f32.mrf.mxu0  ;;  %v2079_v34 = vadd.f32 %v1981_v17, %v6657_v13  ;;  %v1775_v22 = vpop.f32.mrf.mxu1  ;;  %v7066_v13 = vld [vmem:[%s6118_s25 + $0x50] sm:$0xff]  }
 0x200   : > { %v2434_v28 = vrot.slane %v2222_v42, 3  ;;  %v1982_v23 = vrot.slane %v1775_v22, 2  ;;  %7880 = vst [vmem:[#allocation12_spill] sm:$0xff] %v7066_v13 }
 0x201   : > { %v5545_v30 = vpop.f32.mrf.mxu0  ;;  %v5463_v46 = vpop.f32.mrf.mxu1 }
 0x202   : > { %v2435_v57 = vsel %vm2416_vm5, %v2432_v51, %v2434_v28  ;;  %v1983_v45 = vsel %vm1505_vm4, %v1980_v62, %v1982_v23 }
 0x203   : > { %v7060_v18 = vadd.f32 %v2435_v57, %v2078_v54  ;;  %v2227_v41 = vpop.f32.mrf.mxu0  ;;  %5731 = vmatmul.mubr.msk.bf16.gmra.mxu0 %vm404_vm2, %v7045_v32  ;;  %v2080_v33 = vadd.f32 %v1983_v45, %v6662_v60  ;;  %v1780_v12 = vpop.f32.mrf.mxu1  ;;  %5649 = vmatmul.mubr.msk.bf16.gmra.mxu1 %vm404_vm2, %v7066_v13 }
 0x204   : > { %v2436_v55 = vrot.slane %v2227_v41, 3  ;;  %5734 = vmatprep.mubr.msk.bf16.mxu0 %vm6055_vm1, %v7867_v59  ;;  %v1984_v51 = vrot.slane %v1780_v12, 2  ;;  %5652 = vmatprep.mubr.msk.bf16.mxu1 %vm6055_vm1, %v7867_v59 }
 0x205   : > { %v5548_v62 = vpop.f32.mrf.mxu0  ;;  %v5466_v15 = vpop.f32.mrf.mxu1 }
 0x206   : > { %v2437_v54 = vsel %vm2416_vm5, %v2434_v28, %v2436_v55  ;;  %v1985_v60 = vsel %vm1505_vm4, %v1982_v23, %v1984_v51 }
 0x207   : > { %v7076_v17 = vadd.f32 %v2437_v54, %v2079_v34  ;;  %v2230_v42 = vpop.f32.mrf.mxu0  ;;  %v2081_v22 = vadd.f32 %v1985_v60, %v6675_v0  ;;  %v1783_v30 = vpop.f32.mrf.mxu1  ;;  %v7087_v0 = vld [vmem:[%s6118_s25 + $0x58] sm:$0xff]  }
 0x208   : > { %v2438_v57 = vrot.slane %v2230_v42, 3  ;;  %v1986_v46 = vrot.slane %v1783_v30, 2  ;;  %7881 = vst [vmem:[#allocation13_spill] sm:$0xff] %v7087_v0 }
 0x209   : > { %v5549_v45 = vpop.f32.mrf.mxu0  ;;  %v5467_v12 = vpop.f32.mrf.mxu1 }
 0x20a   : > { %v2439_v41 = vsel %vm2416_vm5, %v2436_v55, %v2438_v57  ;;  %v1987_v62 = vsel %vm1505_vm4, %v1984_v51, %v1986_v46 }
 0x20b   : > { %v7081_v32 = vadd.f32 %v2439_v41, %v2080_v33  ;;  %v2235_v28 = vpop.f32.mrf.mxu0  ;;  %5735 = vmatmul.mubr.msk.bf16.gmra.mxu0 %vm404_vm2, %v7066_v13  ;;  %v2082_v34 = vadd.f32 %v1987_v62, %v6680_v3  ;;  %v1788_v23 = vpop.f32.mrf.mxu1  ;;  %5653 = vmatmul.mubr.msk.bf16.gmra.mxu1 %vm404_vm2, %v7087_v0 }
 0x20c   : > { %v2440_v54 = vrot.slane %v2235_v28, 3  ;;  %5738 = vmatprep.mubr.msk.bf16.mxu0 %vm6055_vm1, %v7867_v59  ;;  %v1988_v55 = vrot.slane %v1788_v23, 2  ;;  %5656 = vmatprep.mubr.msk.bf16.mxu1 %vm6055_vm1, %v7867_v59 }
 0x20d   : > { %v5552_v51 = vpop.f32.mrf.mxu0  ;;  %v5470_v15 = vpop.f32.mrf.mxu1 }
 0x20e   : > { %v2441_v33 = vsel %vm2416_vm5, %v2438_v57, %v2440_v54  ;;  %v1989_v3 = vsel %vm1505_vm4, %v1986_v46, %v1988_v55 }
 0x20f   : > { %v7097_v60 = vadd.f32 %v2441_v33, %v2081_v22  ;;  %v2238_v42 = vpop.f32.mrf.mxu0  ;;  %v2083_v30 = vadd.f32 %v1989_v3, %v6693_v19  ;;  %v1791_v45 = vpop.f32.mrf.mxu1  ;;  %v7108_v19 = vld [vmem:[%s6118_s25 + $0x60] sm:$0xff]  }
 0x210   : > { %v2442_v41 = vrot.slane %v2238_v42, 3  ;;  %v1990_v12 = vrot.slane %v1791_v45, 2  ;;  %7882 = vst [vmem:[#allocation14_spill] sm:$0xff] %v7108_v19 }
 0x211   : > { %v5553_v62 = vpop.f32.mrf.mxu0  ;;  %v5471_v23 = vpop.f32.mrf.mxu1 }
 0x212   : > { %v2443_v28 = vsel %vm2416_vm5, %v2440_v54, %v2442_v41  ;;  %v1991_v51 = vsel %vm1505_vm4, %v1988_v55, %v1990_v12 }
 0x213   : > { %v7102_v13 = vadd.f32 %v2443_v28, %v2082_v34  ;;  %v2243_v57 = vpop.f32.mrf.mxu0  ;;  %5739 = vmatmul.mubr.msk.bf16.gmra.mxu0 %vm404_vm2, %v7087_v0  ;;  %v2084_v22 = vadd.f32 %v1991_v51, %v6698_v56  ;;  %v1796_v46 = vpop.f32.mrf.mxu1  ;;  %5657 = vmatmul.mubr.msk.bf16.gmra.mxu1 %vm404_vm2, %v7108_v19 }
 0x214   : > { %v2444_v33 = vrot.slane %v2243_v57, 3  ;;  %5742 = vmatprep.mubr.msk.bf16.mxu0 %vm6055_vm1, %v7867_v59  ;;  %v1992_v54 = vrot.slane %v1796_v46, 2  ;;  %5660 = vmatprep.mubr.msk.bf16.mxu1 %vm6055_vm1, %v7867_v59 }
 0x215   : > { %v5556_v55 = vpop.f32.mrf.mxu0  ;;  %v5474_v15 = vpop.f32.mrf.mxu1 }
 0x216   : > { %v2445_v34 = vsel %vm2416_vm5, %v2442_v41, %v2444_v33  ;;  %v1993_v56 = vsel %vm1505_vm4, %v1990_v12, %v1992_v54 }
 0x217   : > { %v7118_v3 = vadd.f32 %v2445_v34, %v2083_v30  ;;  %v2246_v42 = vpop.f32.mrf.mxu0  ;;  %v2085_v45 = vadd.f32 %v1993_v56, %v6711_v4  ;;  %v1799_v62 = vpop.f32.mrf.mxu1  ;;  %v7129_v4 = vld [vmem:[%s6118_s25 + $0x68] sm:$0xff]  }
 0x218   : > { %v2446_v28 = vrot.slane %v2246_v42, 3  ;;  %v1994_v23 = vrot.slane %v1799_v62, 2 }
 0x219   : > { %v5557_v51 = vpop.f32.mrf.mxu0  ;;  %v5475_v46 = vpop.f32.mrf.mxu1 }
 0x21a   : > { %v2447_v57 = vsel %vm2416_vm5, %v2444_v33, %v2446_v28  ;;  %v1995_v55 = vsel %vm1505_vm4, %v1992_v54, %v1994_v23 }
 0x21b   : > { %v7123_v0 = vadd.f32 %v2447_v57, %v2084_v22  ;;  %v2251_v41 = vpop.f32.mrf.mxu0  ;;  %5743 = vmatmul.mubr.msk.bf16.gmra.mxu0 %vm404_vm2, %v7108_v19  ;;  %v2086_v30 = vadd.f32 %v1995_v55, %v6716_v52  ;;  %v1804_v12 = vpop.f32.mrf.mxu1  ;;  %5661 = vmatmul.mubr.msk.bf16.gmra.mxu1 %vm404_vm2, %v7129_v4 }
 0x21c   : > { %v2448_v34 = vrot.slane %v2251_v41, 3  ;;  %5746 = vmatprep.mubr.msk.bf16.mxu0 %vm6055_vm1, %v7867_v59  ;;  %v1996_v33 = vrot.slane %v1804_v12, 2  ;;  %5664 = vmatprep.mubr.msk.bf16.mxu1 %vm6055_vm1, %v7867_v59 }
 0x21d   : > { %v5560_v54 = vpop.f32.mrf.mxu0  ;;  %v5478_v15 = vpop.f32.mrf.mxu1 }
 0x21e   : > { %v2449_v22 = vsel %vm2416_vm5, %v2446_v28, %v2448_v34  ;;  %v1997_v52 = vsel %vm1505_vm4, %v1994_v23, %v1996_v33 }
 0x21f   : > { %v7139_v56 = vadd.f32 %v2449_v22, %v2085_v45  ;;  %v2254_v42 = vpop.f32.mrf.mxu0  ;;  %v2087_v62 = vadd.f32 %v1997_v52, %v6729_v11  ;;  %v1807_v51 = vpop.f32.mrf.mxu1 }
 0x220   : > { %v2450_v57 = vrot.slane %v2254_v42, 3  ;;  %v1998_v46 = vrot.slane %v1807_v51, 2 }
 0x221   : > { %v5561_v55 = vpop.f32.mrf.mxu0  ;;  %v5479_v12 = vpop.f32.mrf.mxu1 }
 0x222   : > { %v2451_v41 = vsel %vm2416_vm5, %v2448_v34, %v2450_v57  ;;  %v1999_v54 = vsel %vm1505_vm4, %v1996_v33, %v1998_v46 }
 0x223   : > { %v7144_v19 = vadd.f32 %v2451_v41, %v2086_v30  ;;  %v2259_v28 = vpop.f32.mrf.mxu0  ;;  %5747 = vmatmul.mubr.msk.bf16.gmra.mxu0 %vm404_vm2, %v7129_v4  ;;  %v2088_v45 = vadd.f32 %v1999_v54, %v6734_v6  ;;  %v1812_v23 = vpop.f32.mrf.mxu1  ;;  %5665 = vmatmul.mubr.msk.bf16.gmra.mxu1 %vm404_vm2, %v6755_v40 }
 0x224   : > { %v2452_v22 = vrot.slane %v2259_v28, 3  ;;  %5750 = vmatprep.mubr.msk.bf16.mxu0 %vm6055_vm1, %v7867_v59  ;;  %v2000_v11 = vrot.slane %v1812_v23, 2  ;;  %5668 = vmatprep.mubr.msk.bf16.mxu1 %vm6055_vm1, %v7867_v59 }
 0x225   : > { %v5564_v34 = vpop.f32.mrf.mxu0  ;;  %v5482_v33 = vpop.f32.mrf.mxu1 }
 0x226   : > { %v2453_v30 = vsel %vm2416_vm5, %v2450_v57, %v2452_v22  ;;  %v2001_v15 = vsel %vm1505_vm4, %v1998_v46, %v2000_v11 }
 0x227   : > { %v7157_v52 = vadd.f32 %v2453_v30, %v2087_v62  ;;  %v2262_v6 = vpop.f32.mrf.mxu0  ;;  %v2089_v42 = vadd.f32 %v2001_v15, %v6747_v20  ;;  %v1815_v51 = vpop.f32.mrf.mxu1 }
 0x228   : > { %v2454_v55 = vrot.slane %v2262_v6, 3  ;;  %v2002_v41 = vrot.slane %v1815_v51, 2 }
 0x229   : > { %v5565_v12 = vpop.f32.mrf.mxu0  ;;  %v5483_v28 = vpop.f32.mrf.mxu1 }
 0x22a   : > { %v2455_v54 = vsel %vm2416_vm5, %v2452_v22, %v2454_v55  ;;  %v2003_v23 = vsel %vm1505_vm4, %v2000_v11, %v2002_v41 }
 0x22b   : > { %v7162_v34 = vadd.f32 %v2455_v54, %v2088_v45  ;;  %v2267_v57 = vpop.f32.mrf.mxu0  ;;  %5751 = vmatmul.mubr.msk.bf16.gmra.mxu0 %vm404_vm2, %v6755_v40  ;;  %v2090_v62 = vadd.f32 %v2003_v23, %v6752_v36  ;;  %v1820_v46 = vpop.f32.mrf.mxu1  ;;  %5669 = vmatmul.mubr.msk.bf16.gmra.mxu1 %vm404_vm2, %v6776_v1 }
 0x22c   : > { %v2456_v30 = vrot.slane %v2267_v57, 3  ;;  %5754 = vmatprep.mubr.msk.bf16.mxu0 %vm6055_vm1, %v7867_v59  ;;  %v2004_v20 = vrot.slane %v1820_v46, 2  ;;  %5672 = vmatprep.mubr.msk.bf16.mxu1 %vm6055_vm1, %v7867_v59 }
 0x22d   : > { %v5568_v22 = vpop.f32.mrf.mxu0  ;;  %v5486_v11 = vpop.f32.mrf.mxu1 }
 0x22e   : > { %v2457_v45 = vsel %vm2416_vm5, %v2454_v55, %v2456_v30  ;;  %v2005_v40 = vsel %vm1505_vm4, %v2002_v41, %v2004_v20 }
 0x22f   : > { %v7175_v33 = vadd.f32 %v2457_v45, %v2089_v42  ;;  %v2270_v36 = vpop.f32.mrf.mxu0  ;;  %v2091_v15 = vadd.f32 %v2005_v40, %v6768_v7  ;;  %v1823_v6 = vpop.f32.mrf.mxu1 }
 0x230   : > { %v2458_v51 = vrot.slane %v2270_v36, 3  ;;  %v2006_v12 = vrot.slane %v1823_v6, 2 }
 0x231   : > { %v5569_v54 = vpop.f32.mrf.mxu0  ;;  %v5487_v23 = vpop.f32.mrf.mxu1 }
 0x232   : > { %v2459_v28 = vsel %vm2416_vm5, %v2456_v30, %v2458_v51  ;;  %v2007_v57 = vsel %vm1505_vm4, %v2004_v20, %v2006_v12 }
 0x233   : > { %v7180_v46 = vadd.f32 %v2459_v28, %v2090_v62  ;;  %v2275_v55 = vpop.f32.mrf.mxu0  ;;  %5755 = vmatmul.mubr.msk.bf16.gmra.mxu0 %vm404_vm2, %v6776_v1  ;;  %v2092_v42 = vadd.f32 %v2007_v57, %v6773_v27  ;;  %v1828_v41 = vpop.f32.mrf.mxu1  ;;  %5673 = vmatmul.mubr.msk.bf16.gmra.mxu1 %vm404_vm2, %v6781_v38 }
 0x234   : > { %v2460_v22 = vrot.slane %v2275_v55, 3  ;;  %5758 = vmatprep.mubr.msk.bf16.mxu0 %vm6055_vm1, %v7867_v59  ;;  %v2008_v7 = vrot.slane %v1828_v41, 2  ;;  %5676 = vmatprep.mubr.msk.bf16.mxu1 %vm6055_vm1, %v7867_v59 }
 0x235   : > { %v5572_v30 = vpop.f32.mrf.mxu0  ;;  %v5490_v20 = vpop.f32.mrf.mxu1 }
 0x236   : > { %v2461_v62 = vsel %vm2416_vm5, %v2458_v51, %v2460_v22  ;;  %v2009_v1 = vsel %vm1505_vm4, %v2006_v12, %v2008_v7 }
 0x237   : > { %v7193_v45 = vadd.f32 %v2461_v62, %v2091_v15  ;;  %v2278_v27 = vpop.f32.mrf.mxu0  ;;  %v2093_v11 = vadd.f32 %v2009_v1, %v6792_v10  ;;  %v1831_v40 = vpop.f32.mrf.mxu1 }
 0x238   : > { %v2462_v36 = vrot.slane %v2278_v27, 3  ;;  %v2010_v6 = vrot.slane %v1831_v40, 2 }
 0x239   : > { %v5573_v54 = vpop.f32.mrf.mxu0  ;;  %v5491_v23 = vpop.f32.mrf.mxu1 }
 0x23a   : > { %v2463_v28 = vsel %vm2416_vm5, %v2460_v22, %v2462_v36  ;;  %v2011_v57 = vsel %vm1505_vm4, %v2008_v7, %v2010_v6 }
 0x23b   : > { %v7198_v55 = vadd.f32 %v2463_v28, %v2092_v42  ;;  %v2283_v51 = vpop.f32.mrf.mxu0  ;;  %5759 = vmatmul.mubr.msk.bf16.gmra.mxu0 %vm404_vm2, %v6781_v38  ;;  %v2094_v15 = vadd.f32 %v2011_v57, %v6797_v16  ;;  %v1836_v12 = vpop.f32.mrf.mxu1  ;;  %5677 = vmatmul.mubr.msk.bf16.gmra.mxu1 %vm404_vm2, %v6802_v43 }
 0x23c   : > { %v2464_v41 = vrot.slane %v2283_v51, 3  ;;  %5762 = vmatprep.mubr.msk.bf16.mxu0 %vm6055_vm1, %v7867_v59  ;;  %v2012_v10 = vrot.slane %v1836_v12, 2  ;;  %5680 = vmatprep.mubr.msk.bf16.mxu1 %vm6055_vm1, %v7867_v59 }
 0x23d   : > { %v5576_v22 = vpop.f32.mrf.mxu0  ;;  %v5494_v7 = vpop.f32.mrf.mxu1 }
 0x23e   : > { %v2465_v42 = vsel %vm2416_vm5, %v2462_v36, %v2464_v41  ;;  %v2013_v38 = vsel %vm1505_vm4, %v2010_v6, %v2012_v10 }
 0x23f   : > { %v7211_v30 = vadd.f32 %v2465_v42, %v2093_v11  ;;  %v2286_v16 = vpop.f32.mrf.mxu0  ;;  %v2095_v62 = vadd.f32 %v2013_v38, %v6813_v14  ;;  %v1839_v20 = vpop.f32.mrf.mxu1 }
 0x240   : > { %v2466_v1 = vrot.slane %v2286_v16, 3  ;;  %v2014_v27 = vrot.slane %v1839_v20, 2 }
 0x241   : > { %v5577_v40 = vpop.f32.mrf.mxu0  ;;  %v5495_v28 = vpop.f32.mrf.mxu1 }
 0x242   : > { %v2467_v54 = vsel %vm2416_vm5, %v2464_v41, %v2466_v1  ;;  %v2015_v23 = vsel %vm1505_vm4, %v2012_v10, %v2014_v27 }
 0x243   : > { %v7216_v57 = vadd.f32 %v2467_v54, %v2094_v15  ;;  %v2291_v36 = vpop.f32.mrf.mxu0  ;;  %5763 = vmatmul.mubr.msk.bf16.gmra.mxu0 %vm404_vm2, %v6802_v43  ;;  %v2096_v11 = vadd.f32 %v2015_v23, %v6818_v58  ;;  %v1844_v6 = vpop.f32.mrf.mxu1  ;;  %5681 = vmatmul.mubr.msk.bf16.gmra.mxu1 %vm404_vm2, %v6823_v37 }
 0x244   : > { %v2468_v51 = vrot.slane %v2291_v36, 3  ;;  %5766 = vmatprep.mubr.msk.bf16.mxu0 %vm6055_vm1, %v7867_v59  ;;  %v2016_v14 = vrot.slane %v1844_v6, 2  ;;  %5684 = vmatprep.mubr.msk.bf16.mxu1 %vm6055_vm1, %v7867_v59 }
 0x245   : > { %v5580_v12 = vpop.f32.mrf.mxu0  ;;  %v5498_v41 = vpop.f32.mrf.mxu1 }
 0x246   : > { %v2469_v15 = vsel %vm2416_vm5, %v2466_v1, %v2468_v51  ;;  %v2017_v43 = vsel %vm1505_vm4, %v2014_v27, %v2016_v14 }
 0x247   : > { %v7229_v10 = vadd.f32 %v2469_v15, %v2095_v62  ;;  %v2294_v58 = vpop.f32.mrf.mxu0  ;;  %v2097_v22 = vadd.f32 %v2017_v43, %v6834_v44  ;;  %v1847_v42 = vpop.f32.mrf.mxu1 }
 0x248   : > { %v2470_v7 = vrot.slane %v2294_v58, 3  ;;  %v2018_v38 = vrot.slane %v1847_v42, 2 }
 0x249   : > { %v5581_v16 = vpop.f32.mrf.mxu0  ;;  %v5499_v40 = vpop.f32.mrf.mxu1 }
 0x24a   : > { %v2471_v20 = vsel %vm2416_vm5, %v2468_v51, %v2470_v7  ;;  %v2019_v54 = vsel %vm1505_vm4, %v2016_v14, %v2018_v38 }
 0x24b   : > { %v7234_v28 = vadd.f32 %v2471_v20, %v2096_v11  ;;  %v2299_v1 = vpop.f32.mrf.mxu0  ;;  %5767 = vmatmul.mubr.msk.bf16.gmra.mxu0 %vm404_vm2, %v6823_v37  ;;  %v2098_v62 = vadd.f32 %v2019_v54, %v6839_v63  ;;  %v1852_v27 = vpop.f32.mrf.mxu1  ;;  %5685 = vmatmul.mubr.msk.bf16.gmra.mxu1 %vm404_vm2, %v6844_v47 }
 0x24c   : > { %v2472_v23 = vrot.slane %v2299_v1, 3  ;;  %5770 = vmatprep.mubr.msk.bf16.mxu0 %vm6055_vm1, %v7867_v59  ;;  %v2020_v44 = vrot.slane %v1852_v27, 2  ;;  %5688 = vmatprep.mubr.msk.bf16.mxu1 %vm6055_vm1, %v7867_v59 }
 0x24d   : > { %v5584_v36 = vpop.f32.mrf.mxu0  ;;  %v5502_v6 = vpop.f32.mrf.mxu1 }
 0x24e   : > { %v2473_v11 = vsel %vm2416_vm5, %v2470_v7, %v2472_v23  ;;  %v2021_v37 = vsel %vm1505_vm4, %v2018_v38, %v2020_v44 }
 0x24f   : > { %v7247_v51 = vadd.f32 %v2473_v11, %v2097_v22  ;;  %v2302_v63 = vpop.f32.mrf.mxu0  ;;  %v2099_v14 = vadd.f32 %v2021_v37, %v6855_v49  ;;  %v1855_v12 = vpop.f32.mrf.mxu1 }
 0x250   : > { %v2474_v15 = vrot.slane %v2302_v63, 3  ;;  %v2022_v41 = vrot.slane %v1855_v12, 2 }
 0x251   : > { %v5585_v43 = vpop.f32.mrf.mxu0  ;;  %v5503_v42 = vpop.f32.mrf.mxu1 }
 0x252   : > { %v2475_v58 = vsel %vm2416_vm5, %v2472_v23, %v2474_v15  ;;  %v2023_v16 = vsel %vm1505_vm4, %v2020_v44, %v2022_v41 }
 0x253   : > { %v7252_v20 = vadd.f32 %v2475_v58, %v2098_v62  ;;  %v2307_v7 = vpop.f32.mrf.mxu0  ;;  %5771 = vmatmul.mubr.msk.bf16.gmra.mxu0 %vm404_vm2, %v6844_v47  ;;  %v2100_v22 = vadd.f32 %v2023_v16, %v6860_v53  ;;  %v1860_v38 = vpop.f32.mrf.mxu1  ;;  %5689 = vmatmul.mubr.msk.bf16.gmra.mxu1 %vm404_vm2, %v6865_v9 }
 0x254   : > { %v2476_v40 = vrot.slane %v2307_v7, 3  ;;  %5774 = vmatprep.mubr.msk.bf16.mxu0 %vm6055_vm1, %v7867_v59  ;;  %v2024_v49 = vrot.slane %v1860_v38, 2  ;;  %5780 = vmatprep.mubr.msk.bf16.mxu1 %vm6055_vm1, %v7867_v59 }
 0x255   : > { %v5588_v54 = vpop.f32.mrf.mxu0  ;;  %v5506_v62 = vpop.f32.mrf.mxu1 }
 0x256   : > { %v2477_v1 = vsel %vm2416_vm5, %v2474_v15, %v2476_v40  ;;  %v2025_v47 = vsel %vm1505_vm4, %v2022_v41, %v2024_v49 }
 0x257   : > { %v7265_v27 = vadd.f32 %v2477_v1, %v2099_v14  ;;  %v2310_v53 = vpop.f32.mrf.mxu0  ;;  %v2101_v23 = vadd.f32 %v2025_v47, %v6876_v25  ;;  %v1863_v44 = vpop.f32.mrf.mxu1 }
 0x258   : > { %v2478_v36 = vrot.slane %v2310_v53, 3  ;;  %v2026_v11 = vrot.slane %v1863_v44, 2 }
 0x259   : > { %v5589_v6 = vpop.f32.mrf.mxu0  ;;  %v5507_v63 = vpop.f32.mrf.mxu1 }
 0x25a   : > { %v2479_v37 = vsel %vm2416_vm5, %v2476_v40, %v2478_v36  ;;  %v2027_v12 = vsel %vm1505_vm4, %v2024_v49, %v2026_v11 }
 0x25b   : > { %v7270_v43 = vadd.f32 %v2479_v37, %v2100_v22  ;;  %v2315_v15 = vpop.f32.mrf.mxu0  ;;  %5775 = vmatmul.mubr.msk.bf16.gmra.mxu0 %vm404_vm2, %v6865_v9  ;;  %v2102_v14 = vadd.f32 %v2027_v12, %v6885_v21  ;;  %v1868_v41 = vpop.f32.mrf.mxu1  ;;  %5781 = vmatmul.mubr.msk.bf16.vlgmr.msra.gmra.mxu1 %vm404_vm2, %v6890_v2 }
 0x25c   : > { %v2480_v58 = vrot.slane %v2315_v15, 3  ;;  %5866 = vmatprep.mubr.msk.bf16.mxu0 %vm6055_vm1, %v7867_v59  ;;  %v2028_v25 = vrot.slane %v1868_v41, 2  ;;  %5784 = vmatprep.mubr.msk.bf16.mxu1 %vm6055_vm1, %v7867_v59 }
 0x25d   : > { %v5592_v42 = vpop.f32.mrf.mxu0  ;;  %v5510_v7 = vpop.f32.mrf.mxu1 }
 0x25e   : > { %v2481_v16 = vsel %vm2416_vm5, %v2478_v36, %v2480_v58  ;;  %v2029_v9 = vsel %vm1505_vm4, %v2026_v11, %v2028_v25 }
 0x25f   : > { %v7283_v22 = vadd.f32 %v2481_v16, %v2101_v23  ;;  %v2318_v21 = vpop.f32.mrf.mxu0  ;;  %v2103_v38 = vadd.f32 %v2029_v9, %v6904_v48  ;;  %v1871_v40 = vpop.f32.mrf.mxu1 }
 0x260   : > { %v2482_v49 = vrot.slane %v2318_v21, 3  ;;  %v2030_v54 = vrot.slane %v1871_v40, 2 }
 0x261   : > { %v5593_v1 = vpop.f32.mrf.mxu0  ;;  %v5511_v47 = vpop.f32.mrf.mxu1 }
 0x262   : > { %v2483_v62 = vsel %vm2416_vm5, %v2480_v58, %v2482_v49  ;;  %v2031_v53 = vsel %vm1505_vm4, %v2028_v25, %v2030_v54 }
 0x263   : > { %v7288_v44 = vadd.f32 %v2483_v62, %v2102_v14  ;;  %v2323_v36 = vpop.f32.mrf.mxu0  ;;  %5867 = vmatmul.mubr.msk.bf16.vlgmr.msra.gmra.mxu0 %vm404_vm2, %v6890_v2  ;;  %v2104_v23 = vadd.f32 %v2031_v53, %v6909_v61  ;;  %v1876_v11 = vpop.f32.mrf.mxu1  ;;  %5785 = vmatmul.mubr.msk.bf16.gmra.mxu1 %vm404_vm2, %v6914_v29 }
 0x264   : > { %v2484_v6 = vrot.slane %v2323_v36, 3  ;;  %5870 = vmatprep.mubr.msk.bf16.mxu0 %vm6055_vm1, %v7867_v59  ;;  %v2032_v48 = vrot.slane %v1876_v11, 2  ;;  %5788 = vmatprep.mubr.msk.bf16.mxu1 %vm6055_vm1, %v7867_v59  ;;  %v7884_v11 = vld [vmem:[#allocation4_spill] sm:$0xff] }
 0x265   : > { %v5596_v37 = vpop.f32.mrf.mxu0  ;;  %v5514_v12 = vpop.f32.mrf.mxu1 }
 0x266   : > { %v2485_v63 = vsel %vm2416_vm5, %v2482_v49, %v2484_v6  ;;  %v2033_v2 = vsel %vm1505_vm4, %v2030_v54, %v2032_v48  ;;  %v7883_v49 = vld [vmem:[#allocation3_spill] sm:$0xff] }
 0x267   : > { %v7301_v15 = vadd.f32 %v2485_v63, %v2103_v38  ;;  %v2326_v61 = vpop.f32.mrf.mxu0  ;;  %v2105_v14 = vadd.f32 %v2033_v2, %v6924_v31  ;;  %v1879_v41 = vpop.f32.mrf.mxu1 }
 0x268   : > { %v2486_v58 = vrot.slane %v2326_v61, 3  ;;  %v7885_v41 = vld [vmem:[#allocation6_spill] sm:$0xff] }
 0x269   : > { %v5597_v25 = vpop.f32.mrf.mxu0  ;;  %v5515_v16 = vpop.f32.mrf.mxu1 }
 0x26a   : > { %v2487_v42 = vsel %vm2416_vm5, %v2484_v6, %v2486_v58 }
 0x26b   : > { %v7305_v7 = vadd.f32 %v2487_v42, %v2104_v23  ;;  %v2331_v9 = vpop.f32.mrf.mxu0  ;;  %5871 = vmatmul.mubr.msk.bf16.gmra.mxu0 %vm404_vm2, %v6914_v29  ;;  %v1883_v21 = vpop.f32.mrf.mxu1  ;;  %5789 = vmatmul.mubr.msk.bf16.gmra.mxu1 %vm404_vm2, %v7883_v49 }
 0x26c   : > { %v2488_v40 = vrot.slane %v2331_v9, 3  ;;  %5874 = vmatprep.mubr.msk.bf16.mxu0 %vm6055_vm1, %v7867_v59  ;;  %5792 = vmatprep.mubr.msk.bf16.mxu1 %vm6055_vm1, %v7867_v59 }
 0x26d   : > { %v5600_v31 = vpop.f32.mrf.mxu0  ;;  %v5518_v54 = vpop.f32.mrf.mxu1 }
 0x26e   : > { %v2489_v38 = vsel %vm2416_vm5, %v2486_v58, %v2488_v40  ;;  %v7886_v54 = vld [vmem:[#allocation7_spill] sm:$0xff] }
 0x26f   : > { %v7316_v1 = vadd.f32 %v2489_v38, %v2105_v14  ;;  %v2334_v62 = vpop.f32.mrf.mxu0  ;;  %v1885_v47 = vpop.f32.mrf.mxu1 }
 0x271   : > { %v5601_v29 = vpop.f32.mrf.mxu0  ;;  %v5519_v53 = vpop.f32.mrf.mxu1 }
 0x272   : > { %v7887_v29 = vld [vmem:[#allocation5_spill] sm:$0xff] }
 0x273   : > { %v2338_v36 = vpop.f32.mrf.mxu0  ;;  %5875 = vmatmul.mubr.msk.bf16.gmra.mxu0 %vm404_vm2, %v7883_v49  ;;  %v2637_v23 = vpop.f32.mrf.mxu1  ;;  %5793 = vmatmul.mubr.msk.bf16.gmra.mxu1 %vm404_vm2, %v7884_v11 }
 0x274   : > { %5878 = vmatprep.mubr.msk.bf16.mxu0 %vm6055_vm1, %v7867_v59  ;;  %5796 = vmatprep.mubr.msk.bf16.mxu1 %vm6055_vm1, %v7867_v59 }
 0x275   : > { %v5604_v6 = vpop.f32.mrf.mxu0  ;;  %v5610_v48 = vpop.f32.mrf.mxu1 }
 0x277   : > { %v2340_v37 = vpop.f32.mrf.mxu0  ;;  %v2639_v63 = vpop.f32.mrf.mxu1 }
 0x279   : > { %v5605_v12 = vpop.f32.mrf.mxu0  ;;  %v5611_v2 = vpop.f32.mrf.mxu1 }
 0x27b   : > { %v3093_v61 = vpop.f32.mrf.mxu0  ;;  %5879 = vmatmul.mubr.msk.bf16.gmra.mxu0 %vm404_vm2, %v7884_v11  ;;  %v2643_v14 = vpop.f32.mrf.mxu1  ;;  %5797 = vmatmul.mubr.msk.bf16.gmra.mxu1 %vm404_vm2, %v7885_v41 }
 0x27c   : > { %5882 = vmatprep.mubr.msk.bf16.mxu0 %vm6055_vm1, %v7867_v59  ;;  %5800 = vmatprep.mubr.msk.bf16.mxu1 %vm6055_vm1, %v7867_v59  ;;  %v2873_v42 = vrot.slane %v2643_v14, 4 }
 0x27d   : > { %v5696_v58 = vpop.f32.mrf.mxu0  ;;  %v5614_v25 = vpop.f32.mrf.mxu1 }
 0x27e   : > { %v7888_v25 = vld [vmem:[#allocation8_spill] sm:$0xff] }
 0x27f   : > { %v3095_v16 = vpop.f32.mrf.mxu0  ;;  %v2646_v9 = vpop.f32.mrf.mxu1 }
 0x280   : > { %v2874_v21 = vrot.slane %v2646_v9, 4 }
 0x281   : > { %v5697_v40 = vpop.f32.mrf.mxu0  ;;  %v5615_v49 = vpop.f32.mrf.mxu1 }
 0x282   : > { %v2875_v31 = vsel %vm2872_vm6, %v2873_v42, %v2874_v21 }
 0x283   : > { %v3099_v38 = vpop.f32.mrf.mxu0  ;;  %5883 = vmatmul.mubr.msk.bf16.gmra.mxu0 %vm404_vm2, %v7885_v41  ;;  %v2982_v62 = vadd.f32 %v2875_v31, %v7886_v54  ;;  %v2651_v47 = vpop.f32.mrf.mxu1  ;;  %5801 = vmatmul.mubr.msk.bf16.gmra.mxu1 %vm404_vm2, %v7887_v29 }
 0x284   : > { %5886 = vmatprep.mubr.msk.bf16.mxu0 %vm6055_vm1, %v7867_v59  ;;  %v2876_v53 = vrot.slane %v2651_v47, 4  ;;  %5804 = vmatprep.mubr.msk.bf16.mxu1 %vm6055_vm1, %v7867_v59 }
 0x285   : > { %v5700_v36 = vpop.f32.mrf.mxu0  ;;  %v5618_v23 = vpop.f32.mrf.mxu1 }
 0x286   : > { %v2877_v11 = vsel %vm2872_vm6, %v2874_v21, %v2876_v53 }
 0x287   : > { %v3101_v6 = vpop.f32.mrf.mxu0  ;;  %v2983_v48 = vadd.f32 %v2877_v11, %v6992_v8  ;;  %v2654_v37 = vpop.f32.mrf.mxu1 }
 0x288   : > { %v2878_v63 = vrot.slane %v2654_v37, 4  ;;  %v7889_v37 = vld [vmem:[#allocation9_spill] sm:$0xff] }
 0x289   : > { %v5701_v12 = vpop.f32.mrf.mxu0  ;;  %v5619_v2 = vpop.f32.mrf.mxu1 }
 0x28a   : > { %v2879_v61 = vsel %vm2872_vm6, %v2876_v53, %v2878_v63 }
 0x28b   : > { %v3105_v14 = vpop.f32.mrf.mxu0  ;;  %5887 = vmatmul.mubr.msk.bf16.gmra.mxu0 %vm404_vm2, %v7887_v29  ;;  %v2984_v41 = vadd.f32 %v2879_v61, %v6997_v50  ;;  %v2659_v58 = vpop.f32.mrf.mxu1  ;;  %5805 = vmatmul.mubr.msk.bf16.gmra.mxu1 %vm404_vm2, %v7888_v25 }
 0x28c   : > { %5890 = vmatprep.mubr.msk.bf16.mxu0 %vm6055_vm1, %v7867_v59  ;;  %v2880_v8 = vrot.slane %v2659_v58, 4  ;;  %5808 = vmatprep.mubr.msk.bf16.mxu1 %vm6055_vm1, %v7867_v59  ;;  %v3328_v49 = vrot.slane %v3105_v14, 4 }
 0x28d   : > { %v5704_v42 = vpop.f32.mrf.mxu0  ;;  %v5622_v16 = vpop.f32.mrf.mxu1 }
 0x28e   : > { %v2881_v9 = vsel %vm2872_vm6, %v2878_v63, %v2880_v8 }
 0x28f   : > { %v3108_v21 = vpop.f32.mrf.mxu0  ;;  %v2985_v40 = vadd.f32 %v2881_v9, %v7013_v35  ;;  %v2662_v50 = vpop.f32.mrf.mxu1 }
 0x290   : > { %v3329_v31 = vrot.slane %v3108_v21, 4  ;;  %v2882_v38 = vrot.slane %v2662_v50, 4 }
 0x291   : > { %v5705_v54 = vpop.f32.mrf.mxu0  ;;  %v5623_v29 = vpop.f32.mrf.mxu1 }
 0x292   : > { %v3330_v47 = vsel %vm2872_vm6, %v3328_v49, %v3329_v31  ;;  %v2883_v53 = vsel %vm2872_vm6, %v2880_v8, %v2882_v38 }
 0x293   : > { %v7360_v36 = vadd.f32 %v3330_v47, %v2982_v62  ;;  %v3113_v23 = vpop.f32.mrf.mxu0  ;;  %5891 = vmatmul.mubr.msk.bf16.gmra.mxu0 %vm404_vm2, %v7888_v25  ;;  %v2986_v11 = vadd.f32 %v2883_v53, %v7018_v26  ;;  %v2667_v6 = vpop.f32.mrf.mxu1  ;;  %5809 = vmatmul.mubr.msk.bf16.gmra.mxu1 %vm404_vm2, %v7889_v37 }
 0x294   : > { %v3331_v35 = vrot.slane %v3113_v23, 4  ;;  %5894 = vmatprep.mubr.msk.bf16.mxu0 %vm6055_vm1, %v7867_v59  ;;  %v2884_v63 = vrot.slane %v2667_v6, 4  ;;  %5812 = vmatprep.mubr.msk.bf16.mxu1 %vm6055_vm1, %v7867_v59 }
 0x295   : > { %v5708_v12 = vpop.f32.mrf.mxu0  ;;  %v5626_v2 = vpop.f32.mrf.mxu1 }
 0x296   : > { %v3332_v62 = vsel %vm2872_vm6, %v3329_v31, %v3331_v35  ;;  %v2885_v61 = vsel %vm2872_vm6, %v2882_v38, %v2884_v63 }
 0x297   : > { %v7373_v14 = vadd.f32 %v3332_v62, %v2983_v48  ;;  %v3116_v26 = vpop.f32.mrf.mxu0  ;;  %v2987_v58 = vadd.f32 %v2885_v61, %v7034_v5  ;;  %v2670_v25 = vpop.f32.mrf.mxu1  ;;  %v7890_v5 = vld [vmem:[#allocation10_spill] sm:$0xff] }
 0x298   : > { %v3333_v8 = vrot.slane %v3116_v26, 4  ;;  %v2886_v42 = vrot.slane %v2670_v25, 4 }
 0x299   : > { %v5709_v16 = vpop.f32.mrf.mxu0  ;;  %v5627_v21 = vpop.f32.mrf.mxu1 }
 0x29a   : > { %v3334_v9 = vsel %vm2872_vm6, %v3331_v35, %v3333_v8  ;;  %v2887_v49 = vsel %vm2872_vm6, %v2884_v63, %v2886_v42 }
 0x29b   : > { %v7378_v50 = vadd.f32 %v3334_v9, %v2984_v41  ;;  %v3121_v31 = vpop.f32.mrf.mxu0  ;;  %5895 = vmatmul.mubr.msk.bf16.gmra.mxu0 %vm404_vm2, %v7889_v37  ;;  %v2988_v48 = vadd.f32 %v2887_v49, %v7039_v24  ;;  %v2675_v38 = vpop.f32.mrf.mxu1  ;;  %5813 = vmatmul.mubr.msk.bf16.gmra.mxu1 %vm404_vm2, %v7890_v5 }
 0x29c   : > { %v3335_v54 = vrot.slane %v3121_v31, 4  ;;  %5898 = vmatprep.mubr.msk.bf16.mxu0 %vm6055_vm1, %v7867_v59  ;;  %v2888_v47 = vrot.slane %v2675_v38, 4  ;;  %5816 = vmatprep.mubr.msk.bf16.mxu1 %vm6055_vm1, %v7867_v59 }
 0x29d   : > { %v5712_v29 = vpop.f32.mrf.mxu0  ;;  %v5630_v53 = vpop.f32.mrf.mxu1 }
 0x29e   : > { %v3336_v41 = vsel %vm2872_vm6, %v3333_v8, %v3335_v54  ;;  %v2889_v23 = vsel %vm2872_vm6, %v2886_v42, %v2888_v47 }
 0x29f   : > { %v7391_v6 = vadd.f32 %v3336_v41, %v2985_v40  ;;  %v3124_v24 = vpop.f32.mrf.mxu0  ;;  %v2989_v35 = vadd.f32 %v2889_v23, %v7055_v39  ;;  %v2678_v37 = vpop.f32.mrf.mxu1  ;;  %v7891_v39 = vld [vmem:[#allocation11_spill] sm:$0xff] }
 0x2a0   : > { %v3337_v63 = vrot.slane %v3124_v24, 4  ;;  %v2890_v12 = vrot.slane %v2678_v37, 4 }
 0x2a1   : > { %v5713_v62 = vpop.f32.mrf.mxu0  ;;  %v5631_v61 = vpop.f32.mrf.mxu1 }
 0x2a2   : > { %v3338_v2 = vsel %vm2872_vm6, %v3335_v54, %v3337_v63  ;;  %v2891_v26 = vsel %vm2872_vm6, %v2888_v47, %v2890_v12 }
 0x2a3   : > { %v7396_v25 = vadd.f32 %v3338_v2, %v2986_v11  ;;  %v3129_v8 = vpop.f32.mrf.mxu0  ;;  %5899 = vmatmul.mubr.msk.bf16.gmra.mxu0 %vm404_vm2, %v7890_v5  ;;  %v2990_v40 = vadd.f32 %v2891_v26, %v7060_v18  ;;  %v2683_v42 = vpop.f32.mrf.mxu1  ;;  %5817 = vmatmul.mubr.msk.bf16.gmra.mxu1 %vm404_vm2, %v7891_v39 }
 0x2a4   : > { %v3339_v16 = vrot.slane %v3129_v8, 4  ;;  %5902 = vmatprep.mubr.msk.bf16.mxu0 %vm6055_vm1, %v7867_v59  ;;  %v2892_v9 = vrot.slane %v2683_v42, 4  ;;  %5820 = vmatprep.mubr.msk.bf16.mxu1 %vm6055_vm1, %v7867_v59 }
 0x2a5   : > { %v5716_v21 = vpop.f32.mrf.mxu0  ;;  %v5634_v49 = vpop.f32.mrf.mxu1 }
 0x2a6   : > { %v3340_v11 = vsel %vm2872_vm6, %v3337_v63, %v3339_v16  ;;  %v2893_v31 = vsel %vm2872_vm6, %v2890_v12, %v2892_v9 }
 0x2a7   : > { %v7409_v38 = vadd.f32 %v3340_v11, %v2987_v58  ;;  %v3132_v18 = vpop.f32.mrf.mxu0  ;;  %v2991_v54 = vadd.f32 %v2893_v31, %v7076_v17  ;;  %v2686_v5 = vpop.f32.mrf.mxu1  ;;  %v7892_v17 = vld [vmem:[#allocation12_spill] sm:$0xff] }
 0x2a8   : > { %v3341_v47 = vrot.slane %v3132_v18, 4  ;;  %v2894_v29 = vrot.slane %v2686_v5, 4 }
 0x2a9   : > { %v5717_v41 = vpop.f32.mrf.mxu0  ;;  %v5635_v23 = vpop.f32.mrf.mxu1 }
 0x2aa   : > { %v3342_v53 = vsel %vm2872_vm6, %v3339_v16, %v3341_v47  ;;  %v2895_v24 = vsel %vm2872_vm6, %v2892_v9, %v2894_v29 }
 0x2ab   : > { %v7414_v37 = vadd.f32 %v3342_v53, %v2988_v48  ;;  %v3137_v63 = vpop.f32.mrf.mxu0  ;;  %5903 = vmatmul.mubr.msk.bf16.gmra.mxu0 %vm404_vm2, %v7891_v39  ;;  %v2992_v58 = vadd.f32 %v2895_v24, %v7081_v32  ;;  %v2691_v12 = vpop.f32.mrf.mxu1  ;;  %5821 = vmatmul.mubr.msk.bf16.gmra.mxu1 %vm404_vm2, %v7892_v17 }
 0x2ac   : > { %v3343_v62 = vrot.slane %v3137_v63, 4  ;;  %5906 = vmatprep.mubr.msk.bf16.mxu0 %vm6055_vm1, %v7867_v59  ;;  %v2896_v2 = vrot.slane %v2691_v12, 4  ;;  %5824 = vmatprep.mubr.msk.bf16.mxu1 %vm6055_vm1, %v7867_v59 }
 0x2ad   : > { %v5720_v61 = vpop.f32.mrf.mxu0  ;;  %v5638_v26 = vpop.f32.mrf.mxu1 }
 0x2ae   : > { %v3344_v48 = vsel %vm2872_vm6, %v3341_v47, %v3343_v62  ;;  %v2897_v8 = vsel %vm2872_vm6, %v2894_v29, %v2896_v2 }
 0x2af   : > { %v7427_v42 = vadd.f32 %v3344_v48, %v2989_v35  ;;  %v3140_v32 = vpop.f32.mrf.mxu0  ;;  %v2993_v16 = vadd.f32 %v2897_v8, %v7097_v60  ;;  %v2694_v39 = vpop.f32.mrf.mxu1  ;;  %v7893_v60 = vld [vmem:[#allocation13_spill] sm:$0xff] }
 0x2b0   : > { %v3345_v9 = vrot.slane %v3140_v32, 4  ;;  %v2898_v21 = vrot.slane %v2694_v39, 4 }
 0x2b1   : > { %v5721_v11 = vpop.f32.mrf.mxu0  ;;  %v5639_v31 = vpop.f32.mrf.mxu1 }
 0x2b2   : > { %v3346_v49 = vsel %vm2872_vm6, %v3343_v62, %v3345_v9  ;;  %v2899_v18 = vsel %vm2872_vm6, %v2896_v2, %v2898_v21 }
 0x2b3   : > { %v7432_v5 = vadd.f32 %v3346_v49, %v2990_v40  ;;  %v3145_v47 = vpop.f32.mrf.mxu0  ;;  %5907 = vmatmul.mubr.msk.bf16.gmra.mxu0 %vm404_vm2, %v7892_v17  ;;  %v2994_v35 = vadd.f32 %v2899_v18, %v7102_v13  ;;  %v2699_v29 = vpop.f32.mrf.mxu1  ;;  %5825 = vmatmul.mubr.msk.bf16.gmra.mxu1 %vm404_vm2, %v7893_v60 }
 0x2b4   : > { %v3347_v41 = vrot.slane %v3145_v47, 4  ;;  %5910 = vmatprep.mubr.msk.bf16.mxu0 %vm6055_vm1, %v7867_v59  ;;  %v2900_v53 = vrot.slane %v2699_v29, 4  ;;  %5828 = vmatprep.mubr.msk.bf16.mxu1 %vm6055_vm1, %v7867_v59 }
 0x2b5   : > { %v5724_v23 = vpop.f32.mrf.mxu0  ;;  %v5642_v24 = vpop.f32.mrf.mxu1 }
 0x2b6   : > { %v3348_v40 = vsel %vm2872_vm6, %v3345_v9, %v3347_v41  ;;  %v2901_v63 = vsel %vm2872_vm6, %v2898_v21, %v2900_v53 }
 0x2b7   : > { %v7445_v12 = vadd.f32 %v3348_v40, %v2991_v54  ;;  %v3148_v13 = vpop.f32.mrf.mxu0  ;;  %v2995_v62 = vadd.f32 %v2901_v63, %v7118_v3  ;;  %v2702_v17 = vpop.f32.mrf.mxu1  ;;  %v7894_v3 = vld [vmem:[#allocation14_spill] sm:$0xff] }
 0x2b8   : > { %v3349_v2 = vrot.slane %v3148_v13, 4  ;;  %v2902_v61 = vrot.slane %v2702_v17, 4 }
 0x2b9   : > { %v5725_v48 = vpop.f32.mrf.mxu0  ;;  %v5643_v8 = vpop.f32.mrf.mxu1 }
 0x2ba   : > { %v3350_v26 = vsel %vm2872_vm6, %v3347_v41, %v3349_v2  ;;  %v2903_v32 = vsel %vm2872_vm6, %v2900_v53, %v2902_v61 }
 0x2bb   : > { %v7450_v39 = vadd.f32 %v3350_v26, %v2992_v58  ;;  %v3153_v9 = vpop.f32.mrf.mxu0  ;;  %5911 = vmatmul.mubr.msk.bf16.gmra.mxu0 %vm404_vm2, %v7893_v60  ;;  %v2996_v54 = vadd.f32 %v2903_v32, %v7123_v0  ;;  %v2707_v21 = vpop.f32.mrf.mxu1  ;;  %5829 = vmatmul.mubr.msk.bf16.gmra.mxu1 %vm404_vm2, %v7894_v3 }
 0x2bc   : > { %v3351_v11 = vrot.slane %v3153_v9, 4  ;;  %5914 = vmatprep.mubr.msk.bf16.mxu0 %vm6055_vm1, %v7867_v59  ;;  %v2904_v49 = vrot.slane %v2707_v21, 4  ;;  %5832 = vmatprep.mubr.msk.bf16.mxu1 %vm6055_vm1, %v7867_v59 }
 0x2bd   : > { %v5728_v31 = vpop.f32.mrf.mxu0  ;;  %v5646_v18 = vpop.f32.mrf.mxu1 }
 0x2be   : > { %v3352_v58 = vsel %vm2872_vm6, %v3349_v2, %v3351_v11  ;;  %v2905_v47 = vsel %vm2872_vm6, %v2902_v61, %v2904_v49 }
 0x2bf   : > { %v7463_v29 = vadd.f32 %v3352_v58, %v2993_v16  ;;  %v3156_v0 = vpop.f32.mrf.mxu0  ;;  %v2997_v41 = vadd.f32 %v2905_v47, %v7139_v56  ;;  %v2710_v60 = vpop.f32.mrf.mxu1 }
 0x2c0   : > { %v3353_v53 = vrot.slane %v3156_v0, 4  ;;  %v2906_v23 = vrot.slane %v2710_v60, 4 }
 0x2c1   : > { %v5729_v40 = vpop.f32.mrf.mxu0  ;;  %v5647_v63 = vpop.f32.mrf.mxu1 }
 0x2c2   : > { %v3354_v24 = vsel %vm2872_vm6, %v3351_v11, %v3353_v53  ;;  %v2907_v13 = vsel %vm2872_vm6, %v2904_v49, %v2906_v23 }
 0x2c3   : > { %v7468_v17 = vadd.f32 %v3354_v24, %v2994_v35  ;;  %v3161_v2 = vpop.f32.mrf.mxu0  ;;  %5915 = vmatmul.mubr.msk.bf16.gmra.mxu0 %vm404_vm2, %v7894_v3  ;;  %v2998_v16 = vadd.f32 %v2907_v13, %v7144_v19  ;;  %v2715_v61 = vpop.f32.mrf.mxu1  ;;  %5833 = vmatmul.mubr.msk.bf16.gmra.mxu1 %vm404_vm2, %v7129_v4 }
 0x2c4   : > { %v3355_v48 = vrot.slane %v3161_v2, 4  ;;  %5918 = vmatprep.mubr.msk.bf16.mxu0 %vm6055_vm1, %v7867_v59  ;;  %v2908_v56 = vrot.slane %v2715_v61, 4  ;;  %5836 = vmatprep.mubr.msk.bf16.mxu1 %vm6055_vm1, %v7867_v59 }
 0x2c5   : > { %v5732_v26 = vpop.f32.mrf.mxu0  ;;  %v5650_v8 = vpop.f32.mrf.mxu1 }
 0x2c6   : > { %v3356_v35 = vsel %vm2872_vm6, %v3353_v53, %v3355_v48  ;;  %v2909_v32 = vsel %vm2872_vm6, %v2906_v23, %v2908_v56 }
 0x2c7   : > { %v7481_v9 = vadd.f32 %v3356_v35, %v2995_v62  ;;  %v3164_v19 = vpop.f32.mrf.mxu0  ;;  %v2999_v21 = vadd.f32 %v2909_v32, %v7157_v52  ;;  %v2718_v11 = vpop.f32.mrf.mxu1  ;;  %v6022_v52 = vld [vmem:[%s6118_s25 + $0x70] sm:$0xff]  }
 0x2c8   : > { %v3357_v3 = vrot.slane %v3164_v19, 4  ;;  %v2910_v49 = vrot.slane %v2718_v11, 4 }
 0x2c9   : > { %v5733_v31 = vpop.f32.mrf.mxu0  ;;  %v5651_v18 = vpop.f32.mrf.mxu1 }
 0x2ca   : > { %v3358_v58 = vsel %vm2872_vm6, %v3355_v48, %v3357_v3  ;;  %v2911_v47 = vsel %vm2872_vm6, %v2908_v56, %v2910_v49  ;;  %v6023_v31 = vld [vmem:[%s6118_s25 + $0x78] sm:$0xff]  }
 0x2cb   : > { %v7486_v0 = vadd.f32 %v3358_v58, %v2996_v54  ;;  %v3169_v60 = vpop.f32.mrf.mxu0  ;;  %5919 = vmatmul.mubr.msk.bf16.gmra.mxu0 %vm404_vm2, %v7129_v4  ;;  %v3000_v62 = vadd.f32 %v2911_v47, %v7162_v34  ;;  %v2723_v53 = vpop.f32.mrf.mxu1  ;;  %5837 = vmatmul.mubr.msk.bf16.gmra.mxu1 %vm404_vm2, %v6022_v52 }
 0x2cc   : > { %v3359_v23 = vrot.slane %v3169_v60, 4  ;;  %5922 = vmatprep.mubr.msk.bf16.mxu0 %vm6055_vm1, %v7867_v59  ;;  %v2912_v40 = vrot.slane %v2723_v53, 4  ;;  %5840 = vmatprep.mubr.msk.bf16.mxu1 %vm6055_vm1, %v7867_v59 }
 0x2cd   : > { %v5736_v24 = vpop.f32.mrf.mxu0  ;;  %v5654_v63 = vpop.f32.mrf.mxu1 }
 0x2ce   : > { %v3360_v54 = vsel %vm2872_vm6, %v3357_v3, %v3359_v23  ;;  %v2913_v4 = vsel %vm2872_vm6, %v2910_v49, %v2912_v40 }
 0x2cf   : > { %v7499_v13 = vadd.f32 %v3360_v54, %v2997_v41  ;;  %v3172_v34 = vpop.f32.mrf.mxu0  ;;  %v3001_v2 = vadd.f32 %v2913_v4, %v7175_v33  ;;  %v2726_v61 = vpop.f32.mrf.mxu1 }
 0x2d0   : > { %v3361_v48 = vrot.slane %v3172_v34, 4  ;;  %v2914_v56 = vrot.slane %v2726_v61, 4 }
 0x2d1   : > { %v5737_v26 = vpop.f32.mrf.mxu0  ;;  %v5655_v8 = vpop.f32.mrf.mxu1 }
 0x2d2   : > { %v3362_v35 = vsel %vm2872_vm6, %v3359_v23, %v3361_v48  ;;  %v2915_v32 = vsel %vm2872_vm6, %v2912_v40, %v2914_v56  ;;  %v6024_v26 = vld [vmem:[%s6118_s25 + $0x80] sm:$0xff]  }
 0x2d3   : > { %v7504_v19 = vadd.f32 %v3362_v35, %v2998_v16  ;;  %v3177_v11 = vpop.f32.mrf.mxu0  ;;  %5923 = vmatmul.mubr.msk.bf16.gmra.mxu0 %vm404_vm2, %v6022_v52  ;;  %v3002_v41 = vadd.f32 %v2915_v32, %v7180_v46  ;;  %v2731_v3 = vpop.f32.mrf.mxu1  ;;  %5841 = vmatmul.mubr.msk.bf16.gmra.mxu1 %vm404_vm2, %v6023_v31 }
 0x2d4   : > { %v3363_v49 = vrot.slane %v3177_v11, 4  ;;  %5926 = vmatprep.mubr.msk.bf16.mxu0 %vm6055_vm1, %v7867_v59  ;;  %v2916_v33 = vrot.slane %v2731_v3, 4  ;;  %5844 = vmatprep.mubr.msk.bf16.mxu1 %vm6055_vm1, %v7867_v59 }
 0x2d5   : > { %v5740_v58 = vpop.f32.mrf.mxu0  ;;  %v5658_v18 = vpop.f32.mrf.mxu1 }
 0x2d6   : > { %v3364_v16 = vsel %vm2872_vm6, %v3361_v48, %v3363_v49  ;;  %v2917_v47 = vsel %vm2872_vm6, %v2914_v56, %v2916_v33 }
 0x2d7   : > { %v7516_v60 = vadd.f32 %v3364_v16, %v2999_v21  ;;  %v3180_v46 = vpop.f32.mrf.mxu0  ;;  %v3003_v53 = vadd.f32 %v2917_v47, %v7193_v45  ;;  %v2734_v23 = vpop.f32.mrf.mxu1 }
 0x2d8   : > { %v3365_v52 = vrot.slane %v3180_v46, 4  ;;  %v2918_v40 = vrot.slane %v2734_v23, 4 }
 0x2d9   : > { %v5741_v24 = vpop.f32.mrf.mxu0  ;;  %v5659_v63 = vpop.f32.mrf.mxu1 }
 0x2da   : > { %v3366_v54 = vsel %vm2872_vm6, %v3363_v49, %v3365_v52  ;;  %v2919_v4 = vsel %vm2872_vm6, %v2916_v33, %v2918_v40  ;;  %v6025_v24 = vld [vmem:[%s6118_s25 + $0x88] sm:$0xff]  }
 0x2db   : > { %v7521_v34 = vadd.f32 %v3366_v54, %v3000_v62  ;;  %v3185_v61 = vpop.f32.mrf.mxu0  ;;  %5927 = vmatmul.mubr.msk.bf16.gmra.mxu0 %vm404_vm2, %v6023_v31  ;;  %v3004_v21 = vadd.f32 %v2919_v4, %v7198_v55  ;;  %v2739_v48 = vpop.f32.mrf.mxu1  ;;  %5845 = vmatmul.mubr.msk.bf16.gmra.mxu1 %vm404_vm2, %v6024_v26 }
 0x2dc   : > { %v3367_v56 = vrot.slane %v3185_v61, 4  ;;  %5930 = vmatprep.mubr.msk.bf16.mxu0 %vm6055_vm1, %v7867_v59  ;;  %v2920_v45 = vrot.slane %v2739_v48, 4  ;;  %5848 = vmatprep.mubr.msk.bf16.mxu1 %vm6055_vm1, %v7867_v59 }
 0x2dd   : > { %v5744_v35 = vpop.f32.mrf.mxu0  ;;  %v5662_v8 = vpop.f32.mrf.mxu1 }
 0x2de   : > { %v3368_v62 = vsel %vm2872_vm6, %v3365_v52, %v3367_v56  ;;  %v2921_v32 = vsel %vm2872_vm6, %v2918_v40, %v2920_v45 }
 0x2df   : > { %v7533_v11 = vadd.f32 %v3368_v62, %v3001_v2  ;;  %v3188_v55 = vpop.f32.mrf.mxu0  ;;  %v3005_v3 = vadd.f32 %v2921_v32, %v7211_v30  ;;  %v2742_v49 = vpop.f32.mrf.mxu1 }
 0x2e0   : > { %v3369_v31 = vrot.slane %v3188_v55, 4  ;;  %v2922_v33 = vrot.slane %v2742_v49, 4 }
 0x2e1   : > { %v5745_v58 = vpop.f32.mrf.mxu0  ;;  %v5663_v18 = vpop.f32.mrf.mxu1 }
 0x2e2   : > { %v3370_v16 = vsel %vm2872_vm6, %v3367_v56, %v3369_v31  ;;  %v2923_v47 = vsel %vm2872_vm6, %v2920_v45, %v2922_v33  ;;  %v6026_v58 = vld [vmem:[%s6118_s25 + $0x90] sm:$0xff]  }
 0x2e3   : > { %v7538_v46 = vadd.f32 %v3370_v16, %v3002_v41  ;;  %v3193_v23 = vpop.f32.mrf.mxu0  ;;  %5931 = vmatmul.mubr.msk.bf16.gmra.mxu0 %vm404_vm2, %v6024_v26  ;;  %v3006_v2 = vadd.f32 %v2923_v47, %v7216_v57  ;;  %v2747_v52 = vpop.f32.mrf.mxu1  ;;  %5849 = vmatmul.mubr.msk.bf16.gmra.mxu1 %vm404_vm2, %v6025_v24 }
 0x2e4   : > { %v3371_v40 = vrot.slane %v3193_v23, 4  ;;  %5934 = vmatprep.mubr.msk.bf16.mxu0 %vm6055_vm1, %v7867_v59  ;;  %v2924_v30 = vrot.slane %v2747_v52, 4  ;;  %5852 = vmatprep.mubr.msk.bf16.mxu1 %vm6055_vm1, %v7867_v59 }
 0x2e5   : > { %v5748_v54 = vpop.f32.mrf.mxu0  ;;  %v5666_v63 = vpop.f32.mrf.mxu1 }
 0x2e6   : > { %v3372_v41 = vsel %vm2872_vm6, %v3369_v31, %v3371_v40  ;;  %v2925_v4 = vsel %vm2872_vm6, %v2922_v33, %v2924_v30 }
 0x2e7   : > { %v7550_v61 = vadd.f32 %v3372_v41, %v3003_v53  ;;  %v3196_v57 = vpop.f32.mrf.mxu0  ;;  %v3007_v48 = vadd.f32 %v2925_v4, %v7229_v10  ;;  %v2750_v56 = vpop.f32.mrf.mxu1 }
 0x2e8   : > { %v3373_v26 = vrot.slane %v3196_v57, 4  ;;  %v2926_v45 = vrot.slane %v2750_v56, 4 }
 0x2e9   : > { %v5749_v35 = vpop.f32.mrf.mxu0  ;;  %v5667_v8 = vpop.f32.mrf.mxu1 }
 0x2ea   : > { %v3374_v62 = vsel %vm2872_vm6, %v3371_v40, %v3373_v26  ;;  %v2927_v32 = vsel %vm2872_vm6, %v2924_v30, %v2926_v45  ;;  %v6027_v35 = vld [vmem:[%s6118_s25 + $0x98] sm:$0xff]  }
 0x2eb   : > { %v7555_v55 = vadd.f32 %v3374_v62, %v3004_v21  ;;  %v3201_v49 = vpop.f32.mrf.mxu0  ;;  %5935 = vmatmul.mubr.msk.bf16.gmra.mxu0 %vm404_vm2, %v6025_v24  ;;  %v3008_v53 = vadd.f32 %v2927_v32, %v7234_v28  ;;  %v2755_v31 = vpop.f32.mrf.mxu1  ;;  %5853 = vmatmul.mubr.msk.bf16.gmra.mxu1 %vm404_vm2, %v6026_v58 }
 0x2ec   : > { %v3375_v33 = vrot.slane %v3201_v49, 4  ;;  %5938 = vmatprep.mubr.msk.bf16.mxu0 %vm6055_vm1, %v7867_v59  ;;  %v2928_v10 = vrot.slane %v2755_v31, 4  ;;  %5856 = vmatprep.mubr.msk.bf16.mxu1 %vm6055_vm1, %v7867_v59 }
 0x2ed   : > { %v5752_v16 = vpop.f32.mrf.mxu0  ;;  %v5670_v18 = vpop.f32.mrf.mxu1 }
 0x2ee   : > { %v3376_v21 = vsel %vm2872_vm6, %v3373_v26, %v3375_v33  ;;  %v2929_v47 = vsel %vm2872_vm6, %v2926_v45, %v2928_v10 }
 0x2ef   : > { %v7567_v23 = vadd.f32 %v3376_v21, %v3005_v3  ;;  %v3204_v28 = vpop.f32.mrf.mxu0  ;;  %v3009_v52 = vadd.f32 %v2929_v47, %v7247_v51  ;;  %v2758_v40 = vpop.f32.mrf.mxu1 }
 0x2f0   : > { %v3377_v24 = vrot.slane %v3204_v28, 4  ;;  %v2930_v30 = vrot.slane %v2758_v40, 4 }
 0x2f1   : > { %v5753_v54 = vpop.f32.mrf.mxu0  ;;  %v5671_v63 = vpop.f32.mrf.mxu1 }
 0x2f2   : > { %v3378_v41 = vsel %vm2872_vm6, %v3375_v33, %v3377_v24  ;;  %v2931_v4 = vsel %vm2872_vm6, %v2928_v10, %v2930_v30  ;;  %v6028_v54 = vld [vmem:[%s6118_s25 + $0xa0] ss:$0 sps:$4 sm:$0x77]  }
 0x2f3   : > { %v7572_v57 = vadd.f32 %v3378_v41, %v3006_v2  ;;  %v3209_v56 = vpop.f32.mrf.mxu0  ;;  %5939 = vmatmul.mubr.msk.bf16.gmra.mxu0 %vm404_vm2, %v6026_v58  ;;  %v3010_v3 = vadd.f32 %v2931_v4, %v7252_v20  ;;  %v2763_v26 = vpop.f32.mrf.mxu1  ;;  %5857 = vmatmul.mubr.msk.bf16.gmra.mxu1 %vm404_vm2, %v6027_v35 }
 0x2f4   : > { %v3379_v45 = vrot.slane %v3209_v56, 4  ;;  %5942 = vmatprep.mubr.msk.bf16.mxu0 %vm6055_vm1, %v7867_v59  ;;  %v2932_v51 = vrot.slane %v2763_v26, 4  ;;  %5860 = vmatprep.mubr.msk.bf16.mxu1 %vm6055_vm1, %v7867_v59 }
 0x2f5   : > { %v5756_v62 = vpop.f32.mrf.mxu0  ;;  %v5674_v8 = vpop.f32.mrf.mxu1 }
 0x2f6   : > { %v3380_v2 = vsel %vm2872_vm6, %v3377_v24, %v3379_v45  ;;  %v2933_v32 = vsel %vm2872_vm6, %v2930_v30, %v2932_v51 }
 0x2f7   : > { %v7584_v49 = vadd.f32 %v3380_v2, %v3007_v48  ;;  %v3212_v20 = vpop.f32.mrf.mxu0  ;;  %v3011_v31 = vadd.f32 %v2933_v32, %v7265_v27  ;;  %v2766_v33 = vpop.f32.mrf.mxu1 }
 0x2f8   : > { %v3381_v58 = vrot.slane %v3212_v20, 4  ;;  %v2934_v10 = vrot.slane %v2766_v33, 4 }
 0x2f9   : > { %v5757_v16 = vpop.f32.mrf.mxu0  ;;  %v5675_v18 = vpop.f32.mrf.mxu1 }
 0x2fa   : > { %v3382_v21 = vsel %vm2872_vm6, %v3379_v45, %v3381_v58  ;;  %v2935_v47 = vsel %vm2872_vm6, %v2932_v51, %v2934_v10 }
 0x2fb   : > { %v7589_v28 = vadd.f32 %v3382_v21, %v3008_v53  ;;  %v3217_v40 = vpop.f32.mrf.mxu0  ;;  %5943 = vmatmul.mubr.msk.bf16.gmra.mxu0 %vm404_vm2, %v6027_v35  ;;  %v3012_v48 = vadd.f32 %v2935_v47, %v7270_v43  ;;  %v2771_v24 = vpop.f32.mrf.mxu1  ;;  %5861 = vmatmul.mubr.msk.bf16.gmra.mxu1 %vm404_vm2, %v6028_v54 }
 0x2fc   : > { %v3383_v30 = vrot.slane %v3217_v40, 4  ;;  %5946 = vmatprep.mubr.msk.bf16.mxu0 %vm6055_vm1, %v7867_v59  ;;  %v2936_v27 = vrot.slane %v2771_v24, 4 }
 0x2fd   : > { %v5760_v41 = vpop.f32.mrf.mxu0  ;;  %v5678_v4 = vpop.f32.mrf.mxu1 }
 0x2fe   : > { %v3384_v63 = vsel %vm2872_vm6, %v3381_v58, %v3383_v30  ;;  %v2937_v53 = vsel %vm2872_vm6, %v2934_v10, %v2936_v27 }
 0x2ff   : > { %v7599_v56 = vadd.f32 %v3384_v63, %v3009_v52  ;;  %v3220_v26 = vpop.f32.mrf.mxu0  ;;  %v3013_v43 = vadd.f32 %v2937_v53, %v7283_v22  ;;  %v2774_v45 = vpop.f32.mrf.mxu1 }
 0x300   : > { %v3385_v35 = vrot.slane %v3220_v26, 4  ;;  %v2938_v51 = vrot.slane %v2774_v45, 4 }
 0x301   : > { %v5761_v62 = vpop.f32.mrf.mxu0  ;;  %v5679_v8 = vpop.f32.mrf.mxu1 }
 0x302   : > { %v3386_v2 = vsel %vm2872_vm6, %v3383_v30, %v3385_v35  ;;  %v2939_v59 = vsel %vm2872_vm6, %v2936_v27, %v2938_v51 }
 0x303   : > { %v7604_v32 = vadd.f32 %v3386_v2, %v3010_v3  ;;  %v3225_v20 = vpop.f32.mrf.mxu0  ;;  %5947 = vmatmul.mubr.msk.bf16.gmra.mxu0 %vm404_vm2, %v6028_v54  ;;  %v3014_v52 = vadd.f32 %v2939_v59, %v7288_v44  ;;  %v2779_v33 = vpop.f32.mrf.mxu1 }
 0x304   : > { %v3387_v58 = vrot.slane %v3225_v20, 4  ;;  %v2940_v10 = vrot.slane %v2779_v33, 4 }
 0x305   : > { %v5764_v22 = vpop.f32.mrf.mxu0  ;;  %v5682_v21 = vpop.f32.mrf.mxu1 }
 0x306   : > { %v3388_v16 = vsel %vm2872_vm6, %v3385_v35, %v3387_v58  ;;  %v2941_v18 = vsel %vm2872_vm6, %v2938_v51, %v2940_v10 }
 0x307   : > { %v7610_v47 = vadd.f32 %v3388_v16, %v3011_v31  ;;  %v3228_v40 = vpop.f32.mrf.mxu0  ;;  %v3015_v3 = vadd.f32 %v2941_v18, %v7301_v15  ;;  %v2782_v24 = vpop.f32.mrf.mxu1 }
 0x308   : > { %v3389_v30 = vrot.slane %v3228_v40, 4  ;;  %v2942_v27 = vrot.slane %v2782_v24, 4 }
 0x309   : > { %v5765_v54 = vpop.f32.mrf.mxu0  ;;  %v5683_v41 = vpop.f32.mrf.mxu1 }
 0x30a   : > { %v3390_v44 = vsel %vm2872_vm6, %v3387_v58, %v3389_v30  ;;  %v2943_v63 = vsel %vm2872_vm6, %v2940_v10, %v2942_v27 }
 0x30b   : > { %v7615_v4 = vadd.f32 %v3390_v44, %v3012_v48  ;;  %v3233_v53 = vpop.f32.mrf.mxu0  ;;  %v3016_v26 = vadd.f32 %v2943_v63, %v7305_v7  ;;  %v2787_v45 = vpop.f32.mrf.mxu1 }
 0x30c   : > { %v3391_v31 = vrot.slane %v3233_v53, 4  ;;  %v2944_v35 = vrot.slane %v2787_v45, 4 }
 0x30d   : > { %v5768_v51 = vpop.f32.mrf.mxu0  ;;  %v5686_v62 = vpop.f32.mrf.mxu1 }
 0x30e   : > { %v3392_v15 = vsel %vm2872_vm6, %v3389_v30, %v3391_v31  ;;  %v2945_v2 = vsel %vm2872_vm6, %v2942_v27, %v2944_v35 }
 0x30f   : > { %v7620_v8 = vadd.f32 %v3392_v15, %v3013_v43  ;;  %v3236_v59 = vpop.f32.mrf.mxu0  ;;  %v3017_v20 = vadd.f32 %v2945_v2, %v7316_v1  ;;  %v2790_v33 = vpop.f32.mrf.mxu1 }
 0x310   : > { %v3393_v48 = vrot.slane %v3236_v59, 4 }
 0x311   : > { %v5769_v58 = vpop.f32.mrf.mxu0  ;;  %v5687_v7 = vpop.f32.mrf.mxu1 }
 0x312   : > { %v3394_v10 = vsel %vm2872_vm6, %v3391_v31, %v3393_v48 }
 0x313   : > { %v7624_v22 = vadd.f32 %v3394_v10, %v3014_v52  ;;  %v3241_v16 = vpop.f32.mrf.mxu0  ;;  %v2794_v21 = vpop.f32.mrf.mxu1 }
 0x314   : > { %v3395_v18 = vrot.slane %v3241_v16, 4 }
 0x315   : > { %v5772_v40 = vpop.f32.mrf.mxu0  ;;  %v5690_v30 = vpop.f32.mrf.mxu1 }
 0x316   : > { %v3396_v24 = vsel %vm2872_vm6, %v3393_v48, %v3395_v18 }
 0x317   : > { %v7627_v43 = vadd.f32 %v3396_v24, %v3015_v3  ;;  %v3244_v27 = vpop.f32.mrf.mxu0  ;;  %v2796_v54 = vpop.f32.mrf.mxu1 }
 0x318   : > { %v3397_v1 = vrot.slane %v3244_v27, 4 }
 0x319   : > { %v5773_v44 = vpop.f32.mrf.mxu0  ;;  %v5691_v63 = vpop.f32.mrf.mxu1 }
 0x31a   : > { %v3398_v41 = vsel %vm2872_vm6, %v3395_v18, %v3397_v1 }
 0x31b   : > { %v7630_v53 = vadd.f32 %v3398_v41, %v3016_v26  ;;  %v3249_v52 = vpop.f32.mrf.mxu0  ;;  %v3548_v31 = vpop.f32.mrf.mxu1 }
 0x31c   : > { %v3399_v45 = vrot.slane %v3249_v52, 4 }
 0x31d   : > { %v5776_v35 = vpop.f32.mrf.mxu0  ;;  %v5782_v15 = vpop.f32.mrf.mxu1 }
 0x31e   : > { %v3400_v51 = vsel %vm2872_vm6, %v3397_v1, %v3399_v45 }
 0x31f   : > { %v7633_v62 = vadd.f32 %v3400_v51, %v3017_v20  ;;  %v3252_v3 = vpop.f32.mrf.mxu0  ;;  %v3550_v2 = vpop.f32.mrf.mxu1 }
 0x321   : > { %v5777_v59 = vpop.f32.mrf.mxu0  ;;  %v5783_v33 = vpop.f32.mrf.mxu1 }
 0x323   : > { %v4004_v48 = vpop.f32.mrf.mxu0  ;;  %v3554_v58 = vpop.f32.mrf.mxu1 }
 0x325   : > { %v5868_v10 = vpop.f32.mrf.mxu0  ;;  %v5786_v7 = vpop.f32.mrf.mxu1 }
 0x327   : > { %v4006_v16 = vpop.f32.mrf.mxu0  ;;  %v3556_v26 = vpop.f32.mrf.mxu1 }
 0x328   : > { %v7642_v26 = vld [vmem:[%s7838_s2] ss:$0 sm:$0xff] }
 0x329   : > { %v5869_v21 = vpop.f32.mrf.mxu0  ;;  %v5787_v18 = vpop.f32.mrf.mxu1 }
 0x32b   : > { %v4010_v40 = vpop.f32.mrf.mxu0  ;;  %v3560_v24 = vpop.f32.mrf.mxu1 }
 0x32c   : > { %v3784_v44 = vrot.slane %v3560_v24, 5 }
 0x32d   : > { %v5872_v30 = vpop.f32.mrf.mxu0  ;;  %v5790_v27 = vpop.f32.mrf.mxu1 }
 0x32f   : > { %v4012_v54 = vpop.f32.mrf.mxu0  ;;  %v3563_v1 = vpop.f32.mrf.mxu1 }
 0x330   : > { %v3785_v41 = vrot.slane %v3563_v1, 5 }
 0x331   : > { %v5873_v20 = vpop.f32.mrf.mxu0  ;;  %v5791_v63 = vpop.f32.mrf.mxu1 }
 0x332   : > { %v3786_v35 = vsel %vm3783_vm7, %v3784_v44, %v3785_v41 }
 0x333   : > { %v4016_v52 = vpop.f32.mrf.mxu0  ;;  %v3568_v45 = vpop.f32.mrf.mxu1  ;;  %v3893_v48 = vadd.f32 %v3786_v35, %v7360_v36 }
 0x334   : > { %v3787_v51 = vrot.slane %v3568_v45, 5  ;;  %v4239_v2 = vrot.slane %v4016_v52, 6 }
 0x335   : > { %v5876_v31 = vpop.f32.mrf.mxu0  ;;  %v5794_v15 = vpop.f32.mrf.mxu1 }
 0x336   : > { %v3788_v10 = vsel %vm3783_vm7, %v3785_v41, %v3787_v51 }
 0x337   : > { %v4019_v3 = vpop.f32.mrf.mxu0  ;;  %v3571_v59 = vpop.f32.mrf.mxu1  ;;  %v3894_v27 = vadd.f32 %v3788_v10, %v7373_v14 }
 0x338   : > { %v4240_v33 = vrot.slane %v4019_v3, 6  ;;  %v3789_v7 = vrot.slane %v3571_v59, 5 }
 0x339   : > { %v5877_v58 = vpop.f32.mrf.mxu0  ;;  %v5795_v21 = vpop.f32.mrf.mxu1 }
 0x33a   : > { %v4241_v16 = vsel %vm468_vm0, %v4239_v2, %v4240_v33  ;;  %v3790_v1 = vsel %vm3783_vm7, %v3787_v51, %v3789_v7 }
 0x33b   : > { %v4348_v18 = vadd.f32 %v4241_v16, %v3893_v48  ;;  %v4024_v40 = vpop.f32.mrf.mxu0  ;;  %v3576_v24 = vpop.f32.mrf.mxu1  ;;  %v3895_v35 = vadd.f32 %v3790_v1, %v7378_v50 }
 0x33c   : > { %v4242_v30 = vrot.slane %v4024_v40, 6  ;;  %v3791_v20 = vrot.slane %v3576_v24, 5 }
 0x33d   : > { %v4463_v36 = vadd.f32 %v7642_v26, %v4348_v18  ;;  %v5880_v54 = vpop.f32.mrf.mxu0  ;;  %v5798_v41 = vpop.f32.mrf.mxu1 }
 0x33e   : > { %v4243_v44 = vsel %vm468_vm0, %v4240_v33, %v4242_v30  ;;  %v3792_v2 = vsel %vm3783_vm7, %v3789_v7, %v3791_v20 }
 0x33f   : > { %vm4499_vm8 = vcmp.ge.f32.partialorder %v4463_v36, 0.0  ;;  %v4535_v63 = vmul.f32 0.1, %v4463_v36  ;;  %v4349_v52 = vadd.f32 %v4243_v44, %v3894_v27  ;;  %v4027_v45 = vpop.f32.mrf.mxu0  ;;  %v3579_v14 = vpop.f32.mrf.mxu1  ;;  %v3896_v50 = vadd.f32 %v3792_v2, %v7391_v6 }
 0x340   : > { %v4244_v31 = vrot.slane %v4027_v45, 6  ;;  %v3793_v59 = vrot.slane %v3579_v14, 5 }
 0x341   : > { %v4571_v15 = vsel %vm4499_vm8, %v4463_v36, %v4535_v63  ;;  %v4464_v51 = vadd.f32 %v7642_v26, %v4349_v52  ;;  %v5881_v3 = vpop.f32.mrf.mxu0  ;;  %v5799_v48 = vpop.f32.mrf.mxu1 }
 0x342   : > { %4607 = vst [vmem:[%s7652_s20] sm:$0xff] %v4571_v15  ;;  %v4245_v33 = vsel %vm468_vm0, %v4242_v30, %v4244_v31  ;;  %v3794_v7 = vsel %vm3783_vm7, %v3791_v20, %v3793_v59 }
 0x343   : > { %vm4500_vm9 = vcmp.ge.f32.partialorder %v4464_v51, 0.0  ;;  %v4536_v58 = vmul.f32 0.1, %v4464_v51  ;;  %v4350_v10 = vadd.f32 %v4245_v33, %v3895_v35  ;;  %v4032_v16 = vpop.f32.mrf.mxu0  ;;  %v3584_v21 = vpop.f32.mrf.mxu1  ;;  %v3897_v6 = vadd.f32 %v3794_v7, %v7396_v25 }
 0x344   : > { %v4246_v18 = vrot.slane %v4032_v16, 6  ;;  %v3795_v36 = vrot.slane %v3584_v21, 5 }
 0x345   : > { %v4572_v40 = vsel %vm4500_vm9, %v4464_v51, %v4536_v58  ;;  %v4465_v24 = vadd.f32 %v7642_v26, %v4350_v10  ;;  %v5884_v27 = vpop.f32.mrf.mxu0  ;;  %v5802_v54 = vpop.f32.mrf.mxu1 }
 0x346   : > { %4608 = vst [vmem:[%s7652_s20 + $0x8] sm:$0xff] %v4572_v40  ;;  %v4247_v30 = vsel %vm468_vm0, %v4244_v31, %v4246_v18  ;;  %v3796_v20 = vsel %vm3783_vm7, %v3793_v59, %v3795_v36 }
 0x347   : > { %vm4501_vm10 = vcmp.ge.f32.partialorder %v4465_v24, 0.0  ;;  %v4537_v1 = vmul.f32 0.1, %v4465_v24  ;;  %v4351_v44 = vadd.f32 %v4247_v30, %v3896_v50  ;;  %v4035_v41 = vpop.f32.mrf.mxu0  ;;  %v3587_v63 = vpop.f32.mrf.mxu1  ;;  %v3898_v25 = vadd.f32 %v3796_v20, %v7409_v38 }
 0x348   : > { %v4248_v52 = vrot.slane %v4035_v41, 6  ;;  %v3797_v15 = vrot.slane %v3587_v63, 5 }
 0x349   : > { %v4573_v45 = vsel %vm4501_vm10, %v4465_v24, %v4537_v1  ;;  %v4466_v14 = vadd.f32 %v7642_v26, %v4351_v44  ;;  %v5885_v35 = vpop.f32.mrf.mxu0  ;;  %v5803_v51 = vpop.f32.mrf.mxu1 }
 0x34a   : > { %4609 = vst [vmem:[%s7652_s20 + $0x10] sm:$0xff] %v4573_v45  ;;  %v4249_v31 = vsel %vm468_vm0, %v4246_v18, %v4248_v52  ;;  %v3798_v59 = vsel %vm3783_vm7, %v3795_v36, %v3797_v15 }
 0x34b   : > { %vm4502_vm11 = vcmp.ge.f32.partialorder %v4466_v14, 0.0  ;;  %v4538_v3 = vmul.f32 0.1, %v4466_v14  ;;  %v4352_v2 = vadd.f32 %v4249_v31, %v3897_v6  ;;  %v4040_v33 = vpop.f32.mrf.mxu0  ;;  %v3592_v48 = vpop.f32.mrf.mxu1  ;;  %v3899_v38 = vadd.f32 %v3798_v59, %v7414_v37 }
 0x34c   : > { %v4250_v58 = vrot.slane %v4040_v33, 6  ;;  %v3799_v50 = vrot.slane %v3592_v48, 5 }
 0x34d   : > { %v4574_v10 = vsel %vm4502_vm11, %v4466_v14, %v4538_v3  ;;  %v4467_v16 = vadd.f32 %v7642_v26, %v4352_v2  ;;  %v5888_v21 = vpop.f32.mrf.mxu0  ;;  %v5806_v40 = vpop.f32.mrf.mxu1 }
 0x34e   : > { %4610 = vst [vmem:[%s7652_s20 + $0x18] sm:$0xff] %v4574_v10  ;;  %v4251_v18 = vsel %vm468_vm0, %v4248_v52, %v4250_v58  ;;  %v3800_v36 = vsel %vm3783_vm7, %v3797_v15, %v3799_v50 }
 0x34f   : > { %vm4503_vm12 = vcmp.ge.f32.partialorder %v4467_v16, 0.0  ;;  %v4539_v24 = vmul.f32 0.1, %v4467_v16  ;;  %v4353_v27 = vadd.f32 %v4251_v18, %v3898_v25  ;;  %v4043_v7 = vpop.f32.mrf.mxu0  ;;  %v3595_v30 = vpop.f32.mrf.mxu1  ;;  %v3900_v37 = vadd.f32 %v3800_v36, %v7427_v42 }
 0x350   : > { %v4252_v54 = vrot.slane %v4043_v7, 6  ;;  %v3801_v63 = vrot.slane %v3595_v30, 5 }
 0x351   : > { %v4575_v1 = vsel %vm4503_vm12, %v4467_v16, %v4539_v24  ;;  %v4468_v44 = vadd.f32 %v7642_v26, %v4353_v27  ;;  %v5889_v41 = vpop.f32.mrf.mxu0  ;;  %v5807_v6 = vpop.f32.mrf.mxu1 }
 0x352   : > { %4611 = vst [vmem:[%s7652_s20 + $0x20] sm:$0xff] %v4575_v1  ;;  %v4253_v52 = vsel %vm468_vm0, %v4250_v58, %v4252_v54  ;;  %v3802_v15 = vsel %vm3783_vm7, %v3799_v50, %v3801_v63 }
 0x353   : > { %vm4504_vm13 = vcmp.ge.f32.partialorder %v4468_v44, 0.0  ;;  %v4540_v45 = vmul.f32 0.1, %v4468_v44  ;;  %v4354_v14 = vadd.f32 %v4253_v52, %v3899_v38  ;;  %v4048_v35 = vpop.f32.mrf.mxu0  ;;  %v3600_v20 = vpop.f32.mrf.mxu1  ;;  %v3901_v42 = vadd.f32 %v3802_v15, %v7432_v5 }
 0x354   : > { %v4254_v31 = vrot.slane %v4048_v35, 6  ;;  %v3803_v33 = vrot.slane %v3600_v20, 5 }
 0x355   : > { %v4576_v51 = vsel %vm4504_vm13, %v4468_v44, %v4540_v45  ;;  %v4469_v3 = vadd.f32 %v7642_v26, %v4354_v14  ;;  %v5892_v2 = vpop.f32.mrf.mxu0  ;;  %v5810_v58 = vpop.f32.mrf.mxu1 }
 0x356   : > { %4612 = vst [vmem:[%s7652_s20 + $0x28] sm:$0xff] %v4576_v51  ;;  %v4255_v48 = vsel %vm468_vm0, %v4252_v54, %v4254_v31  ;;  %v3804_v50 = vsel %vm3783_vm7, %v3801_v63, %v3803_v33 }
 0x357   : > { %vm4505_vm14 = vcmp.ge.f32.partialorder %v4469_v3, 0.0  ;;  %v4541_v25 = vmul.f32 0.1, %v4469_v3  ;;  %v4355_v10 = vadd.f32 %v4255_v48, %v3900_v37  ;;  %v4051_v16 = vpop.f32.mrf.mxu0  ;;  %v3603_v21 = vpop.f32.mrf.mxu1  ;;  %v3902_v5 = vadd.f32 %v3804_v50, %v7445_v12 }
 0x358   : > { %v4256_v59 = vrot.slane %v4051_v16, 6  ;;  %v3805_v27 = vrot.slane %v3603_v21, 5 }
 0x359   : > { %v4577_v18 = vsel %vm4505_vm14, %v4469_v3, %v4541_v25  ;;  %v4470_v40 = vadd.f32 %v7642_v26, %v4355_v10  ;;  %v5893_v24 = vpop.f32.mrf.mxu0  ;;  %v5811_v30 = vpop.f32.mrf.mxu1 }
 0x35a   : > { %4613 = vst [vmem:[%s7652_s20 + $0x30] sm:$0xff] %v4577_v18  ;;  %v4257_v7 = vsel %vm468_vm0, %v4254_v31, %v4256_v59  ;;  %v3806_v63 = vsel %vm3783_vm7, %v3803_v33, %v3805_v27 }
 0x35b   : > { %vm4506_vm15 = vcmp.ge.f32.partialorder %v4470_v40, 0.0  ;;  %v4542_v54 = vmul.f32 0.1, %v4470_v40  ;;  %v4356_v38 = vadd.f32 %v4257_v7, %v3901_v42  ;;  %v4056_v1 = vpop.f32.mrf.mxu0  ;;  %v3608_v44 = vpop.f32.mrf.mxu1  ;;  %v3903_v12 = vadd.f32 %v3806_v63, %v7450_v39 }
 0x35c   : > { %v4258_v41 = vrot.slane %v4056_v1, 6  ;;  %v3807_v45 = vrot.slane %v3608_v44, 5 }
 0x35d   : > { %v4578_v36 = vsel %vm4506_vm15, %v4470_v40, %v4542_v54  ;;  %v4471_v52 = vadd.f32 %v7642_v26, %v4356_v38  ;;  %v5896_v6 = vpop.f32.mrf.mxu0  ;;  %v5814_v35 = vpop.f32.mrf.mxu1 }
 0x35e   : > { %4614 = vst [vmem:[%s7652_s20 + $0x38] sm:$0xff] %v4578_v36  ;;  %v4259_v14 = vsel %vm468_vm0, %v4256_v59, %v4258_v41  ;;  %v3808_v33 = vsel %vm3783_vm7, %v3805_v27, %v3807_v45 }
 0x35f   : > { %vm4507_vm1 = vcmp.ge.f32.partialorder %v4471_v52, 0.0  ;;  %v4543_v20 = vmul.f32 0.1, %v4471_v52  ;;  %v4357_v31 = vadd.f32 %v4259_v14, %v3902_v5  ;;  %v4059_v37 = vpop.f32.mrf.mxu0  ;;  %v3611_v51 = vpop.f32.mrf.mxu1  ;;  %v3904_v39 = vadd.f32 %v3808_v33, %v7463_v29 }
 0x360   : > { %v4260_v3 = vrot.slane %v4059_v37, 6  ;;  %v3809_v58 = vrot.slane %v3611_v51, 5 }
 0x361   : > { %v4579_v2 = vsel %vm4507_vm1, %v4471_v52, %v4543_v20  ;;  %v4472_v15 = vadd.f32 %v7642_v26, %v4357_v31  ;;  %v5897_v48 = vpop.f32.mrf.mxu0  ;;  %v5815_v10 = vpop.f32.mrf.mxu1 }
 0x362   : > { %4615 = vst [vmem:[%s7652_s20 + $0x40] sm:$0xff] %v4579_v2  ;;  %v4261_v25 = vsel %vm468_vm0, %v4258_v41, %v4260_v3  ;;  %v3810_v27 = vsel %vm3783_vm7, %v3807_v45, %v3809_v58 }
 0x363   : > { %vm4508_vm2 = vcmp.ge.f32.partialorder %v4472_v15, 0.0  ;;  %v4544_v16 = vmul.f32 0.1, %v4472_v15  ;;  %v4358_v21 = vadd.f32 %v4261_v25, %v3903_v12  ;;  %v4064_v59 = vpop.f32.mrf.mxu0  ;;  %v3616_v42 = vpop.f32.mrf.mxu1  ;;  %v3905_v29 = vadd.f32 %v3810_v27, %v7468_v17 }
 0x364   : > { %v4262_v18 = vrot.slane %v4064_v59, 6  ;;  %v3811_v7 = vrot.slane %v3616_v42, 5 }
 0x365   : > { %v4580_v40 = vsel %vm4508_vm2, %v4472_v15, %v4544_v16  ;;  %v4473_v24 = vadd.f32 %v7642_v26, %v4358_v21  ;;  %v5900_v50 = vpop.f32.mrf.mxu0  ;;  %v5818_v54 = vpop.f32.mrf.mxu1 }
 0x366   : > { %4616 = vst [vmem:[%s7652_s20 + $0x48] sm:$0xff] %v4580_v40  ;;  %v4263_v30 = vsel %vm468_vm0, %v4260_v3, %v4262_v18  ;;  %v3812_v63 = vsel %vm3783_vm7, %v3809_v58, %v3811_v7 }
 0x367   : > { %vm4509_vm3 = vcmp.ge.f32.partialorder %v4473_v24, 0.0  ;;  %v4545_v38 = vmul.f32 0.1, %v4473_v24  ;;  %v4359_v1 = vadd.f32 %v4263_v30, %v3904_v39  ;;  %v4067_v44 = vpop.f32.mrf.mxu0  ;;  %v3619_v41 = vpop.f32.mrf.mxu1  ;;  %v3906_v17 = vadd.f32 %v3812_v63, %v7481_v9 }
 0x368   : > { %v4264_v5 = vrot.slane %v4067_v44, 6  ;;  %v3813_v45 = vrot.slane %v3619_v41, 5 }
 0x369   : > { %v4581_v36 = vsel %vm4509_vm3, %v4473_v24, %v4545_v38  ;;  %v4474_v52 = vadd.f32 %v7642_v26, %v4359_v1  ;;  %v5901_v6 = vpop.f32.mrf.mxu0  ;;  %v5819_v35 = vpop.f32.mrf.mxu1 }
 0x36a   : > { %4617 = vst [vmem:[%s7652_s20 + $0x50] sm:$0xff] %v4581_v36  ;;  %v4265_v14 = vsel %vm468_vm0, %v4262_v18, %v4264_v5  ;;  %v3814_v48 = vsel %vm3783_vm7, %v3811_v7, %v3813_v45 }
 0x36b   : > { %vm4510_vm4 = vcmp.ge.f32.partialorder %v4474_v52, 0.0  ;;  %v4546_v20 = vmul.f32 0.1, %v4474_v52  ;;  %v4360_v31 = vadd.f32 %v4265_v14, %v3905_v29  ;;  %v4072_v37 = vpop.f32.mrf.mxu0  ;;  %v3624_v51 = vpop.f32.mrf.mxu1  ;;  %v3907_v9 = vadd.f32 %v3814_v48, %v7486_v0 }
 0x36c   : > { %v4266_v3 = vrot.slane %v4072_v37, 6  ;;  %v3815_v33 = vrot.slane %v3624_v51, 5 }
 0x36d   : > { %v4582_v12 = vsel %vm4510_vm4, %v4474_v52, %v4546_v20  ;;  %v4475_v2 = vadd.f32 %v7642_v26, %v4360_v31  ;;  %v5904_v15 = vpop.f32.mrf.mxu0  ;;  %v5822_v25 = vpop.f32.mrf.mxu1 }
 0x36e   : > { %4618 = vst [vmem:[%s7652_s20 + $0x58] sm:$0xff] %v4582_v12  ;;  %v4267_v58 = vsel %vm468_vm0, %v4264_v5, %v4266_v3  ;;  %v3816_v24 = vsel %vm3783_vm7, %v3813_v45, %v3815_v33 }
 0x36f   : > { %vm4511_vm5 = vcmp.ge.f32.partialorder %v4475_v2, 0.0  ;;  %v4547_v10 = vmul.f32 0.1, %v4475_v2  ;;  %v4361_v16 = vadd.f32 %v4267_v58, %v3906_v17  ;;  %v4075_v21 = vpop.f32.mrf.mxu0  ;;  %v3627_v59 = vpop.f32.mrf.mxu1  ;;  %v3908_v0 = vadd.f32 %v3816_v24, %v7499_v13 }
 0x370   : > { %v4268_v42 = vrot.slane %v4075_v21, 6  ;;  %v3817_v50 = vrot.slane %v3627_v59, 5 }
 0x371   : > { %v4583_v18 = vsel %vm4511_vm5, %v4475_v2, %v4547_v10  ;;  %v4476_v39 = vadd.f32 %v7642_v26, %v4361_v16  ;;  %v5905_v40 = vpop.f32.mrf.mxu0  ;;  %v5823_v7 = vpop.f32.mrf.mxu1 }
 0x372   : > { %4619 = vst [vmem:[%s7652_s20 + $0x60] sm:$0xff] %v4583_v18  ;;  %v4269_v27 = vsel %vm468_vm0, %v4266_v3, %v4268_v42  ;;  %v3818_v36 = vsel %vm3783_vm7, %v3815_v33, %v3817_v50 }
 0x373   : > { %vm4512_vm6 = vcmp.ge.f32.partialorder %v4476_v39, 0.0  ;;  %v4548_v30 = vmul.f32 0.1, %v4476_v39  ;;  %v4362_v54 = vadd.f32 %v4269_v27, %v3907_v9  ;;  %v4080_v38 = vpop.f32.mrf.mxu0  ;;  %v3632_v1 = vpop.f32.mrf.mxu1  ;;  %v3909_v13 = vadd.f32 %v3818_v36, %v7504_v19 }
 0x374   : > { %v4270_v44 = vrot.slane %v4080_v38, 6  ;;  %v3819_v52 = vrot.slane %v3632_v1, 5 }
 0x375   : > { %v4584_v41 = vsel %vm4512_vm6, %v4476_v39, %v4548_v30  ;;  %v4477_v5 = vadd.f32 %v7642_v26, %v4362_v54  ;;  %v5908_v29 = vpop.f32.mrf.mxu0  ;;  %v5826_v63 = vpop.f32.mrf.mxu1 }
 0x376   : > { %4620 = vst [vmem:[%s7652_s20 + $0x68] sm:$0xff] %v4584_v41  ;;  %v4271_v6 = vsel %vm468_vm0, %v4268_v42, %v4270_v44  ;;  %v3820_v17 = vsel %vm3783_vm7, %v3817_v50, %v3819_v52 }
 0x377   : > { %vm4513_vm8 = vcmp.ge.f32.partialorder %v4477_v5, 0.0  ;;  %v4549_v45 = vmul.f32 0.1, %v4477_v5  ;;  %v4363_v14 = vadd.f32 %v4271_v6, %v3908_v0  ;;  %v4083_v35 = vpop.f32.mrf.mxu0  ;;  %v3635_v20 = vpop.f32.mrf.mxu1  ;;  %v3910_v19 = vadd.f32 %v3820_v17, %v7516_v60 }
 0x378   : > { %v4272_v31 = vrot.slane %v4083_v35, 6  ;;  %v3821_v12 = vrot.slane %v3635_v20, 5 }
 0x379   : > { %v4585_v37 = vsel %vm4513_vm8, %v4477_v5, %v4549_v45  ;;  %v4478_v51 = vadd.f32 %v7642_v26, %v4363_v14  ;;  %v5909_v3 = vpop.f32.mrf.mxu0  ;;  %v5827_v15 = vpop.f32.mrf.mxu1 }
 0x37a   : > { %4621 = vst [vmem:[%s7652_s20 + $0x70] sm:$0xff] %v4585_v37  ;;  %v4273_v2 = vsel %vm468_vm0, %v4270_v44, %v4272_v31  ;;  %v3822_v42 = vsel %vm3783_vm7, %v3819_v52, %v3821_v12 }
 0x37b   : > { %vm4514_vm9 = vcmp.ge.f32.partialorder %v4478_v51, 0.0  ;;  %v4550_v48 = vmul.f32 0.1, %v4478_v51  ;;  %v4364_v33 = vadd.f32 %v4273_v2, %v3909_v13  ;;  %v4088_v58 = vpop.f32.mrf.mxu0  ;;  %v3640_v25 = vpop.f32.mrf.mxu1  ;;  %v3911_v60 = vadd.f32 %v3822_v42, %v7521_v34 }
 0x37c   : > { %v4274_v10 = vrot.slane %v4088_v58, 6  ;;  %v3823_v9 = vrot.slane %v3640_v25, 5 }
 0x37d   : > { %v4586_v16 = vsel %vm4514_vm9, %v4478_v51, %v4550_v48  ;;  %v4479_v21 = vadd.f32 %v7642_v26, %v4364_v33  ;;  %v5912_v59 = vpop.f32.mrf.mxu0  ;;  %v5830_v39 = vpop.f32.mrf.mxu1 }
 0x37e   : > { %4622 = vst [vmem:[%s7652_s20 + $0x78] sm:$0xff] %v4586_v16  ;;  %v4275_v18 = vsel %vm468_vm0, %v4272_v31, %v4274_v10  ;;  %v3824_v1 = vsel %vm3783_vm7, %v3821_v12, %v3823_v9 }
 0x37f   : > { %vm4515_vm10 = vcmp.ge.f32.partialorder %v4479_v21, 0.0  ;;  %v4551_v40 = vmul.f32 0.1, %v4479_v21  ;;  %v4365_v24 = vadd.f32 %v4275_v18, %v3910_v19  ;;  %v4091_v50 = vpop.f32.mrf.mxu0  ;;  %v3643_v27 = vpop.f32.mrf.mxu1  ;;  %v3912_v34 = vadd.f32 %v3824_v1, %v7533_v11 }
 0x380   : > { %v4276_v7 = vrot.slane %v4091_v50, 6  ;;  %v3825_v44 = vrot.slane %v3643_v27, 5 }
 0x381   : > { %v4587_v30 = vsel %vm4515_vm10, %v4479_v21, %v4551_v40  ;;  %v4480_v54 = vadd.f32 %v7642_v26, %v4365_v24  ;;  %v5913_v38 = vpop.f32.mrf.mxu0  ;;  %v5831_v41 = vpop.f32.mrf.mxu1 }
 0x382   : > { %4623 = vst [vmem:[%s7652_s20 + $0x80] sm:$0xff] %v4587_v30  ;;  %v4277_v0 = vsel %vm468_vm0, %v4274_v10, %v4276_v7  ;;  %v3826_v35 = vsel %vm3783_vm7, %v3823_v9, %v3825_v44 }
 0x383   : > { %vm4516_vm11 = vcmp.ge.f32.partialorder %v4480_v54, 0.0  ;;  %v4552_v5 = vmul.f32 0.1, %v4480_v54  ;;  %v4366_v29 = vadd.f32 %v4277_v0, %v3911_v60  ;;  %v4096_v36 = vpop.f32.mrf.mxu0  ;;  %v3648_v52 = vpop.f32.mrf.mxu1  ;;  %v3913_v11 = vadd.f32 %v3826_v35, %v7538_v46 }
 0x384   : > { %v4278_v6 = vrot.slane %v4096_v36, 6  ;;  %v3827_v20 = vrot.slane %v3648_v52, 5 }
 0x385   : > { %v4588_v63 = vsel %vm4516_vm11, %v4480_v54, %v4552_v5  ;;  %v4481_v45 = vadd.f32 %v7642_v26, %v4366_v29  ;;  %v5916_v14 = vpop.f32.mrf.mxu0  ;;  %v5834_v13 = vpop.f32.mrf.mxu1 }
 0x386   : > { %4624 = vst [vmem:[%s7652_s20 + $0x88] sm:$0xff] %v4588_v63  ;;  %v4279_v31 = vsel %vm468_vm0, %v4276_v7, %v4278_v6  ;;  %v3828_v33 = vsel %vm3783_vm7, %v3825_v44, %v3827_v20 }
 0x387   : > { %vm4517_vm12 = vcmp.ge.f32.partialorder %v4481_v45, 0.0  ;;  %v4553_v37 = vmul.f32 0.1, %v4481_v45  ;;  %v4367_v51 = vadd.f32 %v4279_v31, %v3912_v34  ;;  %v4099_v3 = vpop.f32.mrf.mxu0  ;;  %v3651_v17 = vpop.f32.mrf.mxu1  ;;  %v3914_v46 = vadd.f32 %v3828_v33, %v7550_v61 }
 0x388   : > { %v4280_v12 = vrot.slane %v4099_v3, 6  ;;  %v3829_v58 = vrot.slane %v3651_v17, 5 }
 0x389   : > { %v4589_v2 = vsel %vm4517_vm12, %v4481_v45, %v4553_v37  ;;  %v4482_v15 = vadd.f32 %v7642_v26, %v4367_v51  ;;  %v5917_v48 = vpop.f32.mrf.mxu0  ;;  %v5835_v10 = vpop.f32.mrf.mxu1 }
 0x38a   : > { %4625 = vst [vmem:[%s7652_s20 + $0x90] sm:$0xff] %v4589_v2  ;;  %v4281_v25 = vsel %vm468_vm0, %v4278_v6, %v4280_v12  ;;  %v3830_v40 = vsel %vm3783_vm7, %v3827_v20, %v3829_v58 }
 0x38b   : > { %vm4518_vm13 = vcmp.ge.f32.partialorder %v4482_v15, 0.0  ;;  %v4554_v19 = vmul.f32 0.1, %v4482_v15  ;;  %v4368_v16 = vadd.f32 %v4281_v25, %v3913_v11  ;;  %v4104_v21 = vpop.f32.mrf.mxu0  ;;  %v3656_v59 = vpop.f32.mrf.mxu1  ;;  %v3915_v61 = vadd.f32 %v3830_v40, %v7555_v55 }
 0x38c   : > { %v4282_v42 = vrot.slane %v4104_v21, 6  ;;  %v3831_v24 = vrot.slane %v3656_v59, 5 }
 0x38d   : > { %v4590_v9 = vsel %vm4518_vm13, %v4482_v15, %v4554_v19  ;;  %v4483_v18 = vadd.f32 %v7642_v26, %v4368_v16  ;;  %v5920_v39 = vpop.f32.mrf.mxu0  ;;  %v5838_v27 = vpop.f32.mrf.mxu1 }
 0x38e   : > { %4626 = vst [vmem:[%s7652_s20 + $0x98] sm:$0xff] %v4590_v9  ;;  %v4283_v50 = vsel %vm468_vm0, %v4280_v12, %v4282_v42  ;;  %v3832_v41 = vsel %vm3783_vm7, %v3829_v58, %v3831_v24 }
 0x38f   : > { %vm4519_vm14 = vcmp.ge.f32.partialorder %v4483_v18, 0.0  ;;  %v4555_v7 = vmul.f32 0.1, %v4483_v18  ;;  %v4369_v60 = vadd.f32 %v4283_v50, %v3914_v46  ;;  %v4107_v30 = vpop.f32.mrf.mxu0  ;;  %v3659_v54 = vpop.f32.mrf.mxu1  ;;  %v3916_v55 = vadd.f32 %v3832_v41, %v7567_v23 }
 0x390   : > { %v4284_v38 = vrot.slane %v4107_v30, 6  ;;  %v3833_v5 = vrot.slane %v3659_v54, 5 }
 0x391   : > { %v4591_v1 = vsel %vm4519_vm14, %v4483_v18, %v4555_v7  ;;  %v4484_v44 = vadd.f32 %v7642_v26, %v4369_v60  ;;  %v5921_v0 = vpop.f32.mrf.mxu0  ;;  %v5839_v36 = vpop.f32.mrf.mxu1 }
 0x392   : > { %4627 = vst [vmem:[%s7652_s20 + $0xa0] sm:$0xff] %v4591_v1  ;;  %v4285_v29 = vsel %vm468_vm0, %v4282_v42, %v4284_v38  ;;  %v3834_v31 = vsel %vm3783_vm7, %v3831_v24, %v3833_v5 }
 0x393   : > { %vm4520_vm15 = vcmp.ge.f32.partialorder %v4484_v44, 0.0  ;;  %v4556_v52 = vmul.f32 0.1, %v4484_v44  ;;  %v4370_v6 = vadd.f32 %v4285_v29, %v3915_v61  ;;  %v4112_v34 = vpop.f32.mrf.mxu0  ;;  %v3664_v63 = vpop.f32.mrf.mxu1  ;;  %v3917_v23 = vadd.f32 %v3834_v31, %v7572_v57 }
 0x394   : > { %v4286_v45 = vrot.slane %v4112_v34, 6  ;;  %v3835_v13 = vrot.slane %v3664_v63, 5 }
 0x395   : > { %v4592_v14 = vsel %vm4520_vm15, %v4484_v44, %v4556_v52  ;;  %v4485_v35 = vadd.f32 %v7642_v26, %v4370_v6  ;;  %v5924_v20 = vpop.f32.mrf.mxu0  ;;  %v5842_v51 = vpop.f32.mrf.mxu1 }
 0x396   : > { %4628 = vst [vmem:[%s7652_s20 + $0xa8] sm:$0xff] %v4592_v14  ;;  %v4287_v37 = vsel %vm468_vm0, %v4284_v38, %v4286_v45  ;;  %v3836_v58 = vsel %vm3783_vm7, %v3833_v5, %v3835_v13 }
 0x397   : > { %vm4521_vm1 = vcmp.ge.f32.partialorder %v4485_v35, 0.0  ;;  %v4557_v3 = vmul.f32 0.1, %v4485_v35  ;;  %v4371_v17 = vadd.f32 %v4287_v37, %v3916_v55  ;;  %v4115_v12 = vpop.f32.mrf.mxu0  ;;  %v3667_v11 = vpop.f32.mrf.mxu1  ;;  %v3918_v57 = vadd.f32 %v3836_v58, %v7584_v49 }
 0x398   : > { %v4288_v2 = vrot.slane %v4115_v12, 6  ;;  %v3837_v25 = vrot.slane %v3667_v11, 5 }
 0x399   : > { %v4593_v15 = vsel %vm4521_vm1, %v4485_v35, %v4557_v3  ;;  %v4486_v48 = vadd.f32 %v7642_v26, %v4371_v17  ;;  %v5925_v33 = vpop.f32.mrf.mxu0  ;;  %v5843_v19 = vpop.f32.mrf.mxu1 }
 0x39a   : > { %4629 = vst [vmem:[%s7652_s20 + $0xb0] sm:$0xff] %v4593_v15  ;;  %v4289_v10 = vsel %vm468_vm0, %v4286_v45, %v4288_v2  ;;  %v3838_v40 = vsel %vm3783_vm7, %v3835_v13, %v3837_v25 }
 0x39b   : > { %vm4522_vm2 = vcmp.ge.f32.partialorder %v4486_v48, 0.0  ;;  %v4558_v16 = vmul.f32 0.1, %v4486_v48  ;;  %v4372_v21 = vadd.f32 %v4289_v10, %v3917_v23  ;;  %v4120_v59 = vpop.f32.mrf.mxu0  ;;  %v3672_v42 = vpop.f32.mrf.mxu1  ;;  %v3919_v49 = vadd.f32 %v3838_v40, %v7589_v28 }
 0x39c   : > { %v4290_v46 = vrot.slane %v4120_v59, 6  ;;  %v3839_v24 = vrot.slane %v3672_v42, 5 }
 0x39d   : > { %v4594_v9 = vsel %vm4522_vm2, %v4486_v48, %v4558_v16  ;;  %v4487_v18 = vadd.f32 %v7642_v26, %v4372_v21  ;;  %v5928_v39 = vpop.f32.mrf.mxu0  ;;  %v5846_v27 = vpop.f32.mrf.mxu1 }
 0x39e   : > { %4630 = vst [vmem:[%s7652_s20 + $0xb8] sm:$0xff] %v4594_v9  ;;  %v4291_v50 = vsel %vm468_vm0, %v4288_v2, %v4290_v46  ;;  %v3840_v0 = vsel %vm3783_vm7, %v3837_v25, %v3839_v24 }
 0x39f   : > { %vm4523_vm3 = vcmp.ge.f32.partialorder %v4487_v18, 0.0  ;;  %v4559_v7 = vmul.f32 0.1, %v4487_v18  ;;  %v4373_v60 = vadd.f32 %v4291_v50, %v3918_v57  ;;  %v4123_v30 = vpop.f32.mrf.mxu0  ;;  %v3675_v54 = vpop.f32.mrf.mxu1  ;;  %v3920_v28 = vadd.f32 %v3840_v0, %v7599_v56 }
 0x3a0   : > { %v4292_v38 = vrot.slane %v4123_v30, 6  ;;  %v3841_v41 = vrot.slane %v3675_v54, 5 }
 0x3a1   : > { %v4595_v61 = vsel %vm4523_vm3, %v4487_v18, %v4559_v7  ;;  %v4488_v1 = vadd.f32 %v7642_v26, %v4373_v60  ;;  %v5929_v44 = vpop.f32.mrf.mxu0  ;;  %v5847_v29 = vpop.f32.mrf.mxu1 }
 0x3a2   : > { %4631 = vst [vmem:[%s7652_s20 + $0xc0] sm:$0xff] %v4595_v61  ;;  %v4293_v5 = vsel %vm468_vm0, %v4290_v46, %v4292_v38  ;;  %v3842_v35 = vsel %vm3783_vm7, %v3839_v24, %v3841_v41 }
 0x3a3   : > { %vm4524_vm4 = vcmp.ge.f32.partialorder %v4488_v1, 0.0  ;;  %v4560_v36 = vmul.f32 0.1, %v4488_v1  ;;  %v4374_v52 = vadd.f32 %v4293_v5, %v3919_v49  ;;  %v4128_v6 = vpop.f32.mrf.mxu0  ;;  %v3680_v34 = vpop.f32.mrf.mxu1  ;;  %v3921_v56 = vadd.f32 %v3842_v35, %v7604_v32 }
 0x3a4   : > { %v4294_v63 = vrot.slane %v4128_v6, 6  ;;  %v3843_v20 = vrot.slane %v3680_v34, 5 }
 0x3a5   : > { %v4596_v45 = vsel %vm4524_vm4, %v4488_v1, %v4560_v36  ;;  %v4489_v55 = vadd.f32 %v7642_v26, %v4374_v52  ;;  %v5932_v14 = vpop.f32.mrf.mxu0  ;;  %v5850_v13 = vpop.f32.mrf.mxu1 }
 0x3a6   : > { %4632 = vst [vmem:[%s7652_s20 + $0xc8] sm:$0xff] %v4596_v45  ;;  %v4295_v31 = vsel %vm468_vm0, %v4292_v38, %v4294_v63  ;;  %v3844_v15 = vsel %vm3783_vm7, %v3841_v41, %v3843_v20 }
 0x3a7   : > { %vm4525_vm5 = vcmp.ge.f32.partialorder %v4489_v55, 0.0  ;;  %v4561_v37 = vmul.f32 0.1, %v4489_v55  ;;  %v4375_v51 = vadd.f32 %v4295_v31, %v3920_v28  ;;  %v4131_v3 = vpop.f32.mrf.mxu0  ;;  %v3683_v17 = vpop.f32.mrf.mxu1  ;;  %v3922_v32 = vadd.f32 %v3844_v15, %v7610_v47 }
 0x3a8   : > { %v4296_v12 = vrot.slane %v4131_v3, 6  ;;  %v3845_v48 = vrot.slane %v3683_v17, 5 }
 0x3a9   : > { %v4597_v11 = vsel %vm4525_vm5, %v4489_v55, %v4561_v37  ;;  %v4490_v2 = vadd.f32 %v7642_v26, %v4375_v51  ;;  %v5933_v23 = vpop.f32.mrf.mxu0  ;;  %v5851_v58 = vpop.f32.mrf.mxu1 }
 0x3aa   : > { %4633 = vst [vmem:[%s7652_s20 + $0xd0] sm:$0xff] %v4597_v11  ;;  %v4297_v33 = vsel %vm468_vm0, %v4294_v63, %v4296_v12  ;;  %v3846_v57 = vsel %vm3783_vm7, %v3843_v20, %v3845_v48 }
 0x3ab   : > { %vm4526_vm6 = vcmp.ge.f32.partialorder %v4490_v2, 0.0  ;;  %v4562_v25 = vmul.f32 0.1, %v4490_v2  ;;  %v4376_v10 = vadd.f32 %v4297_v33, %v3921_v56  ;;  %v4136_v19 = vpop.f32.mrf.mxu0  ;;  %v3688_v16 = vpop.f32.mrf.mxu1  ;;  %v3923_v47 = vadd.f32 %v3846_v57, %v7615_v4 }
 0x3ac   : > { %v4298_v21 = vrot.slane %v4136_v19, 6  ;;  %v3847_v9 = vrot.slane %v3688_v16, 5 }
 0x3ad   : > { %v4598_v59 = vsel %vm4526_vm6, %v4490_v2, %v4562_v25  ;;  %v4491_v42 = vadd.f32 %v7642_v26, %v4376_v10  ;;  %v5936_v46 = vpop.f32.mrf.mxu0  ;;  %v5854_v39 = vpop.f32.mrf.mxu1 }
 0x3ae   : > { %4634 = vst [vmem:[%s7652_s20 + $0xd8] sm:$0xff] %v4598_v59  ;;  %v4299_v18 = vsel %vm468_vm0, %v4296_v12, %v4298_v21  ;;  %v3848_v38 = vsel %vm3783_vm7, %v3845_v48, %v3847_v9 }
 0x3af   : > { %vm4527_vm8 = vcmp.ge.f32.partialorder %v4491_v42, 0.0  ;;  %v4563_v40 = vmul.f32 0.1, %v4491_v42  ;;  %v4377_v24 = vadd.f32 %v4299_v18, %v3922_v32  ;;  %v4139_v50 = vpop.f32.mrf.mxu0  ;;  %v3691_v27 = vpop.f32.mrf.mxu1  ;;  %v3924_v4 = vadd.f32 %v3848_v38, %v7620_v8 }
 0x3b0   : > { %v4300_v7 = vrot.slane %v4139_v50, 6  ;;  %v3849_v49 = vrot.slane %v3691_v27, 5 }
 0x3b1   : > { %v4599_v60 = vsel %vm4527_vm8, %v4491_v42, %v4563_v40  ;;  %v4492_v30 = vadd.f32 %v7642_v26, %v4377_v24  ;;  %v5937_v54 = vpop.f32.mrf.mxu0  ;;  %v5855_v1 = vpop.f32.mrf.mxu1 }
 0x3b2   : > { %4635 = vst [vmem:[%s7652_s20 + $0xe0] sm:$0xff] %v4599_v60  ;;  %v4301_v61 = vsel %vm468_vm0, %v4298_v21, %v4300_v7  ;;  %v3850_v34 = vsel %vm3783_vm7, %v3847_v9, %v3849_v49 }
 0x3b3   : > { %vm4528_vm9 = vcmp.ge.f32.partialorder %v4492_v30, 0.0  ;;  %v4564_v44 = vmul.f32 0.1, %v4492_v30  ;;  %v4378_v0 = vadd.f32 %v4301_v61, %v3923_v47  ;;  %v4144_v41 = vpop.f32.mrf.mxu0  ;;  %v3696_v5 = vpop.f32.mrf.mxu1  ;;  %v3925_v8 = vadd.f32 %v3850_v34, %v7624_v22 }
 0x3b4   : > { %v4302_v29 = vrot.slane %v4144_v41, 6  ;;  %v3851_v63 = vrot.slane %v3696_v5, 5 }
 0x3b5   : > { %v4600_v36 = vsel %vm4528_vm9, %v4492_v30, %v4564_v44  ;;  %v4493_v52 = vadd.f32 %v7642_v26, %v4378_v0  ;;  %v5940_v6 = vpop.f32.mrf.mxu0  ;;  %v5858_v45 = vpop.f32.mrf.mxu1 }
 0x3b6   : > { %4636 = vst [vmem:[%s7652_s20 + $0xe8] sm:$0xff] %v4600_v36  ;;  %v4303_v28 = vsel %vm468_vm0, %v4300_v7, %v4302_v29  ;;  %v3852_v3 = vsel %vm3783_vm7, %v3849_v49, %v3851_v63 }
 0x3b7   : > { %vm4529_vm10 = vcmp.ge.f32.partialorder %v4493_v52, 0.0  ;;  %v4565_v55 = vmul.f32 0.1, %v4493_v52  ;;  %v4379_v14 = vadd.f32 %v4303_v28, %v3924_v4  ;;  %v4147_v35 = vpop.f32.mrf.mxu0  ;;  %v3699_v20 = vpop.f32.mrf.mxu1  ;;  %v3926_v22 = vadd.f32 %v3852_v3, %v7627_v43 }
 0x3b8   : > { %v4304_v31 = vrot.slane %v4147_v35, 6  ;;  %v3853_v17 = vrot.slane %v3699_v20, 5 }
 0x3b9   : > { %v4601_v13 = vsel %vm4529_vm10, %v4493_v52, %v4565_v55  ;;  %v4494_v37 = vadd.f32 %v7642_v26, %v4379_v14  ;;  %v5941_v51 = vpop.f32.mrf.mxu0  ;;  %v5859_v56 = vpop.f32.mrf.mxu1 }
 0x3ba   : > { %4637 = vst [vmem:[%s7652_s20 + $0xf0] sm:$0xff] %v4601_v13  ;;  %v4305_v12 = vsel %vm468_vm0, %v4302_v29, %v4304_v31  ;;  %v3854_v10 = vsel %vm3783_vm7, %v3851_v63, %v3853_v17 }
 0x3bb   : > { %vm4530_vm11 = vcmp.ge.f32.partialorder %v4494_v37, 0.0  ;;  %v4566_v11 = vmul.f32 0.1, %v4494_v37  ;;  %v4380_v2 = vadd.f32 %v4305_v12, %v3925_v8  ;;  %v4152_v23 = vpop.f32.mrf.mxu0  ;;  %v3704_v15 = vpop.f32.mrf.mxu1  ;;  %v3927_v43 = vadd.f32 %v3854_v10, %v7630_v53 }
 0x3bc   : > { %v4306_v48 = vrot.slane %v4152_v23, 6  ;;  %v3855_v19 = vrot.slane %v3704_v15, 5 }
 0x3bd   : > { %v4602_v33 = vsel %vm4530_vm11, %v4494_v37, %v4566_v11  ;;  %v4495_v58 = vadd.f32 %v7642_v26, %v4380_v2  ;;  %v5944_v25 = vpop.f32.mrf.mxu0  ;;  %v5862_v21 = vpop.f32.mrf.mxu1 }
 0x3be   : > { %4638 = vst [vmem:[%s7652_s20 + $0xf8] sm:$0xff] %v4602_v33  ;;  %v4307_v16 = vsel %vm468_vm0, %v4304_v31, %v4306_v48  ;;  %v3856_v40 = vsel %vm3783_vm7, %v3853_v17, %v3855_v19 }
 0x3bf   : > { %vm4531_vm12 = vcmp.ge.f32.partialorder %v4495_v58, 0.0  ;;  %v4567_v32 = vmul.f32 0.1, %v4495_v58  ;;  %v4381_v59 = vadd.f32 %v4307_v16, %v3926_v22  ;;  %v4155_v42 = vpop.f32.mrf.mxu0  ;;  %v3707_v46 = vpop.f32.mrf.mxu1  ;;  %v3928_v30 = vadd.f32 %v3856_v40, %v7633_v62 }
 0x3c0   : > { %v4308_v57 = vrot.slane %v4155_v42, 6 }
 0x3c1   : > { %v4603_v9 = vsel %vm4531_vm12, %v4495_v58, %v4567_v32  ;;  %v4496_v18 = vadd.f32 %v7642_v26, %v4381_v59  ;;  %v5945_v39 = vpop.f32.mrf.mxu0  ;;  %v5863_v50 = vpop.f32.mrf.mxu1  ;;  %v6029_v26 = vld [vmem:[%s7838_s2] ss:$0 sm:$0xff] }
 0x3c2   : > { %4639 = vst [vmem:[%s7652_s20 + $0x100] sm:$0xff] %v4603_v9  ;;  %v4309_v24 = vsel %vm468_vm0, %v4306_v48, %v4308_v57 }
 0x3c3   : > { %vm4532_vm13 = vcmp.ge.f32.partialorder %v4496_v18, 0.0  ;;  %v4568_v27 = vmul.f32 0.1, %v4496_v18  ;;  %v4382_v7 = vadd.f32 %v4309_v24, %v3927_v43  ;;  %v4160_v47 = vpop.f32.mrf.mxu0 }
 0x3c4   : > { %v4310_v60 = vrot.slane %v4160_v47, 6 }
 0x3c5   : > { %v4604_v53 = vsel %vm4532_vm13, %v4496_v18, %v4568_v27  ;;  %v4497_v54 = vadd.f32 %v6029_v26, %v4382_v7  ;;  %v5948_v38 = vpop.f32.mrf.mxu0 }
 0x3c6   : > { %4640 = vst [vmem:[%s7652_s20 + $0x108] sm:$0xff] %v4604_v53  ;;  %v4311_v49 = vsel %vm468_vm0, %v4308_v57, %v4310_v60 }
 0x3c7   : > { %vm4533_vm7 = vcmp.ge.f32.partialorder %v4497_v54, 0.0  ;;  %v4569_v61 = vmul.f32 0.1, %v4497_v54  ;;  %v4383_v1 = vadd.f32 %v4311_v49, %v3928_v30  ;;  %v4163_v44 = vpop.f32.mrf.mxu0 }
 0x3c9   : > { %v4605_v0 = vsel %vm4533_vm7, %v4497_v54, %v4569_v61  ;;  %v4498_v41 = vadd.f32 %v6029_v26, %v4383_v1  ;;  %v5949_v5 = vpop.f32.mrf.mxu0 }
 0x3ca   : > { %4641 = vst [vmem:[%s7652_s20 + $0x110] sm:$0xff] %v4605_v0 }
 0x3cb   : > { %vm4534_vm14 = vcmp.ge.f32.partialorder %v4498_v41, 0.0  ;;  %v4570_v62 = vmul.f32 0.1, %v4498_v41 }
 0x3cd   : > { %v4606_v29 = vsel %vm4534_vm14, %v4498_v41, %v4570_v62 }
 0x3ce   : > { %4642 = vst [vmem:[%s7652_s20 + $0x118] sm:$0xff] %v4606_v29 }
 0x3cf PF: > { %s13_s14 = sadd.s32 1, %s6052_s14   ;;  %s7895_s12 = smov %s6048_s13 }
 0x3d0   : > { %p10_p5 = scmp.ge.s32.totalorder %s13_s14, 4   ;;  %s7896_s13 = smov %s7898_s15 }
 0x3d2   :  { %12 = sbr.rel (!%p10_p5) target bundleno = 2 (0x2), region = 76 }

</bundles_post_ra>
